<compile_context>
chip_gen: v5e
topology: v5e:2x2
jax: 0.10.0
libtpu: 0.0.40
codegen_flags: <defaults>
</compile_context>

<pallas_src>
import functools

import jax
import jax.numpy as jnp
from jax.experimental import pallas as pl
from jax.experimental.pallas import tpu as pltpu

HIDDEN = 200          # classifier hidden width in the PyTorch module
HIDDEN_PAD = 256      # lane-friendly padded hidden width
OUT_LANES = 128       # lane-dense width of the fused tail stages + output slab


def _spatial_attn_kernel(patches_ref, w_emb_ref, b_emb_ref, tmplT_ref,
                         wf_ref, bfu_ref, wbd2_ref, b2p_ref, wbd3_ref,
                         wc4p_ref, a0_ref, a1_ref, tokp_ref, seg_ref,
                         blk_ref, b3p_ref, out_ref, *, bt, n_tokens):
    f32 = jnp.float32
    bf16 = jnp.bfloat16

    # ---- backbone ----
    # TODO(synk): Xception backbone definition not provided; surrogate = linear
    # patch embedding.
    bb = jnp.dot(patches_ref[...], w_emb_ref[...],
                 preferred_element_type=f32) + b_emb_ref[...]           # (R, E) f32

    # ---- long-distance attention maps (softmax over tokens, per template) ----
    # TODO(synk): LongDistanceAttention (ViT) definition not provided; surrogate
    # = template/token similarity softmaxed over the tokens of each image.
    # 1/sqrt(E) is pre-folded into tmplT.
    s = jnp.dot(bb.astype(bf16), tmplT_ref[...],
                preferred_element_type=f32)                             # (R, L)
    # Per-template max over all rows of this block.  It is constant across the
    # tokens of every image, so the token-softmax is mathematically unchanged,
    # and it avoids any (bt, N, L) reshape / axis-1 segment reduce.
    m = jnp.max(s, axis=0, keepdims=True)                               # (1, L)
    e = jnp.exp(s - m)                                                  # (R, L)
    # Segment-sum over the tokens of each image as one MXU pass with a
    # block-diagonal matrix of ones (review: block-matrix segment reduce).
    denom = jnp.dot(blk_ref[...], e.astype(bf16),
                    preferred_element_type=f32)                         # (R, L)
    lda = e * pl.reciprocal(denom, approx=True)
    scale = jnp.sum(lda, axis=-1, keepdims=True)                        # (R, 1)

    # einsum('ijk,ilj->iljk') followed by einsum('iljk->ijk') == bb * sum_l lda.
    # bb (f32) is dead after this line (live-range trim).
    scaled_bf = (bb * scale).astype(bf16)                               # (R, E)

    # ---- fused classifier-Linear(200)+ReLU / localizer-conv1+ReLU ----
    hfull = jnp.maximum(
        jnp.dot(scaled_bf, wf_ref[...], preferred_element_type=f32)
        + bfu_ref[...], 0.0)                                            # (R, 384)
    hfull_bf = hfull.astype(bf16)   # cast immediately; f32 copy dies here

    # ---- fused classifier-Linear(2) / localizer-conv2 (block-diagonal) ----
    # lanes 0:2 = relu(h2) (ReLU after Flatten == elementwise ReLU),
    # lanes 2:2+E/8 = relu(l1 @ wc2).
    f2 = jnp.maximum(
        jnp.dot(hfull_bf, wbd2_ref[...], preferred_element_type=f32)
        + b2p_ref[...], 0.0)                                            # (R, 128)
    f2_bf = f2.astype(bf16)

    # ---- classifier pass-through + localizer conv3+ReLU (block-diagonal) ----
    # lanes 0:2 = relu(h2) (identity pass-through; ReLU idempotent on >=0),
    # lanes 2:2+E/32 = l3 = relu(l2 @ wc3).
    f3 = jnp.maximum(
        jnp.dot(f2_bf, wbd3_ref[...], preferred_element_type=f32), 0.0)  # (R, 128)

    # localizer conv4 (1x1, no bias): per-row contraction with wc4 placed on the
    # l3 lanes (zeros elsewhere) -> full-width multiply + lane reduce, no slice.
    srow = jnp.sum(f3 * wc4p_ref[...], axis=-1, keepdims=True)          # (R, 1)

    # Right-hand side of the final segment matmul:
    #   lanes 0:2   = per-token classifier contributions h2 * w3[2n]/w3[2n+1]
    #   lane  2+n   = localizer logit of this row's token (one-hot scatter)
    rhs = (f3[:, 0:1] * a0_ref[...] + f3[:, 1:2] * a1_ref[...]
           + srow * tokp_ref[...])                                      # (R, 128)

    # One lane-dense MXU pass does BOTH the classifier token-sum and the
    # localizer (row -> token lane) scatter (review: block-matrix on the MXU).
    tail = jnp.dot(seg_ref[...], rhs.astype(bf16),
                   preferred_element_type=f32)                          # (bt, 128)

    # Build the whole output slab in registers and store it with ONE unmasked
    # full-width (bt, 128) store (review: lane-dense output store).
    lane = jax.lax.broadcasted_iota(jnp.int32, (bt, OUT_LANES), 1)
    slab = jnp.where(lane < 2, tail + b3p_ref[...],
                     jnp.where(lane < 2 + n_tokens,
                               jax.nn.sigmoid(tail), 0.0))
    out_ref[...] = slab


def init_params(key, *, in_chans=3, patch_size=16, embed_dim=128,
                num_forg_template=3, num_patches=16, hidden=HIDDEN):
    P, E = patch_size, embed_dim
    d_in = in_chans * P * P
    ks = jax.random.split(key, 13)
    s = 0.02
    f32 = jnp.float32
    return dict(
        w_emb=jax.random.normal(ks[0], (d_in, E), f32) * s,
        b_emb=jax.random.normal(ks[1], (1, E), f32) * 0.1,
        tmpl=jax.random.normal(ks[2], (num_forg_template, E), f32),
        w1=jax.random.normal(ks[3], (E, hidden), f32) * s,
        b1=jax.random.normal(ks[4], (1, hidden), f32) * 0.1,
        w2=jax.random.normal(ks[5], (hidden, 2), f32) * s,
        b2=jax.random.normal(ks[6], (1, 2), f32) * 0.1,
        w3=jax.random.normal(ks[7], (2 * num_patches, 2), f32) * s,
        b3=jax.random.normal(ks[8], (1, 2), f32) * 0.1,
        wc1=jax.random.normal(ks[9], (E, E // 4), f32) * s,
        wc2=jax.random.normal(ks[10], (E // 4, E // 8), f32) * s,
        wc3=jax.random.normal(ks[11], (E // 8, E // 32), f32) * s,
        wc4=jax.random.normal(ks[12], (E // 32, 1), f32) * s,
    )


def pick_batch_block(batch, n_tokens):
    """Choose the per-step batch chunk (review items 2-4).

    Target ~256 MXU rows per grid step (fills v6e/v7x's 2x256x256 MXU; v5e just
    takes two row passes), keep the f32 out-block rule (bt % 8 == 0) and the
    bf16 patches rule (bt * N % 16 == 0).  With B=16/N=16 this gives bt=16 and
    a single grid step; with B>=32 the grid length is >=2 so both v7x
    TensorCores get work under dimension_semantics=("parallel",).
    """
    target = max(8, min(256 // max(n_tokens, 1), ((batch + 7) // 8) * 8))
    bt = max(8, (target // 8) * 8)
    while (bt * n_tokens) % 16 != 0:      # bf16 sublane packing on the patches
        bt += 8
    return bt


def prepare_params(params, *, n_tokens, batch_block):
    """One-time weight preprocessing (hoisted out of the forward path)."""
    f32, bf16 = jnp.float32, jnp.bfloat16
    E, hidden = params["w1"].shape
    lc1 = params["wc1"].shape[1]          # E // 4
    lc2 = params["wc2"].shape[1]          # E // 8
    lc3 = params["wc3"].shape[1]          # E // 32
    N, bt = n_tokens, batch_block
    R = bt * N
    assert hidden <= HIDDEN_PAD
    assert 2 + N <= OUT_LANES, "token count must fit the 128-lane output slab"
    assert 2 + lc2 <= OUT_LANES and 2 + lc3 <= OUT_LANES

    # fused stage-1 weight: [classifier Linear(200) padded to 256 | localizer conv1]
    w1p = jnp.pad(params["w1"], ((0, 0), (0, HIDDEN_PAD - hidden)))
    b1p = jnp.pad(params["b1"], ((0, 0), (0, HIDDEN_PAD - hidden)))
    wf = jnp.concatenate([w1p, params["wc1"]], axis=1)
    bfu = jnp.concatenate([b1p, jnp.zeros((1, lc1), f32)], axis=1)
    lane_pad = (-wf.shape[1]) % 128
    wf = jnp.pad(wf, ((0, 0), (0, lane_pad)))                            # (E, 384)
    bfu = jnp.pad(bfu, ((0, 0), (0, lane_pad)))
    hf_w = wf.shape[1]

    # fused stage-2 block-diagonal weight: classifier Linear(2) (rows 0:256 ->
    # lanes 0:2) and localizer conv2 (rows 256:256+E/4 -> lanes 2:2+E/8).
    w2p = jnp.pad(params["w2"], ((0, HIDDEN_PAD - hidden), (0, 0)))      # (256, 2)
    wbd2 = jnp.zeros((hf_w, OUT_LANES), f32)
    wbd2 = wbd2.at[:HIDDEN_PAD, 0:2].set(w2p)
    wbd2 = wbd2.at[HIDDEN_PAD:HIDDEN_PAD + lc1, 2:2 + lc2].set(params["wc2"])
    b2p = jnp.zeros((1, OUT_LANES), f32).at[:, 0:2].set(params["b2"])

    # fused stage-3 block-diagonal weight: 2-lane identity pass-through of the
    # classifier and localizer conv3 (rows 2:2+E/8 -> lanes 2:2+E/32).
    wbd3 = jnp.zeros((OUT_LANES, OUT_LANES), f32)
    wbd3 = wbd3.at[0, 0].set(1.0).at[1, 1].set(1.0)
    wbd3 = wbd3.at[2:2 + lc2, 2:2 + lc3].set(params["wc3"])

    # localizer conv4 weight scattered onto the l3 lanes (zeros elsewhere).
    wc4p = jnp.zeros((1, OUT_LANES), f32).at[:, 2:2 + lc3].set(params["wc4"][:, 0])

    # per-row classifier weights: row r = b*N + n pairs with w3[2n] / w3[2n+1]
    # (the Flatten interleaving), tiled over the bt batch elements of a block.
    w3e = jnp.tile(params["w3"][0::2], (bt, 1))                          # (R, 2)
    w3o = jnp.tile(params["w3"][1::2], (bt, 1))
    a0 = jnp.zeros((R, OUT_LANES), f32).at[:, 0:2].set(w3e)
    a1 = jnp.zeros((R, OUT_LANES), f32).at[:, 0:2].set(w3o)

    # token one-hot scatter (row r -> lane 2 + r % N) and segment matrices.
    tokp = jnp.zeros((R, OUT_LANES), f32)
    tokp = tokp.at[:, 2:2 + N].set(jnp.tile(jnp.eye(N, dtype=f32), (bt, 1)))
    seg = jnp.repeat(jnp.eye(bt, dtype=f32), N, axis=1)                  # (bt, R)
    blk = jnp.kron(jnp.eye(bt, dtype=f32), jnp.ones((N, N), f32))        # (R, R)

    b3p = jnp.zeros((1, OUT_LANES), f32).at[:, 0:2].set(params["b3"])

    return dict(
        w_emb=params["w_emb"].astype(bf16),
        b_emb=params["b_emb"].astype(f32),
        # fold 1/sqrt(E) into the template weight (review item: pre-scale).
        tmplT=(params["tmpl"].T * (1.0 / (E ** 0.5))).astype(bf16),      # (E, L)
        wf=wf.astype(bf16), bfu=bfu.astype(f32),
        wbd2=wbd2.astype(bf16), b2p=b2p,
        wbd3=wbd3.astype(bf16),
        wc4p=wc4p,
        a0=a0, a1=a1, tokp=tokp,
        seg=seg.astype(bf16), blk=blk.astype(bf16),
        b3p=b3p,
    )


def _extract_patches(x, patch_size):
    B, C, H, W = x.shape
    P = patch_size
    nh, nw = H // P, W // P
    # matches x.unfold(2,P,P).unfold(3,P,P).permute(0,2,3,1,4,5).view(-1,C,P,P)
    patches = x.reshape(B, C, nh, P, nw, P).transpose(0, 2, 4, 1, 3, 5)
    return patches.reshape(B, nh * nw, C * P * P)


def _full_spec(a):
    nd = a.ndim
    return pl.BlockSpec(a.shape, lambda g, _nd=nd: (0,) * _nd)


def spatial_attention_forward(x, prep, patch_size=16):
    B, C, H, W = x.shape
    P = patch_size
    N = (H // P) * (W // P)
    d_in = C * P * P
    bt, R = prep["seg"].shape
    assert R == bt * N, "prepared geometry does not match the input token count"

    # TODO(synk): the 6-D unfold/transpose stays in XLA (one fused transpose+cast
    # pass); pulling it into the kernel is not cleanly lowerable.  If xprof shows
    # it un-fused, consider CompilerParams(allow_input_fusion=...).
    patches = _extract_patches(x, P).astype(jnp.bfloat16)                # (B, N, d_in)
    b_pad = ((B + bt - 1) // bt) * bt
    if b_pad != B:
        patches = jnp.pad(patches, ((0, b_pad - B), (0, 0), (0, 0)))
    patches = patches.reshape(b_pad * N, d_in)                           # batch in rows

    weight_names = ("w_emb", "b_emb", "tmplT", "wf", "bfu", "wbd2", "b2p",
                    "wbd3", "wc4p", "a0", "a1", "tokp", "seg", "blk", "b3p")
    weight_args = tuple(prep[k] for k in weight_names)

    kernel = functools.partial(_spatial_attn_kernel, bt=bt, n_tokens=N)

    # Weights have constant index maps so they are fetched once; VMEM is far
    # from binding here (~1-2 MiB of weights/constants vs 32 MiB scoped), so we
    # keep the default buffering (pl.Buffered(1) would only be a minor win).
    in_specs = ([pl.BlockSpec((bt * N, d_in), lambda g: (g, 0))]
                + [_full_spec(a) for a in weight_args])
    out_specs = pl.BlockSpec((bt, OUT_LANES), lambda g: (g, 0))
    out_shape = jax.ShapeDtypeStruct((b_pad, OUT_LANES), jnp.float32)

    out = pl.pallas_call(
        kernel,
        grid=(b_pad // bt,),
        in_specs=in_specs,
        out_specs=out_specs,
        out_shape=out_shape,
        compiler_params=pltpu.CompilerParams(
            dimension_semantics=("parallel",)),   # v7x: batch chunks across 2 TCs
    )(patches, *weight_args)

    cls = out[:B, 0:2]
    patch = out[:B, 2:2 + N]
    return cls, patch


def reference_forward(x, params, patch_size=16):
    """Pure-JAX f32 reference mirroring the (surrogated) forward semantics."""
    B = x.shape[0]
    patches = _extract_patches(x, patch_size).astype(jnp.float32)
    bb = patches @ params["w_emb"] + params["b_emb"]                     # (B, N, E)
    E = bb.shape[-1]
    scores = jnp.einsum("le,bne->bln", params["tmpl"], bb) * (1.0 / (E ** 0.5))
    lda = jax.nn.softmax(scores, axis=-1)                                # (B, L, N)
    scaled4 = jnp.einsum("ijk,ilj->iljk", bb, lda)
    scaled = jnp.einsum("iljk->ijk", scaled4)                            # (B, N, E)
    h1 = jax.nn.relu(scaled @ params["w1"] + params["b1"])
    h2 = h1 @ params["w2"] + params["b2"]                                # (B, N, 2)
    flat = jax.nn.relu(h2.reshape(B, -1))                                # (B, 2N)
    cls = flat @ params["w3"] + params["b3"]                             # (B, 2)
    l1 = jax.nn.relu(scaled @ params["wc1"])
    l2 = jax.nn.relu(l1 @ params["wc2"])
    l3 = jax.nn.relu(l2 @ params["wc3"])
    patch = jax.nn.sigmoid(l3 @ params["wc4"])[..., 0]                   # (B, N)
    return cls, patch


if __name__ == "__main__":
    key = jax.random.PRNGKey(0)
    B, C, H, W = 16, 3, 64, 64
    P, E = 16, 128
    N = (H // P) * (W // P)   # 16 patches per image

    kx, kp = jax.random.split(key)
    x = jax.random.normal(kx, (B, C, H, W), jnp.float32)
    params = init_params(kp, in_chans=C, patch_size=P, embed_dim=E,
                         num_forg_template=3, num_patches=N, hidden=HIDDEN)

    bt = pick_batch_block(B, N)           # -> 16 (256 MXU rows, single grid step)
    prep = prepare_params(params, n_tokens=N, batch_block=bt)  # hoisted, run once

    fwd = jax.jit(functools.partial(spatial_attention_forward, patch_size=P))
    cls, patch = fwd(x, prep)
    (cls, patch) = jax.block_until_ready((cls, patch))

    rcls, rpatch = reference_forward(x, params, patch_size=P)
    assert cls.shape == (B, 2) and patch.shape == (B, N)
    # bf16 weights/activations in the kernel vs f32 reference -> loose tolerance
    assert jnp.allclose(cls, rcls, atol=2e-2, rtol=2e-2), \
        float(jnp.max(jnp.abs(cls - rcls)))
    assert jnp.allclose(patch, rpatch, atol=2e-2, rtol=2e-2), \
        float(jnp.max(jnp.abs(patch - rpatch)))
    print("KERNEL_OK")
</pallas_src>

<mosaic_0001>
module attributes {stable_mosaic.version = 11 : i64} {
  func.func @_spatial_attn_kernel(%arg0: i32, %arg1: memref<256x768xbf16, #tpu.memory_space<vmem>>, %arg2: memref<768x128xbf16, #tpu.memory_space<vmem>>, %arg3: memref<1x128xf32, #tpu.memory_space<vmem>>, %arg4: memref<128x3xbf16, #tpu.memory_space<vmem>>, %arg5: memref<128x384xbf16, #tpu.memory_space<vmem>>, %arg6: memref<1x384xf32, #tpu.memory_space<vmem>>, %arg7: memref<384x128xbf16, #tpu.memory_space<vmem>>, %arg8: memref<1x128xf32, #tpu.memory_space<vmem>>, %arg9: memref<128x128xbf16, #tpu.memory_space<vmem>>, %arg10: memref<1x128xf32, #tpu.memory_space<vmem>>, %arg11: memref<256x128xf32, #tpu.memory_space<vmem>>, %arg12: memref<256x128xf32, #tpu.memory_space<vmem>>, %arg13: memref<256x128xf32, #tpu.memory_space<vmem>>, %arg14: memref<16x256xbf16, #tpu.memory_space<vmem>>, %arg15: memref<256x256xbf16, #tpu.memory_space<vmem>>, %arg16: memref<1x128xf32, #tpu.memory_space<vmem>>, %arg17: memref<16x128xf32, #tpu.memory_space<vmem>>) attributes {dimension_semantics = [#tpu.dimension_semantics<parallel>], iteration_bounds = array<i64: 1>, scalar_prefetch = 0 : i64, scratch_operands = 0 : i64, tpu.core_type = #tpu.core_type<tc>, window_params = [{transform_indices = @transform_0, window_bounds = array<i64: 256, 768>}, {pipeline_mode = #tpu.pipeline_mode<synchronous>, transform_indices = @transform_1, window_bounds = array<i64: 768, 128>}, {pipeline_mode = #tpu.pipeline_mode<synchronous>, transform_indices = @transform_2, window_bounds = array<i64: 1, 128>}, {pipeline_mode = #tpu.pipeline_mode<synchronous>, transform_indices = @transform_3, window_bounds = array<i64: 128, 3>}, {pipeline_mode = #tpu.pipeline_mode<synchronous>, transform_indices = @transform_4, window_bounds = array<i64: 128, 384>}, {pipeline_mode = #tpu.pipeline_mode<synchronous>, transform_indices = @transform_5, window_bounds = array<i64: 1, 384>}, {pipeline_mode = #tpu.pipeline_mode<synchronous>, transform_indices = @transform_6, window_bounds = array<i64: 384, 128>}, {pipeline_mode = #tpu.pipeline_mode<synchronous>, transform_indices = @transform_7, window_bounds = array<i64: 1, 128>}, {pipeline_mode = #tpu.pipeline_mode<synchronous>, transform_indices = @transform_8, window_bounds = array<i64: 128, 128>}, {pipeline_mode = #tpu.pipeline_mode<synchronous>, transform_indices = @transform_9, window_bounds = array<i64: 1, 128>}, {pipeline_mode = #tpu.pipeline_mode<synchronous>, transform_indices = @transform_10, window_bounds = array<i64: 256, 128>}, {pipeline_mode = #tpu.pipeline_mode<synchronous>, transform_indices = @transform_11, window_bounds = array<i64: 256, 128>}, {pipeline_mode = #tpu.pipeline_mode<synchronous>, transform_indices = @transform_12, window_bounds = array<i64: 256, 128>}, {pipeline_mode = #tpu.pipeline_mode<synchronous>, transform_indices = @transform_13, window_bounds = array<i64: 16, 256>}, {pipeline_mode = #tpu.pipeline_mode<synchronous>, transform_indices = @transform_14, window_bounds = array<i64: 256, 256>}, {pipeline_mode = #tpu.pipeline_mode<synchronous>, transform_indices = @transform_15, window_bounds = array<i64: 1, 128>}, {transform_indices = @transform_16, window_bounds = array<i64: 16, 128>}]} {
    %c0 = arith.constant 0 : index
    %c0_0 = arith.constant 0 : index
    %0 = vector.load %arg1[%c0, %c0_0] : memref<256x768xbf16, #tpu.memory_space<vmem>>, vector<256x768xbf16>
    %c0_1 = arith.constant 0 : index
    %c0_2 = arith.constant 0 : index
    %1 = vector.load %arg2[%c0_1, %c0_2] : memref<768x128xbf16, #tpu.memory_space<vmem>>, vector<768x128xbf16>
    %cst = arith.constant dense<0.000000e+00> : vector<256x128xf32>
    %2 = tpu.matmul %0, %1, %cst {dimension_numbers = #tpu.dot_dimension_numbers<[1], [0], [0], [1], [0, 0, 1, 1], [], []>} : vector<256x768xbf16>, vector<768x128xbf16>, vector<256x128xf32> -> vector<256x128xf32>
    %c0_3 = arith.constant 0 : index
    %c0_4 = arith.constant 0 : index
    %3 = vector.load %arg3[%c0_3, %c0_4] : memref<1x128xf32, #tpu.memory_space<vmem>>, vector<1x128xf32>
    %4 = vector.broadcast %3 : vector<1x128xf32> to vector<256x128xf32>
    %5 = arith.addf %2, %4 : vector<256x128xf32>
    %6 = arith.truncf %5 : vector<256x128xf32> to vector<256x128xbf16>
    %c0_5 = arith.constant 0 : index
    %c0_6 = arith.constant 0 : index
    %7 = vector.load %arg4[%c0_5, %c0_6] : memref<128x3xbf16, #tpu.memory_space<vmem>>, vector<128x3xbf16>
    %cst_7 = arith.constant dense<0.000000e+00> : vector<256x3xf32>
    %8 = tpu.matmul %6, %7, %cst_7 {dimension_numbers = #tpu.dot_dimension_numbers<[1], [0], [0], [1], [0, 0, 1, 1], [], []>} : vector<256x128xbf16>, vector<128x3xbf16>, vector<256x3xf32> -> vector<256x3xf32>
    %cst_8 = arith.constant dense<0xFF800000> : vector<3xf32>
    %9 = vector.multi_reduction <maximumf>, %8, %cst_8 [0] : vector<256x3xf32> to vector<3xf32>
    %10 = vector.shape_cast %9 : vector<3xf32> to vector<1x3xf32>
    %11 = vector.broadcast %10 : vector<1x3xf32> to vector<256x3xf32>
    %12 = arith.subf %8, %11 : vector<256x3xf32>
    %13 = math.exp %12 : vector<256x3xf32>
    %c0_9 = arith.constant 0 : index
    %c0_10 = arith.constant 0 : index
    %14 = vector.load %arg15[%c0_9, %c0_10] : memref<256x256xbf16, #tpu.memory_space<vmem>>, vector<256x256xbf16>
    %15 = arith.truncf %13 : vector<256x3xf32> to vector<256x3xbf16>
    %cst_11 = arith.constant dense<0.000000e+00> : vector<256x3xf32>
    %16 = tpu.matmul %14, %15, %cst_11 {dimension_numbers = #tpu.dot_dimension_numbers<[1], [0], [0], [1], [0, 0, 1, 1], [], []>} : vector<256x256xbf16>, vector<256x3xbf16>, vector<256x3xf32> -> vector<256x3xf32>
    %17 = tpu.reciprocal %16 {approx = true} : vector<256x3xf32> -> vector<256x3xf32>
    %18 = arith.mulf %13, %17 : vector<256x3xf32>
    %cst_12 = arith.constant dense<0.000000e+00> : vector<256xf32>
    %19 = vector.multi_reduction <add>, %18, %cst_12 [1] : vector<256x3xf32> to vector<256xf32>
    %20 = vector.shape_cast %19 : vector<256xf32> to vector<256x1xf32>
    %21 = vector.broadcast %20 : vector<256x1xf32> to vector<256x128xf32>
    %22 = arith.mulf %5, %21 : vector<256x128xf32>
    %23 = arith.truncf %22 : vector<256x128xf32> to vector<256x128xbf16>
    %c0_13 = arith.constant 0 : index
    %c0_14 = arith.constant 0 : index
    %24 = vector.load %arg5[%c0_13, %c0_14] : memref<128x384xbf16, #tpu.memory_space<vmem>>, vector<128x384xbf16>
    %cst_15 = arith.constant dense<0.000000e+00> : vector<256x384xf32>
    %25 = tpu.matmul %23, %24, %cst_15 {dimension_numbers = #tpu.dot_dimension_numbers<[1], [0], [0], [1], [0, 0, 1, 1], [], []>} : vector<256x128xbf16>, vector<128x384xbf16>, vector<256x384xf32> -> vector<256x384xf32>
    %c0_16 = arith.constant 0 : index
    %c0_17 = arith.constant 0 : index
    %26 = vector.load %arg6[%c0_16, %c0_17] : memref<1x384xf32, #tpu.memory_space<vmem>>, vector<1x384xf32>
    %27 = vector.broadcast %26 : vector<1x384xf32> to vector<256x384xf32>
    %28 = arith.addf %25, %27 : vector<256x384xf32>
    %cst_18 = arith.constant 0.000000e+00 : f32
    %29 = vector.broadcast %cst_18 : f32 to vector<256x384xf32>
    %30 = arith.maximumf %28, %29 : vector<256x384xf32>
    %31 = arith.truncf %30 : vector<256x384xf32> to vector<256x384xbf16>
    %c0_19 = arith.constant 0 : index
    %c0_20 = arith.constant 0 : index
    %32 = vector.load %arg7[%c0_19, %c0_20] : memref<384x128xbf16, #tpu.memory_space<vmem>>, vector<384x128xbf16>
    %cst_21 = arith.constant dense<0.000000e+00> : vector<256x128xf32>
    %33 = tpu.matmul %31, %32, %cst_21 {dimension_numbers = #tpu.dot_dimension_numbers<[1], [0], [0], [1], [0, 0, 1, 1], [], []>} : vector<256x384xbf16>, vector<384x128xbf16>, vector<256x128xf32> -> vector<256x128xf32>
    %c0_22 = arith.constant 0 : index
    %c0_23 = arith.constant 0 : index
    %34 = vector.load %arg8[%c0_22, %c0_23] : memref<1x128xf32, #tpu.memory_space<vmem>>, vector<1x128xf32>
    %35 = vector.broadcast %34 : vector<1x128xf32> to vector<256x128xf32>
    %36 = arith.addf %33, %35 : vector<256x128xf32>
    %cst_24 = arith.constant 0.000000e+00 : f32
    %37 = vector.broadcast %cst_24 : f32 to vector<256x128xf32>
    %38 = arith.maximumf %36, %37 : vector<256x128xf32>
    %39 = arith.truncf %38 : vector<256x128xf32> to vector<256x128xbf16>
    %c0_25 = arith.constant 0 : index
    %c0_26 = arith.constant 0 : index
    %40 = vector.load %arg9[%c0_25, %c0_26] : memref<128x128xbf16, #tpu.memory_space<vmem>>, vector<128x128xbf16>
    %cst_27 = arith.constant dense<0.000000e+00> : vector<256x128xf32>
    %41 = tpu.matmul %39, %40, %cst_27 {dimension_numbers = #tpu.dot_dimension_numbers<[1], [0], [0], [1], [0, 0, 1, 1], [], []>} : vector<256x128xbf16>, vector<128x128xbf16>, vector<256x128xf32> -> vector<256x128xf32>
    %cst_28 = arith.constant 0.000000e+00 : f32
    %42 = vector.broadcast %cst_28 : f32 to vector<256x128xf32>
    %43 = arith.maximumf %41, %42 : vector<256x128xf32>
    %c0_29 = arith.constant 0 : index
    %c0_30 = arith.constant 0 : index
    %44 = vector.load %arg10[%c0_29, %c0_30] : memref<1x128xf32, #tpu.memory_space<vmem>>, vector<1x128xf32>
    %45 = vector.broadcast %44 : vector<1x128xf32> to vector<256x128xf32>
    %46 = arith.mulf %43, %45 : vector<256x128xf32>
    %cst_31 = arith.constant dense<0.000000e+00> : vector<256xf32>
    %47 = vector.multi_reduction <add>, %46, %cst_31 [1] : vector<256x128xf32> to vector<256xf32>
    %48 = vector.shape_cast %47 : vector<256xf32> to vector<256x1xf32>
    %49 = vector.extract_strided_slice %43 {offsets = [0, 0], sizes = [256, 1], strides = [1, 1]} : vector<256x128xf32> to vector<256x1xf32>
    %c0_32 = arith.constant 0 : index
    %c0_33 = arith.constant 0 : index
    %50 = vector.load %arg11[%c0_32, %c0_33] : memref<256x128xf32, #tpu.memory_space<vmem>>, vector<256x128xf32>
    %51 = vector.broadcast %49 : vector<256x1xf32> to vector<256x128xf32>
    %52 = arith.mulf %51, %50 : vector<256x128xf32>
    %53 = vector.extract_strided_slice %43 {offsets = [0, 1], sizes = [256, 1], strides = [1, 1]} : vector<256x128xf32> to vector<256x1xf32>
    %c0_34 = arith.constant 0 : index
    %c0_35 = arith.constant 0 : index
    %54 = vector.load %arg12[%c0_34, %c0_35] : memref<256x128xf32, #tpu.memory_space<vmem>>, vector<256x128xf32>
    %55 = vector.broadcast %53 : vector<256x1xf32> to vector<256x128xf32>
    %56 = arith.mulf %55, %54 : vector<256x128xf32>
    %57 = arith.addf %52, %56 : vector<256x128xf32>
    %c0_36 = arith.constant 0 : index
    %c0_37 = arith.constant 0 : index
    %58 = vector.load %arg13[%c0_36, %c0_37] : memref<256x128xf32, #tpu.memory_space<vmem>>, vector<256x128xf32>
    %59 = vector.broadcast %48 : vector<256x1xf32> to vector<256x128xf32>
    %60 = arith.mulf %59, %58 : vector<256x128xf32>
    %61 = arith.addf %57, %60 : vector<256x128xf32>
    %c0_38 = arith.constant 0 : index
    %c0_39 = arith.constant 0 : index
    %62 = vector.load %arg14[%c0_38, %c0_39] : memref<16x256xbf16, #tpu.memory_space<vmem>>, vector<16x256xbf16>
    %63 = arith.truncf %61 : vector<256x128xf32> to vector<256x128xbf16>
    %cst_40 = arith.constant dense<0.000000e+00> : vector<16x128xf32>
    %64 = tpu.matmul %62, %63, %cst_40 {dimension_numbers = #tpu.dot_dimension_numbers<[1], [0], [0], [1], [0, 0, 1, 1], [], []>} : vector<16x256xbf16>, vector<256x128xbf16>, vector<16x128xf32> -> vector<16x128xf32>
    %65 = tpu.iota {dimensions = array<i32: 1>} : vector<16x128xi32>
    %c2_i32 = arith.constant 2 : i32
    %66 = vector.broadcast %c2_i32 : i32 to vector<16x128xi32>
    %67 = arith.cmpi slt, %65, %66 : vector<16x128xi32>
    %c0_41 = arith.constant 0 : index
    %c0_42 = arith.constant 0 : index
    %68 = vector.load %arg16[%c0_41, %c0_42] : memref<1x128xf32, #tpu.memory_space<vmem>>, vector<1x128xf32>
    %69 = vector.broadcast %68 : vector<1x128xf32> to vector<16x128xf32>
    %70 = arith.addf %64, %69 : vector<16x128xf32>
    %c18_i32 = arith.constant 18 : i32
    %71 = vector.broadcast %c18_i32 : i32 to vector<16x128xi32>
    %72 = arith.cmpi slt, %65, %71 : vector<16x128xi32>
    %73 = arith.negf %64 : vector<16x128xf32>
    %74 = math.exp %73 : vector<16x128xf32>
    %cst_43 = arith.constant 1.000000e+00 : f32
    %75 = vector.broadcast %cst_43 : f32 to vector<16x128xf32>
    %76 = arith.addf %75, %74 : vector<16x128xf32>
    %77 = arith.divf %75, %76 : vector<16x128xf32>
    %cst_44 = arith.constant 0.000000e+00 : f32
    %78 = vector.broadcast %cst_44 : f32 to vector<16x128xf32>
    %79 = arith.select %72, %77, %78 : vector<16x128xi1>, vector<16x128xf32>
    %80 = arith.select %67, %70, %79 : vector<16x128xi1>, vector<16x128xf32>
    %c0_45 = arith.constant 0 : index
    %c0_46 = arith.constant 0 : index
    %81 = vector.load %arg17[%c0_45, %c0_46] : memref<16x128xf32, #tpu.memory_space<vmem>>, vector<16x128xf32>
    tpu.vector_store %arg17[%c0_45, %c0_46], %80 {strides = array<i32>} : memref<16x128xf32, #tpu.memory_space<vmem>>, vector<16x128xf32>,
    return
  }
  func.func @transform_0(%arg0: i32) -> (i32, i32) {
    %c0_i32 = arith.constant 0 : i32
    %c0_i32_0 = arith.constant 0 : i32
    return %arg0, %c0_i32 : i32, i32
  }
  func.func @transform_1(%arg0: i32) -> (i32, i32) {
    %c0_i32 = arith.constant 0 : i32
    %c0_i32_0 = arith.constant 0 : i32
    %c0_i32_1 = arith.constant 0 : i32
    return %c0_i32, %c0_i32_0 : i32, i32
  }
  func.func @transform_2(%arg0: i32) -> (i32, i32) {
    %c0_i32 = arith.constant 0 : i32
    %c0_i32_0 = arith.constant 0 : i32
    %c0_i32_1 = arith.constant 0 : i32
    return %c0_i32, %c0_i32_0 : i32, i32
  }
  func.func @transform_3(%arg0: i32) -> (i32, i32) {
    %c0_i32 = arith.constant 0 : i32
    %c0_i32_0 = arith.constant 0 : i32
    %c0_i32_1 = arith.constant 0 : i32
    return %c0_i32, %c0_i32_0 : i32, i32
  }
  func.func @transform_4(%arg0: i32) -> (i32, i32) {
    %c0_i32 = arith.constant 0 : i32
    %c0_i32_0 = arith.constant 0 : i32
    %c0_i32_1 = arith.constant 0 : i32
    return %c0_i32, %c0_i32_0 : i32, i32
  }
  func.func @transform_5(%arg0: i32) -> (i32, i32) {
    %c0_i32 = arith.constant 0 : i32
    %c0_i32_0 = arith.constant 0 : i32
    %c0_i32_1 = arith.constant 0 : i32
    return %c0_i32, %c0_i32_0 : i32, i32
  }
  func.func @transform_6(%arg0: i32) -> (i32, i32) {
    %c0_i32 = arith.constant 0 : i32
    %c0_i32_0 = arith.constant 0 : i32
    %c0_i32_1 = arith.constant 0 : i32
    return %c0_i32, %c0_i32_0 : i32, i32
  }
  func.func @transform_7(%arg0: i32) -> (i32, i32) {
    %c0_i32 = arith.constant 0 : i32
    %c0_i32_0 = arith.constant 0 : i32
    %c0_i32_1 = arith.constant 0 : i32
    return %c0_i32, %c0_i32_0 : i32, i32
  }
  func.func @transform_8(%arg0: i32) -> (i32, i32) {
    %c0_i32 = arith.constant 0 : i32
    %c0_i32_0 = arith.constant 0 : i32
    %c0_i32_1 = arith.constant 0 : i32
    return %c0_i32, %c0_i32_0 : i32, i32
  }
  func.func @transform_9(%arg0: i32) -> (i32, i32) {
    %c0_i32 = arith.constant 0 : i32
    %c0_i32_0 = arith.constant 0 : i32
    %c0_i32_1 = arith.constant 0 : i32
    return %c0_i32, %c0_i32_0 : i32, i32
  }
  func.func @transform_10(%arg0: i32) -> (i32, i32) {
    %c0_i32 = arith.constant 0 : i32
    %c0_i32_0 = arith.constant 0 : i32
    %c0_i32_1 = arith.constant 0 : i32
    return %c0_i32, %c0_i32_0 : i32, i32
  }
  func.func @transform_11(%arg0: i32) -> (i32, i32) {
    %c0_i32 = arith.constant 0 : i32
    %c0_i32_0 = arith.constant 0 : i32
    %c0_i32_1 = arith.constant 0 : i32
    return %c0_i32, %c0_i32_0 : i32, i32
  }
  func.func @transform_12(%arg0: i32) -> (i32, i32) {
    %c0_i32 = arith.constant 0 : i32
    %c0_i32_0 = arith.constant 0 : i32
    %c0_i32_1 = arith.constant 0 : i32
    return %c0_i32, %c0_i32_0 : i32, i32
  }
  func.func @transform_13(%arg0: i32) -> (i32, i32) {
    %c0_i32 = arith.constant 0 : i32
    %c0_i32_0 = arith.constant 0 : i32
    %c0_i32_1 = arith.constant 0 : i32
    return %c0_i32, %c0_i32_0 : i32, i32
  }
  func.func @transform_14(%arg0: i32) -> (i32, i32) {
    %c0_i32 = arith.constant 0 : i32
    %c0_i32_0 = arith.constant 0 : i32
    %c0_i32_1 = arith.constant 0 : i32
    return %c0_i32, %c0_i32_0 : i32, i32
  }
  func.func @transform_15(%arg0: i32) -> (i32, i32) {
    %c0_i32 = arith.constant 0 : i32
    %c0_i32_0 = arith.constant 0 : i32
    %c0_i32_1 = arith.constant 0 : i32
    return %c0_i32, %c0_i32_0 : i32, i32
  }
  func.func @transform_16(%arg0: i32) -> (i32, i32) {
    %c0_i32 = arith.constant 0 : i32
    %c0_i32_0 = arith.constant 0 : i32
    return %arg0, %c0_i32 : i32, i32
  }
}

</mosaic_0001>

<bundles_post_ra>
// kernel: spatial_attention_forward.1
= control target key start
LH: loop header
LB: loop body
LE: loop exit
PB: predicated region body
PF: predicated region fallthrough
CT: control target
= control target key end

     0   :  { %vm1720_vm0 = vcmask 23552   ;;  %s8773_s1 = inlined_call_operand.vmem [shape: bf16[768,128], index: 1, kind: input, shape index: {}]   ;;  %s8774_s2 = inlined_call_operand.vmem [shape: f32[1,128], index: 2, kind: input, shape index: {}]   ;;  %s8775_s0 = inlined_call_operand.vmem [shape: bf16[256,768], index: 0, kind: input, shape index: {}]   ;;  %s8776_s3 = inlined_call_operand.vmem [shape: bf16[128,3], index: 3, kind: input, shape index: {}]   ;;  %s8777_s14 = inlined_call_operand.vmem [shape: bf16[256,256], index: 14, kind: input, shape index: {}]   ;;  %s8778_s4 = inlined_call_operand.vmem [shape: bf16[128,384], index: 4, kind: input, shape index: {}]   ;;  %s8779_s6 = inlined_call_operand.vmem [shape: bf16[384,128], index: 6, kind: input, shape index: {}]   ;;  %s8780_s5 = inlined_call_operand.vmem [shape: f32[1,384], index: 5, kind: input, shape index: {}]   ;;  %s8781_s7 = inlined_call_operand.vmem [shape: f32[1,128], index: 7, kind: input, shape index: {}]   ;;  %s8782_s8 = inlined_call_operand.vmem [shape: bf16[128,128], index: 8, kind: input, shape index: {}]   ;;  %s8783_s9 = inlined_call_operand.vmem [shape: f32[1,128], index: 9, kind: input, shape index: {}]   ;;  %s8784_s11 = inlined_call_operand.vmem [shape: f32[256,128], index: 11, kind: input, shape index: {}]   ;;  %s8785_s10 = inlined_call_operand.vmem [shape: f32[256,128], index: 10, kind: input, shape index: {}]   ;;  %s8786_s12 = inlined_call_operand.vmem [shape: f32[256,128], index: 12, kind: input, shape index: {}]   ;;  %s8787_s13 = inlined_call_operand.vmem [shape: bf16[16,256], index: 13, kind: input, shape index: {}]   ;;  %s8788_s15 = inlined_call_operand.vmem [shape: f32[1,128], index: 15, kind: input, shape index: {}]   ;;  %s8789_s16 = inlined_call_operand.vmem [shape: f32[16,128], index: 16, kind: output, shape index: {}]  }
   0x1   :  { %8822 = sst [smem:[#allocation29_spill]] %s8773_s1  ;;  %v4515_v32 = vld [vmem:[%s8775_s0] sm:$0xf]  ;;  %v5486_v33 = vld [vmem:[%s8775_s0 + $0x14] sm:$0xf0] }
   0x2   :  { %s8823_s23 = sld [smem:[#allocation29_spill]]  ;;  %v5483_v34 = vld [vmem:[%s8775_s0 + $0x4] sm:$0xf]  ;;  %v4517_v35 = vld [vmem:[%s8775_s0 + $0x18] sm:$0xf0]  ;;  %v4516_v40 = vor.u32 %v5486_v33, %v4515_v32 }
   0x3   :  { %v4523_v36 = vld [vmem:[%s8775_s0 + $0x8] sm:$0xf]  ;;  %v5487_v37 = vld [vmem:[%s8775_s0 + $0x1c] sm:$0xf0]  ;;  %v5484_v38 = vld [vmem:[%s8775_s0 + $0xc] sm:$0xf]  ;;  %v4520_v41 = vor.u32 %v5483_v34, %v4517_v35 }
   0x4   :  { %v4525_v39 = vld [vmem:[%s8775_s0 + $0x20] sm:$0xf0]  ;;  %v4524_v42 = vor.u32 %v5487_v37, %v4523_v36  ;;  %v4539_v44 = vld [vmem:[%s8775_s0 + $0x30] sm:$0xf]  ;;  %v5492_v45 = vld [vmem:[%s8775_s0 + $0x44] sm:$0xf0] }
   0x5   :  { %v4528_v43 = vor.u32 %v5484_v38, %v4525_v39  ;;  %v5489_v46 = vld [vmem:[%s8775_s0 + $0x34] sm:$0xf]  ;;  %v4541_v47 = vld [vmem:[%s8775_s0 + $0x48] sm:$0xf0]  ;;  %v4547_v48 = vld [vmem:[%s8775_s0 + $0x38] sm:$0xf]  ;;  %v4540_v52 = vor.u32 %v5492_v45, %v4539_v44 }
   0x6   :  { %v5493_v49 = vld [vmem:[%s8775_s0 + $0x4c] sm:$0xf0]  ;;  %v5490_v50 = vld [vmem:[%s8775_s0 + $0x3c] sm:$0xf]  ;;  %v4549_v51 = vld [vmem:[%s8775_s0 + $0x50] sm:$0xf0]  ;;  %v4544_v53 = vor.u32 %v5489_v46, %v4541_v47 }
   0x7   :  { %v4548_v54 = vor.u32 %v5493_v49, %v4547_v48  ;;  %v4552_v55 = vor.u32 %v5490_v50, %v4549_v51  ;;  %v4563_v56 = vld [vmem:[%s8775_s0 + $0x60] sm:$0xf]  ;;  %v5498_v57 = vld [vmem:[%s8775_s0 + $0x74] sm:$0xf0]  ;;  %v5495_v58 = vld [vmem:[%s8775_s0 + $0x64] sm:$0xf] }
   0x8   :  { %v5586_v0 = vld [vmem:[%s8823_s23 + $0x38] sm:$0xff]  ;;  %v5585_v4 = vld [vmem:[%s8823_s23 + $0x30] sm:$0xff]  ;;  %v5584_v8 = vld [vmem:[%s8823_s23 + $0x28] sm:$0xff] }
   0x9   :  { %v5594_v1 = vld [vmem:[%s8823_s23 + $0x78] sm:$0xff]  ;;  %1017 = vmatpush.bf16.msra.mxu0 %v5586_v0  ;;  %v5593_v5 = vld [vmem:[%s8823_s23 + $0x70] sm:$0xff]  ;;  %v5592_v9 = vld [vmem:[%s8823_s23 + $0x68] sm:$0xff]  ;;  %v4564_v0 = vor.u32 %v5498_v57, %v4563_v56 }
   0xa   :  { %v5602_v2 = vld [vmem:[%s8823_s23 + $0xb8] sm:$0xff]  ;;  %1106 = vmatpush.bf16.msra.mxu1 %v5594_v1  ;;  %v5601_v6 = vld [vmem:[%s8823_s23 + $0xb0] sm:$0xff]  ;;  %v5600_v10 = vld [vmem:[%s8823_s23 + $0xa8] sm:$0xff] }
   0xb   :  { %v5610_v3 = vld [vmem:[%s8823_s23 + $0xf8] sm:$0xff]  ;;  %1195 = vmatpush.bf16.msra.mxu2 %v5602_v2  ;;  %v5609_v7 = vld [vmem:[%s8823_s23 + $0xf0] sm:$0xff]  ;;  %v5608_v11 = vld [vmem:[%s8823_s23 + $0xe8] sm:$0xff] }
   0xc   :  { %1284 = vmatpush.bf16.msra.mxu3 %v5610_v3  ;;  %v5583_v12 = vld [vmem:[%s8823_s23 + $0x20] sm:$0xff]  ;;  %v5582_v16 = vld [vmem:[%s8823_s23 + $0x18] sm:$0xff]  ;;  %v5581_v20 = vld [vmem:[%s8823_s23 + $0x10] sm:$0xff] }
   0xd   :  { %1018 = vmatpush.bf16.msra.mxu0 %v5585_v4  ;;  %v5591_v13 = vld [vmem:[%s8823_s23 + $0x60] sm:$0xff]  ;;  %v5590_v17 = vld [vmem:[%s8823_s23 + $0x58] sm:$0xff]  ;;  %v5589_v21 = vld [vmem:[%s8823_s23 + $0x50] sm:$0xff] }
   0xe   :  { %1107 = vmatpush.bf16.msra.mxu1 %v5593_v5  ;;  %v5599_v14 = vld [vmem:[%s8823_s23 + $0xa0] sm:$0xff]  ;;  %v5598_v18 = vld [vmem:[%s8823_s23 + $0x98] sm:$0xff]  ;;  %v5597_v22 = vld [vmem:[%s8823_s23 + $0x90] sm:$0xff] }
   0xf   :  { %1196 = vmatpush.bf16.msra.mxu2 %v5601_v6  ;;  %v5607_v15 = vld [vmem:[%s8823_s23 + $0xe0] sm:$0xff]  ;;  %v5606_v19 = vld [vmem:[%s8823_s23 + $0xd8] sm:$0xff]  ;;  %v5605_v23 = vld [vmem:[%s8823_s23 + $0xd0] sm:$0xff] }
  0x10   :  { %1285 = vmatpush.bf16.msra.mxu3 %v5609_v7  ;;  %v5580_v24 = vld [vmem:[%s8823_s23 + $0x8] sm:$0xff]  ;;  %v5579_v28 = vld [vmem:[%s8823_s23] sm:$0xff]  ;;  %v4565_v59 = vld [vmem:[%s8775_s0 + $0x78] sm:$0xf0] }
  0x11   :  { %1019 = vmatpush.bf16.msra.mxu0 %v5584_v8  ;;  %v5588_v25 = vld [vmem:[%s8823_s23 + $0x48] sm:$0xff]  ;;  %v5587_v29 = vld [vmem:[%s8823_s23 + $0x40] sm:$0xff]  ;;  %v4568_v1 = vor.u32 %v5495_v58, %v4565_v59  ;;  %v4587_v4 = vld [vmem:[%s8775_s0 + $0x90] sm:$0xf] }
  0x12   :  { %1108 = vmatpush.bf16.msra.mxu1 %v5592_v9  ;;  %v5596_v26 = vld [vmem:[%s8823_s23 + $0x88] sm:$0xff]  ;;  %v5595_v30 = vld [vmem:[%s8823_s23 + $0x80] sm:$0xff]  ;;  %v5501_v6 = vld [vmem:[%s8775_s0 + $0x94] sm:$0xf] }
  0x13   :  { %1197 = vmatpush.bf16.msra.mxu2 %v5600_v10  ;;  %v5604_v27 = vld [vmem:[%s8823_s23 + $0xc8] sm:$0xff]  ;;  %v5603_v31 = vld [vmem:[%s8823_s23 + $0xc0] sm:$0xff]  ;;  %v4595_v8 = vld [vmem:[%s8775_s0 + $0x98] sm:$0xf] }
  0x14   :  { %1286 = vmatpush.bf16.msra.mxu3 %v5608_v11  ;;  %v4571_v60 = vld [vmem:[%s8775_s0 + $0x68] sm:$0xf]  ;;  %v5499_v61 = vld [vmem:[%s8775_s0 + $0x7c] sm:$0xf0]  ;;  %v5496_v62 = vld [vmem:[%s8775_s0 + $0x6c] sm:$0xf] }
  0x15   :  { %1020 = vmatpush.bf16.msra.mxu0 %v5583_v12  ;;  %v4573_v63 = vld [vmem:[%s8775_s0 + $0x80] sm:$0xf0]  ;;  %v4572_v2 = vor.u32 %v5499_v61, %v4571_v60  ;;  %v5504_v5 = vld [vmem:[%s8775_s0 + $0xa4] sm:$0xf0]  ;;  %v4589_v7 = vld [vmem:[%s8775_s0 + $0xa8] sm:$0xf0] }
  0x16   :  { %1109 = vmatpush.bf16.msra.mxu1 %v5591_v13  ;;  %v4576_v3 = vor.u32 %v5496_v62, %v4573_v63  ;;  %v5505_v9 = vld [vmem:[%s8775_s0 + $0xac] sm:$0xf0]  ;;  %v5502_v10 = vld [vmem:[%s8775_s0 + $0x9c] sm:$0xf]  ;;  %v4597_v11 = vld [vmem:[%s8775_s0 + $0xb0] sm:$0xf0]  ;;  %v4588_v12 = vor.u32 %v5504_v5, %v4587_v4  ;;  %v4592_v13 = vor.u32 %v5501_v6, %v4589_v7 }
  0x17   :  { %1198 = vmatpush.bf16.msra.mxu2 %v5599_v14  ;;  %v4596_v14 = vor.u32 %v5505_v9, %v4595_v8  ;;  %v4643_v32 = vld [vmem:[%s8775_s0 + $0xf8] sm:$0xf]  ;;  %v5517_v33 = vld [vmem:[%s8775_s0 + $0x10c] sm:$0xf0]  ;;  %v5514_v34 = vld [vmem:[%s8775_s0 + $0xfc] sm:$0xf] }
  0x18   :  { %1287 = vmatpush.bf16.msra.mxu3 %v5607_v15  ;;  %v4600_v15 = vor.u32 %v5502_v10, %v4597_v11  ;;  %v4645_v35 = vld [vmem:[%s8775_s0 + $0x110] sm:$0xf0]  ;;  %v4644_v38 = vor.u32 %v5517_v33, %v4643_v32  ;;  %v4667_v44 = vld [vmem:[%s8775_s0 + $0x128] sm:$0xf]  ;;  %v5523_v45 = vld [vmem:[%s8775_s0 + $0x13c] sm:$0xf0] }
  0x19   :  { %1021 = vmatpush.bf16.msra.mxu0 %v5582_v16  ;;  %v4611_v16 = vld [vmem:[%s8775_s0 + $0xc0] sm:$0xf]  ;;  %v4648_v39 = vor.u32 %v5514_v34, %v4645_v35  ;;  %v5520_v46 = vld [vmem:[%s8775_s0 + $0x12c] sm:$0xf]  ;;  %v4669_v47 = vld [vmem:[%s8775_s0 + $0x140] sm:$0xf0]  ;;  %v4668_v50 = vor.u32 %v5523_v45, %v4667_v44 }
  0x1a   :  { %1110 = vmatpush.bf16.msra.mxu1 %v5590_v17  ;;  %v5510_v17 = vld [vmem:[%s8775_s0 + $0xd4] sm:$0xf0]  ;;  %v4672_v51 = vor.u32 %v5520_v46, %v4669_v47  ;;  %v5529_v57 = vld [vmem:[%s8775_s0 + $0x16c] sm:$0xf0]  ;;  %v5526_v58 = vld [vmem:[%s8775_s0 + $0x15c] sm:$0xf] }
  0x1b   :  { %1199 = vmatpush.bf16.msra.mxu2 %v5598_v18  ;;  %v5507_v18 = vld [vmem:[%s8775_s0 + $0xc4] sm:$0xf]  ;;  %v4691_v56 = vld [vmem:[%s8775_s0 + $0x158] sm:$0xf]  ;;  %v4693_v59 = vld [vmem:[%s8775_s0 + $0x170] sm:$0xf0] }
  0x1c   :  { %1288 = vmatpush.bf16.msra.mxu3 %v5606_v19  ;;  %v4613_v19 = vld [vmem:[%s8775_s0 + $0xd8] sm:$0xf0]  ;;  %v4692_v62 = vor.u32 %v5529_v57, %v4691_v56  ;;  %v4696_v63 = vor.u32 %v5526_v58, %v4693_v59  ;;  %v4715_v5 = vld [vmem:[%s8775_s0 + $0x188] sm:$0xf]  ;;  %v5535_v6 = vld [vmem:[%s8775_s0 + $0x19c] sm:$0xf0] }
  0x1d   :  { %1022 = vmatpush.bf16.msra.mxu0 %v5581_v20  ;;  %v4619_v20 = vld [vmem:[%s8775_s0 + $0xc8] sm:$0xf]  ;;  %v4709_v4 = vld [vmem:[%s8775_s0 + $0x198] sm:$0xf0]  ;;  %v5532_v7 = vld [vmem:[%s8775_s0 + $0x18c] sm:$0xf] }
  0x1e   :  { %1111 = vmatpush.bf16.msra.mxu1 %v5589_v21  ;;  %v5511_v21 = vld [vmem:[%s8775_s0 + $0xdc] sm:$0xf0]  ;;  %v4717_v8 = vld [vmem:[%s8775_s0 + $0x1a0] sm:$0xf0]  ;;  %v4741_v32 = vld [vmem:[%s8775_s0 + $0x1d0] sm:$0xf0] }
  0x1f   :  { %1200 = vmatpush.bf16.msra.mxu2 %v5597_v22  ;;  %v5508_v22 = vld [vmem:[%s8775_s0 + $0xcc] sm:$0xf]  ;;  %v4757_v56 = vld [vmem:[%s8775_s0 + $0x1f8] sm:$0xf0]  ;;  %v4763_v57 = vld [vmem:[%s8775_s0 + $0x1e8] sm:$0xf] }
  0x20   :  { %1289 = vmatpush.bf16.msra.mxu3 %v5605_v23  ;;  %v4621_v23 = vld [vmem:[%s8775_s0 + $0xe0] sm:$0xf0]  ;;  %v5547_v58 = vld [vmem:[%s8775_s0 + $0x1fc] sm:$0xf0]  ;;  %v5544_v59 = vld [vmem:[%s8775_s0 + $0x1ec] sm:$0xf] }
  0x21   :  { %1023 = vmatpush.bf16.msra.mxu0 %v5580_v24  ;;  %v4612_v24 = vor.u32 %v5510_v17, %v4611_v16 }
  0x22   :  { %1112 = vmatpush.bf16.msra.mxu1 %v5588_v25  ;;  %v4616_v25 = vor.u32 %v5507_v18, %v4613_v19 }
  0x23   :  { %1201 = vmatpush.bf16.msra.mxu2 %v5596_v26  ;;  %v4620_v26 = vor.u32 %v5511_v21, %v4619_v20 }
  0x24   :  { %1290 = vmatpush.bf16.msra.mxu3 %v5604_v27  ;;  %v4624_v27 = vor.u32 %v5508_v22, %v4621_v23 }
  0x25   :  { %1024 = vmatpush.bf16.msra.mxu0 %v5579_v28  ;;  %v4635_v28 = vld [vmem:[%s8775_s0 + $0xf0] sm:$0xf] }
  0x26   :  { %1113 = vmatpush.bf16.msra.mxu1 %v5587_v29  ;;  %v5516_v29 = vld [vmem:[%s8775_s0 + $0x104] sm:$0xf0] }
  0x27   :  { %1202 = vmatpush.bf16.msra.mxu2 %v5595_v30  ;;  %v5513_v30 = vld [vmem:[%s8775_s0 + $0xf4] sm:$0xf]  ;;  %v4636_v36 = vor.u32 %v5516_v29, %v4635_v28  ;;  %v4733_v28 = vld [vmem:[%s8775_s0 + $0x1c8] sm:$0xf0]  ;;  %v4739_v29 = vld [vmem:[%s8775_s0 + $0x1b8] sm:$0xf] }
  0x28   :  { %1291 = vmatpush.bf16.msra.mxu3 %v5603_v31  ;;  %1025 = vmatmul.bf16.vlgmr.msra.gmra.mxu0 %v4516_v40  ;;  %v4637_v31 = vld [vmem:[%s8775_s0 + $0x108] sm:$0xf0]  ;;  %v4659_v40 = vld [vmem:[%s8775_s0 + $0x120] sm:$0xf] }
  0x29   :  { %1114 = vmatmul.bf16.vlgmr.msra.gmra.mxu1 %v4520_v41  ;;  %v4640_v37 = vor.u32 %v5513_v30, %v4637_v31  ;;  %v5522_v41 = vld [vmem:[%s8775_s0 + $0x134] sm:$0xf0]  ;;  %v5541_v30 = vld [vmem:[%s8775_s0 + $0x1cc] sm:$0xf0]  ;;  %v5538_v31 = vld [vmem:[%s8775_s0 + $0x1bc] sm:$0xf] }
  0x2a   :  { %1203 = vmatmul.bf16.vlgmr.msra.gmra.mxu2 %v4524_v42  ;;  %v5519_v42 = vld [vmem:[%s8775_s0 + $0x124] sm:$0xf]  ;;  %v4660_v48 = vor.u32 %v5522_v41, %v4659_v40  ;;  %v4740_v40 = vor.u32 %v5541_v30, %v4739_v29  ;;  %v4744_v41 = vor.u32 %v5538_v31, %v4741_v32 }
  0x2b   :  { %1292 = vmatmul.bf16.vlgmr.msra.gmra.mxu3 %v4528_v43  ;;  %v4661_v43 = vld [vmem:[%s8775_s0 + $0x138] sm:$0xf0] }
  0x2c   :  { %v4664_v49 = vor.u32 %v5519_v42, %v4661_v43 }
  0x38   :  { %1030 = vmatmul.bf16.gmra.mxu0 %v4540_v52  ;;  %v4683_v52 = vld [vmem:[%s8775_s0 + $0x150] sm:$0xf] }
  0x39   :  { %1119 = vmatmul.bf16.gmra.mxu1 %v4544_v53  ;;  %v5528_v53 = vld [vmem:[%s8775_s0 + $0x164] sm:$0xf0] }
  0x3a   :  { %1208 = vmatmul.bf16.gmra.mxu2 %v4548_v54  ;;  %v5525_v54 = vld [vmem:[%s8775_s0 + $0x154] sm:$0xf]  ;;  %v4684_v60 = vor.u32 %v5528_v53, %v4683_v52  ;;  %v4755_v53 = vld [vmem:[%s8775_s0 + $0x1e0] sm:$0xf] }
  0x3b   :  { %1297 = vmatmul.bf16.gmra.mxu3 %v4552_v55  ;;  %v4685_v55 = vld [vmem:[%s8775_s0 + $0x168] sm:$0xf0] }
  0x3c   :  { %v4688_v61 = vor.u32 %v5525_v54, %v4685_v55  ;;  %v5546_v54 = vld [vmem:[%s8775_s0 + $0x1f4] sm:$0xf0]  ;;  %v5543_v55 = vld [vmem:[%s8775_s0 + $0x1e4] sm:$0xf] }
  0x48   :  { %1035 = vmatmul.bf16.gmra.mxu0 %v4564_v0  ;;  %v6284_v0 = vld [vmem:[%s8774_s2] ss:$0 sm:$0xff] }
  0x49   :  { %1124 = vmatmul.bf16.gmra.mxu1 %v4568_v1  ;;  %v4707_v1 = vld [vmem:[%s8775_s0 + $0x180] sm:$0xf] }
  0x4a   :  { %1213 = vmatmul.bf16.gmra.mxu2 %v4572_v2  ;;  %v5534_v2 = vld [vmem:[%s8775_s0 + $0x194] sm:$0xf0] }
  0x4b   :  { %1302 = vmatmul.bf16.gmra.mxu3 %v4576_v3  ;;  %v5531_v3 = vld [vmem:[%s8775_s0 + $0x184] sm:$0xf]  ;;  %v4708_v9 = vor.u32 %v5534_v2, %v4707_v1  ;;  %v4760_v1 = vor.u32 %v5543_v55, %v4757_v56  ;;  %v5556_v55 = vld [vmem:[%s8775_s0 + $0x24c] sm:$0xf] }
  0x4c   :  { %v4712_v10 = vor.u32 %v5531_v3, %v4709_v4  ;;  %v4813_v56 = vld [vmem:[%s8775_s0 + $0x260] sm:$0xf0] }
  0x58   :  { %1040 = vmatmul.bf16.gmra.mxu0 %v4588_v12 }
  0x59   :  { %1129 = vmatmul.bf16.gmra.mxu1 %v4592_v13  ;;  %v4716_v13 = vor.u32 %v5535_v6, %v4715_v5  ;;  %v4764_v5 = vor.u32 %v5547_v58, %v4763_v57 }
  0x5a   :  { %1218 = vmatmul.bf16.gmra.mxu2 %v4596_v14  ;;  %v4720_v14 = vor.u32 %v5532_v7, %v4717_v8 }
  0x5b   :  { %1307 = vmatmul.bf16.gmra.mxu3 %v4600_v15 }
  0x68   :  { %1045 = vmatmul.bf16.gmra.mxu0 %v4612_v24 }
  0x69   :  { %1134 = vmatmul.bf16.gmra.mxu1 %v4616_v25  ;;  %v4731_v25 = vld [vmem:[%s8775_s0 + $0x1b0] sm:$0xf] }
  0x6a   :  { %1223 = vmatmul.bf16.gmra.mxu2 %v4620_v26  ;;  %v5540_v26 = vld [vmem:[%s8775_s0 + $0x1c4] sm:$0xf0] }
  0x6b   :  { %1312 = vmatmul.bf16.gmra.mxu3 %v4624_v27  ;;  %v5537_v27 = vld [vmem:[%s8775_s0 + $0x1b4] sm:$0xf]  ;;  %v4732_v35 = vor.u32 %v5540_v26, %v4731_v25  ;;  %v5550_v25 = vld [vmem:[%s8775_s0 + $0x21c] sm:$0xf] }
  0x6c   :  { %v4789_v26 = vld [vmem:[%s8775_s0 + $0x230] sm:$0xf0] }
  0x78   :  { %1050 = vmatmul.bf16.gmra.mxu0 %v4636_v36  ;;  %v4736_v36 = vor.u32 %v5537_v27, %v4733_v28 }
  0x79   :  { %1139 = vmatmul.bf16.gmra.mxu1 %v4640_v37 }
  0x7a   :  { %1228 = vmatmul.bf16.gmra.mxu2 %v4644_v38 }
  0x7b   :  { %1317 = vmatmul.bf16.gmra.mxu3 %v4648_v39 }
  0x88   :  { %1055 = vmatmul.bf16.gmra.mxu0 %v4660_v48 }
  0x89   :  { %1144 = vmatmul.bf16.gmra.mxu1 %v4664_v49 }
  0x8a   :  { %1233 = vmatmul.bf16.gmra.mxu2 %v4668_v50 }
  0x8b   :  { %1322 = vmatmul.bf16.gmra.mxu3 %v4672_v51 }
  0x98   :  { %1060 = vmatmul.bf16.gmra.mxu0 %v4684_v60  ;;  %v4765_v60 = vld [vmem:[%s8775_s0 + $0x200] sm:$0xf0] }
  0x99   :  { %1149 = vmatmul.bf16.gmra.mxu1 %v4688_v61  ;;  %v4768_v6 = vor.u32 %v5544_v59, %v4765_v60 }
  0x9a   :  { %1238 = vmatmul.bf16.gmra.mxu2 %v4692_v62 }
  0x9b   :  { %1327 = vmatmul.bf16.gmra.mxu3 %v4696_v63  ;;  %v4756_v63 = vor.u32 %v5546_v54, %v4755_v53  ;;  %v4811_v53 = vld [vmem:[%s8775_s0 + $0x248] sm:$0xf]  ;;  %v5559_v54 = vld [vmem:[%s8775_s0 + $0x25c] sm:$0xf0] }
  0xa5   :  { %v1026_v11 = vpop.f32.mrf.mxu0 }
  0xa6   :  { %v1115_v12 = vpop.f32.mrf.mxu1  ;;  %v1027_v15 = vadd.f32 %v6284_v0, %v1026_v11 }
  0xa8   :  { %v1116_v16 = vadd.f32 %v1115_v12, %v1027_v15  ;;  %1065 = vmatmul.bf16.gmra.mxu0 %v4708_v9 }
  0xa9   :  { %1154 = vmatmul.bf16.gmra.mxu1 %v4712_v10 }
  0xaa   :  { %1243 = vmatmul.bf16.gmra.mxu2 %v4716_v13 }
  0xab   :  { %1332 = vmatmul.bf16.gmra.mxu3 %v4720_v14 }
  0xad   :  { %v1204_v17 = vpop.f32.mrf.mxu2  ;;  %v1028_v20 = vpop.f32.mrf.mxu0 }
  0xae   :  { %v1293_v18 = vpop.f32.mrf.mxu3  ;;  %v1205_v19 = vadd.f32 %v1204_v17, %v1116_v16  ;;  %v1117_v21 = vpop.f32.mrf.mxu1  ;;  %v1029_v22 = vadd.f32 %v6284_v0, %v1028_v20  ;;  %v5549_v20 = vld [vmem:[%s8775_s0 + $0x214] sm:$0xf] }
  0xb0   :  { %v6312_v23 = vadd.f32 %v1293_v18, %v1205_v19  ;;  %v1118_v24 = vadd.f32 %v1117_v21, %v1029_v22  ;;  %v4779_v18 = vld [vmem:[%s8775_s0 + $0x210] sm:$0xf]  ;;  %v5552_v19 = vld [vmem:[%s8775_s0 + $0x224] sm:$0xf0]  ;;  %v4781_v21 = vld [vmem:[%s8775_s0 + $0x228] sm:$0xf0] }
  0xb1   :  { %v4787_v22 = vld [vmem:[%s8775_s0 + $0x218] sm:$0xf]  ;;  %v4780_v29 = vor.u32 %v5552_v19, %v4779_v18  ;;  %v4784_v30 = vor.u32 %v5549_v20, %v4781_v21  ;;  %v5564_v19 = vld [vmem:[%s8775_s0 + $0x284] sm:$0xf0] }
  0xb2   :  { %v5616_v20 = vld [vmem:[%s8823_s23 + $0x128] sm:$0xff] }
  0xb3   :  { %v5624_v21 = vld [vmem:[%s8823_s23 + $0x168] sm:$0xff] }
  0xb5   :  { %v1206_v33 = vpop.f32.mrf.mxu2  ;;  %v1031_v38 = vpop.f32.mrf.mxu0 }
  0xb6   :  { %v1295_v34 = vpop.f32.mrf.mxu3  ;;  %v1207_v37 = vadd.f32 %v1206_v33, %v1118_v24  ;;  %v1120_v39 = vpop.f32.mrf.mxu1  ;;  %v1032_v42 = vadd.f32 %v6284_v0, %v1031_v38  ;;  %v5553_v24 = vld [vmem:[%s8775_s0 + $0x22c] sm:$0xf0] }
  0xb8   :  { %v6339_v43 = vadd.f32 %v1295_v34, %v1207_v37  ;;  %v1121_v44 = vadd.f32 %v1120_v39, %v1032_v42  ;;  %1070 = vmatmul.bf16.gmra.mxu0 %v4732_v35  ;;  %v4788_v34 = vor.u32 %v5553_v24, %v4787_v22  ;;  %v4792_v35 = vor.u32 %v5550_v25, %v4789_v26  ;;  %v5561_v22 = vld [vmem:[%s8775_s0 + $0x274] sm:$0xf]  ;;  %v4829_v24 = vld [vmem:[%s8775_s0 + $0x288] sm:$0xf0]  ;;  %v4835_v25 = vld [vmem:[%s8775_s0 + $0x278] sm:$0xf] }
  0xb9   :  { %1159 = vmatmul.bf16.gmra.mxu1 %v4736_v36  ;;  %v5565_v26 = vld [vmem:[%s8775_s0 + $0x28c] sm:$0xf0] }
  0xba   :  { %1248 = vmatmul.bf16.gmra.mxu2 %v4740_v40 }
  0xbb   :  { %1337 = vmatmul.bf16.gmra.mxu3 %v4744_v41 }
  0xbd   :  { %v1209_v45 = vpop.f32.mrf.mxu2  ;;  %v1033_v48 = vpop.f32.mrf.mxu0 }
  0xbe   :  { %v1298_v46 = vpop.f32.mrf.mxu3  ;;  %v1210_v47 = vadd.f32 %v1209_v45, %v1121_v44  ;;  %v1122_v49 = vpop.f32.mrf.mxu1  ;;  %v1034_v50 = vadd.f32 %v6284_v0, %v1033_v48  ;;  %v4803_v48 = vld [vmem:[%s8775_s0 + $0x240] sm:$0xf] }
  0xc0   :  { %v6342_v51 = vadd.f32 %v1298_v46, %v1210_v47  ;;  %v1123_v52 = vadd.f32 %v1122_v49, %v1034_v50  ;;  %v5558_v49 = vld [vmem:[%s8775_s0 + $0x254] sm:$0xf0]  ;;  %v5555_v50 = vld [vmem:[%s8775_s0 + $0x244] sm:$0xf] }
  0xc1   :  { %v4804_v59 = vor.u32 %v5558_v49, %v4803_v48 }
  0xc5   :  { %v1211_v61 = vpop.f32.mrf.mxu2  ;;  %v1036_v3 = vpop.f32.mrf.mxu0 }
  0xc6   :  { %v1300_v62 = vpop.f32.mrf.mxu3  ;;  %v1212_v2 = vadd.f32 %v1211_v61, %v1123_v52  ;;  %v1125_v4 = vpop.f32.mrf.mxu1  ;;  %v1037_v7 = vadd.f32 %v6284_v0, %v1036_v3  ;;  %v4805_v52 = vld [vmem:[%s8775_s0 + $0x258] sm:$0xf0] }
  0xc7   :  { %v4808_v60 = vor.u32 %v5555_v50, %v4805_v52 }
  0xc8   :  { %v6369_v8 = vadd.f32 %v1300_v62, %v1212_v2  ;;  %v1126_v9 = vadd.f32 %v1125_v4, %v1037_v7  ;;  %1075 = vmatmul.bf16.gmra.mxu0 %v4756_v63  ;;  %v4816_v2 = vor.u32 %v5556_v55, %v4813_v56  ;;  %v5626_v7 = vld [vmem:[%s8823_s23 + $0x178] sm:$0xff]  ;;  %v5612_v56 = vld [vmem:[%s8823_s23 + $0x108] sm:$0xff] }
  0xc9   :  { %1164 = vmatmul.bf16.gmra.mxu1 %v4760_v1  ;;  %v4812_v1 = vor.u32 %v5559_v54, %v4811_v53  ;;  %v4851_v53 = vld [vmem:[%s8775_s0 + $0x2a0] sm:$0xf]  ;;  %v5570_v55 = vld [vmem:[%s8775_s0 + $0x2b4] sm:$0xf0] }
  0xca   :  { %1253 = vmatmul.bf16.gmra.mxu2 %v4764_v5  ;;  %1462 = vmatpush.bf16.msrb.mxu1 %v5626_v7 }
  0xcb   :  { %1342 = vmatmul.bf16.gmra.mxu3 %v4768_v6  ;;  %v5618_v6 = vld [vmem:[%s8823_s23 + $0x138] sm:$0xff] }
  0xcc   :  { %1373 = vmatpush.bf16.msrb.mxu0 %v5618_v6  ;;  %v5619_v6 = vld [vmem:[%s8823_s23 + $0x140] sm:$0xff] }
  0xcd   :  { %v1214_v10 = vpop.f32.mrf.mxu2  ;;  %v1038_v13 = vpop.f32.mrf.mxu0 }
  0xce   :  { %v1303_v11 = vpop.f32.mrf.mxu3  ;;  %v1215_v12 = vadd.f32 %v1214_v10, %v1126_v9  ;;  %v1127_v14 = vpop.f32.mrf.mxu1  ;;  %v1039_v15 = vadd.f32 %v6284_v0, %v1038_v13  ;;  %v5617_v10 = vld [vmem:[%s8823_s23 + $0x130] sm:$0xff] }
  0xd0   :  { %v6372_v16 = vadd.f32 %v1303_v11, %v1215_v12  ;;  %v1128_v17 = vadd.f32 %v1127_v14, %v1039_v15  ;;  %v5625_v11 = vld [vmem:[%s8823_s23 + $0x170] sm:$0xff]  ;;  %1374 = vmatpush.bf16.msrb.mxu0 %v5617_v10 }
  0xd1   :  { %1463 = vmatpush.bf16.msrb.mxu1 %v5625_v11 }
  0xd4   :  { %1375 = vmatpush.bf16.msrb.mxu0 %v5616_v20 }
  0xd5   :  { %v1216_v27 = vpop.f32.mrf.mxu2  ;;  %v1041_v32 = vpop.f32.mrf.mxu0  ;;  %1464 = vmatpush.bf16.msrb.mxu1 %v5624_v21 }
  0xd6   :  { %v1305_v28 = vpop.f32.mrf.mxu3  ;;  %v1217_v31 = vadd.f32 %v1216_v27, %v1128_v17  ;;  %v1130_v33 = vpop.f32.mrf.mxu1  ;;  %v1042_v36 = vadd.f32 %v6284_v0, %v1041_v32  ;;  %v4827_v17 = vld [vmem:[%s8775_s0 + $0x270] sm:$0xf]  ;;  %v5562_v27 = vld [vmem:[%s8775_s0 + $0x27c] sm:$0xf]  ;;  %v5615_v32 = vld [vmem:[%s8823_s23 + $0x120] sm:$0xff] }
  0xd8   :  { %v6399_v37 = vadd.f32 %v1305_v28, %v1217_v31  ;;  %v1131_v38 = vadd.f32 %v1130_v33, %v1042_v36  ;;  %1080 = vmatmul.bf16.gmra.mxu0 %v4780_v29  ;;  %v4837_v28 = vld [vmem:[%s8775_s0 + $0x290] sm:$0xf0]  ;;  %v4832_v31 = vor.u32 %v5561_v22, %v4829_v24  ;;  %v5623_v33 = vld [vmem:[%s8823_s23 + $0x160] sm:$0xff]  ;;  %v4836_v36 = vor.u32 %v5565_v26, %v4835_v25  ;;  %v4875_v24 = vld [vmem:[%s8775_s0 + $0x2d0] sm:$0xf] }
  0xd9   :  { %1169 = vmatmul.bf16.gmra.mxu1 %v4784_v30  ;;  %v4828_v30 = vor.u32 %v5564_v19, %v4827_v17  ;;  %1376 = vmatpush.bf16.msrb.mxu0 %v5615_v32  ;;  %v5576_v25 = vld [vmem:[%s8775_s0 + $0x2e4] sm:$0xf0]  ;;  %v5573_v26 = vld [vmem:[%s8775_s0 + $0x2d4] sm:$0xf] }
  0xda   :  { %1258 = vmatmul.bf16.gmra.mxu2 %v4788_v34  ;;  %1465 = vmatpush.bf16.msrb.mxu1 %v5623_v33  ;;  %v4885_v32 = vld [vmem:[%s8775_s0 + $0x2f0] sm:$0xf0] }
  0xdb   :  { %1347 = vmatmul.bf16.gmra.mxu3 %v4792_v35 }
  0xdd   :  { %v1219_v39 = vpop.f32.mrf.mxu2  ;;  %v1043_v42 = vpop.f32.mrf.mxu0 }
  0xde   :  { %v1308_v40 = vpop.f32.mrf.mxu3  ;;  %v1220_v41 = vadd.f32 %v1219_v39, %v1131_v38  ;;  %v1132_v44 = vpop.f32.mrf.mxu1  ;;  %v1044_v45 = vadd.f32 %v6284_v0, %v1043_v42  ;;  %v4840_v38 = vor.u32 %v5562_v27, %v4837_v28  ;;  %v5622_v42 = vld [vmem:[%s8823_s23 + $0x158] sm:$0xff]  ;;  %v4877_v27 = vld [vmem:[%s8775_s0 + $0x2e8] sm:$0xf0] }
  0xdf   :  { %1466 = vmatpush.bf16.msrb.mxu1 %v5622_v42  ;;  %v4883_v28 = vld [vmem:[%s8775_s0 + $0x2d8] sm:$0xf] }
  0xe0   :  { %v6402_v46 = vadd.f32 %v1308_v40, %v1220_v41  ;;  %v1133_v47 = vadd.f32 %v1132_v44, %v1044_v45  ;;  %v5614_v41 = vld [vmem:[%s8823_s23 + $0x118] sm:$0xff]  ;;  %v5613_v45 = vld [vmem:[%s8823_s23 + $0x110] sm:$0xff] }
  0xe1   :  { %1377 = vmatpush.bf16.msrb.mxu0 %v5614_v41 }
  0xe5   :  { %v1221_v57 = vpop.f32.mrf.mxu2  ;;  %v1046_v62 = vpop.f32.mrf.mxu0  ;;  %1378 = vmatpush.bf16.msrb.mxu0 %v5613_v45 }
  0xe6   :  { %v1310_v58 = vpop.f32.mrf.mxu3  ;;  %v1222_v61 = vadd.f32 %v1221_v57, %v1133_v47  ;;  %v1135_v63 = vpop.f32.mrf.mxu1  ;;  %v1047_v3 = vadd.f32 %v6284_v0, %v1046_v62  ;;  %v5621_v47 = vld [vmem:[%s8823_s23 + $0x150] sm:$0xff]  ;;  %v5620_v57 = vld [vmem:[%s8823_s23 + $0x148] sm:$0xff] }
  0xe7   :  { %1467 = vmatpush.bf16.msrb.mxu1 %v5621_v47  ;;  %v5568_v62 = vld [vmem:[%s8775_s0 + $0x2ac] sm:$0xf] }
  0xe8   :  { %v6429_v4 = vadd.f32 %v1310_v58, %v1222_v61  ;;  %v1136_v5 = vadd.f32 %v1135_v63, %v1047_v3  ;;  %1085 = vmatmul.bf16.gmra.mxu0 %v4804_v59  ;;  %v5567_v58 = vld [vmem:[%s8775_s0 + $0x2a4] sm:$0xf]  ;;  %v4853_v59 = vld [vmem:[%s8775_s0 + $0x2b8] sm:$0xf0]  ;;  %v5571_v61 = vld [vmem:[%s8775_s0 + $0x2bc] sm:$0xf0] }
  0xe9   :  { %1174 = vmatmul.bf16.gmra.mxu1 %v4808_v60  ;;  %v4859_v60 = vld [vmem:[%s8775_s0 + $0x2a8] sm:$0xf]  ;;  %v4861_v63 = vld [vmem:[%s8775_s0 + $0x2c0] sm:$0xf0]  ;;  %1379 = vmatpush.bf16.msrb.mxu0 %v5612_v56  ;;  %v4856_v3 = vor.u32 %v5567_v58, %v4853_v59  ;;  %v5485_v56 = vld [vmem:[%s8775_s0 + $0x14] sm:$0xf] }
  0xea   :  { %1263 = vmatmul.bf16.gmra.mxu2 %v4812_v1  ;;  %v4860_v10 = vor.u32 %v5571_v61, %v4859_v60  ;;  %v4864_v11 = vor.u32 %v5568_v62, %v4861_v63 }
  0xeb   :  { %1352 = vmatmul.bf16.gmra.mxu3 %v4816_v2  ;;  %1468 = vmatpush.bf16.msrb.mxu1 %v5620_v57  ;;  %v4852_v2 = vor.u32 %v5570_v55, %v4851_v53  ;;  %v4531_v53 = vld [vmem:[%s8775_s0 + $0x10] sm:$0xf]  ;;  %v5488_v55 = vld [vmem:[%s8775_s0 + $0x24] sm:$0xf0]  ;;  %v4533_v57 = vld [vmem:[%s8775_s0 + $0x28] sm:$0xf0] }
  0xec   :  { %v4532_v59 = vor.u32 %v5488_v55, %v4531_v53  ;;  %v4536_v60 = vor.u32 %v5485_v56, %v4533_v57 }
  0xed   :  { %v1224_v9 = vpop.f32.mrf.mxu2  ;;  %v1048_v13 = vpop.f32.mrf.mxu0 }
  0xee   :  { %v6443_v12 = vadd.f32 %v1224_v9, %v1136_v5  ;;  %v1137_v14 = vpop.f32.mrf.mxu1  ;;  %v1049_v15 = vadd.f32 %v6284_v0, %v1048_v13  ;;  %v5611_v5 = vld [vmem:[%s8823_s23 + $0x100] sm:$0xff] }
  0xef   :  { %1380 = vmatpush.bf16.msrb.mxu0 %v5611_v5  ;;  %1469 = vmatpush.bf16.msrb.mxu1 %v5619_v6 }
  0xf0   :  { %v6449_v18 = vadd.f32 %v1137_v14, %v1049_v15 }
  0xf5   :  { %v6478_v29 = vpop.f32.mrf.mxu2  ;;  %v1051_v34 = vpop.f32.mrf.mxu0 }
  0xf6   :  { %v1140_v35 = vpop.f32.mrf.mxu1  ;;  %v1052_v39 = vadd.f32 %v6284_v0, %v1051_v34  ;;  %v4876_v34 = vor.u32 %v5576_v25, %v4875_v24 }
  0xf8   :  { %v1141_v40 = vadd.f32 %v1140_v35, %v1052_v39  ;;  %1090 = vmatmul.bf16.gmra.mxu0 %v4828_v30  ;;  %v5577_v30 = vld [vmem:[%s8775_s0 + $0x2ec] sm:$0xf0]  ;;  %v4880_v35 = vor.u32 %v5573_v26, %v4877_v27 }
  0xf9   :  { %1179 = vmatmul.bf16.gmra.mxu1 %v4832_v31  ;;  %v5574_v31 = vld [vmem:[%s8775_s0 + $0x2dc] sm:$0xf]  ;;  %v4884_v39 = vor.u32 %v5577_v30, %v4883_v28 }
  0xfa   :  { %1268 = vmatmul.bf16.gmra.mxu2 %v4836_v36 }
  0xfb   :  { %1357 = vmatmul.bf16.gmra.mxu3 %v4840_v38 }
  0xfd   :  { %v1229_v44 = vpop.f32.mrf.mxu2  ;;  %v1053_v49 = vpop.f32.mrf.mxu0 }
  0xfe   :  { %v6499_v48 = vadd.f32 %v1229_v44, %v1141_v40  ;;  %v1142_v50 = vpop.f32.mrf.mxu1  ;;  %v1054_v52 = vadd.f32 %v6284_v0, %v1053_v49  ;;  %v4888_v40 = vor.u32 %v5574_v31, %v4885_v32 }
 0x100   :  { %v6505_v54 = vadd.f32 %v1142_v50, %v1054_v52 }
 0x105   :  { %v6534_v1 = vpop.f32.mrf.mxu2  ;;  %v1056_v7 = vpop.f32.mrf.mxu0 }
 0x106   :  { %v1145_v9 = vpop.f32.mrf.mxu1  ;;  %v1057_v13 = vadd.f32 %v6284_v0, %v1056_v7 }
 0x108   :  { %v1146_v14 = vadd.f32 %v1145_v9, %v1057_v13  ;;  %1095 = vmatmul.bf16.gmra.mxu0 %v4852_v2  ;;  %v5494_v13 = vld [vmem:[%s8775_s0 + $0x54] sm:$0xf0] }
 0x109   :  { %1184 = vmatmul.bf16.gmra.mxu1 %v4856_v3 }
 0x10a   :  { %1273 = vmatmul.bf16.gmra.mxu2 %v4860_v10 }
 0x10b   :  { %1362 = vmatmul.bf16.gmra.mxu3 %v4864_v11  ;;  %v4555_v11 = vld [vmem:[%s8775_s0 + $0x40] sm:$0xf] }
 0x10d   :  { %v1234_v15 = vpop.f32.mrf.mxu2  ;;  %v1058_v19 = vpop.f32.mrf.mxu0 }
 0x10e   :  { %v6543_v17 = vadd.f32 %v1234_v15, %v1146_v14  ;;  %v1147_v20 = vpop.f32.mrf.mxu1  ;;  %v1059_v21 = vadd.f32 %v6284_v0, %v1058_v19  ;;  %v5491_v14 = vld [vmem:[%s8775_s0 + $0x44] sm:$0xf]  ;;  %v4557_v15 = vld [vmem:[%s8775_s0 + $0x58] sm:$0xf0] }
 0x110   :  { %v6546_v22 = vadd.f32 %v1147_v20, %v1059_v21  ;;  %v4556_v20 = vor.u32 %v5494_v13, %v4555_v11  ;;  %v4560_v21 = vor.u32 %v5491_v14, %v4557_v15 }
 0x115   :  { %v6572_v33 = vpop.f32.mrf.mxu2  ;;  %v1061_v36 = vpop.f32.mrf.mxu0 }
 0x116   :  { %v1150_v38 = vpop.f32.mrf.mxu1  ;;  %v1062_v41 = vadd.f32 %v6284_v0, %v1061_v36  ;;  %v4579_v36 = vld [vmem:[%s8775_s0 + $0x70] sm:$0xf] }
 0x118   :  { %v1151_v42 = vadd.f32 %v1150_v38, %v1062_v41  ;;  %1100 = vmatmul.bf16.gmra.mxu0 %v4876_v34  ;;  %v5500_v38 = vld [vmem:[%s8775_s0 + $0x84] sm:$0xf0] }
 0x119   :  { %1189 = vmatmul.bf16.gmra.mxu1 %v4880_v35 }
 0x11a   :  { %1278 = vmatmul.bf16.gmra.mxu2 %v4884_v39  ;;  %v5497_v39 = vld [vmem:[%s8775_s0 + $0x74] sm:$0xf] }
 0x11b   :  { %1367 = vmatmul.bf16.gmra.mxu3 %v4888_v40  ;;  %v4581_v40 = vld [vmem:[%s8775_s0 + $0x88] sm:$0xf0] }
 0x11d   :  { %v1239_v44 = vpop.f32.mrf.mxu2  ;;  %v1063_v47 = vpop.f32.mrf.mxu0 }
 0x11e   :  { %v6575_v45 = vadd.f32 %v1239_v44, %v1151_v42  ;;  %v1152_v49 = vpop.f32.mrf.mxu1  ;;  %v1064_v50 = vadd.f32 %v6284_v0, %v1063_v47  ;;  %v4580_v42 = vor.u32 %v5500_v38, %v4579_v36  ;;  %v4584_v44 = vor.u32 %v5497_v39, %v4581_v40 }
 0x120   :  { %v6578_v52 = vadd.f32 %v1152_v49, %v1064_v50 }
 0x125   :  { %v6592_v58 = vpop.f32.mrf.mxu2  ;;  %v1066_v61 = vpop.f32.mrf.mxu0 }
 0x126   :  { %v1155_v62 = vpop.f32.mrf.mxu1  ;;  %v1067_v63 = vadd.f32 %v6284_v0, %v1066_v61 }
 0x128   :  { %v1156_v2 = vadd.f32 %v1155_v62, %v1067_v63  ;;  %1381 = vmatmul.bf16.vlgmr.msrb.gmra.mxu0 %v4532_v59  ;;  %v4603_v62 = vld [vmem:[%s8775_s0 + $0xa0] sm:$0xf]  ;;  %v5506_v63 = vld [vmem:[%s8775_s0 + $0xb4] sm:$0xf0] }
 0x129   :  { %1470 = vmatmul.bf16.vlgmr.msrb.gmra.mxu1 %v4536_v60 }
 0x12d   :  { %v1244_v3 = vpop.f32.mrf.mxu2  ;;  %v1068_v6 = vpop.f32.mrf.mxu0 }
 0x12e   :  { %v6595_v5 = vadd.f32 %v1244_v3, %v1156_v2  ;;  %v1157_v7 = vpop.f32.mrf.mxu1  ;;  %v1069_v9 = vadd.f32 %v6284_v0, %v1068_v6  ;;  %v5503_v2 = vld [vmem:[%s8775_s0 + $0xa4] sm:$0xf]  ;;  %v4605_v3 = vld [vmem:[%s8775_s0 + $0xb8] sm:$0xf0] }
 0x130   :  { %v6598_v10 = vadd.f32 %v1157_v7, %v1069_v9  ;;  %v4604_v7 = vor.u32 %v5506_v63, %v4603_v62  ;;  %v4608_v9 = vor.u32 %v5503_v2, %v4605_v3  ;;  %v5518_v62 = vld [vmem:[%s8775_s0 + $0x114] sm:$0xf0]  ;;  %v5515_v63 = vld [vmem:[%s8775_s0 + $0x104] sm:$0xf]  ;;  %v4653_v2 = vld [vmem:[%s8775_s0 + $0x118] sm:$0xf0] }
 0x135   :  { %v6612_v19 = vpop.f32.mrf.mxu2  ;;  %v1071_v24 = vpop.f32.mrf.mxu0 }
 0x136   :  { %v1160_v25 = vpop.f32.mrf.mxu1  ;;  %v1072_v26 = vadd.f32 %v6284_v0, %v1071_v24 }
 0x138   :  { %v1161_v27 = vadd.f32 %v1160_v25, %v1072_v26  ;;  %1386 = vmatmul.bf16.gmra.mxu0 %v4556_v20 }
 0x139   :  { %1475 = vmatmul.bf16.gmra.mxu1 %v4560_v21 }
 0x13d   :  { %v1249_v28 = vpop.f32.mrf.mxu2  ;;  %v1073_v31 = vpop.f32.mrf.mxu0 }
 0x13e   :  { %v6615_v30 = vadd.f32 %v1249_v28, %v1161_v27  ;;  %v1162_v32 = vpop.f32.mrf.mxu1  ;;  %v1074_v34 = vadd.f32 %v6284_v0, %v1073_v31  ;;  %v4627_v28 = vld [vmem:[%s8775_s0 + $0xd0] sm:$0xf]  ;;  %v5512_v31 = vld [vmem:[%s8775_s0 + $0xe4] sm:$0xf0] }
 0x13f   :  { %v4628_v38 = vor.u32 %v5512_v31, %v4627_v28 }
 0x140   :  { %v6618_v35 = vadd.f32 %v1162_v32, %v1074_v34  ;;  %v5509_v32 = vld [vmem:[%s8775_s0 + $0xd4] sm:$0xf]  ;;  %v4629_v34 = vld [vmem:[%s8775_s0 + $0xe8] sm:$0xf0] }
 0x141   :  { %v4632_v39 = vor.u32 %v5509_v32, %v4629_v34 }
 0x145   :  { %v6632_v41 = vpop.f32.mrf.mxu2  ;;  %v1076_v47 = vpop.f32.mrf.mxu0 }
 0x146   :  { %v1165_v49 = vpop.f32.mrf.mxu1  ;;  %v1077_v50 = vadd.f32 %v6284_v0, %v1076_v47 }
 0x148   :  { %v1166_v53 = vadd.f32 %v1165_v49, %v1077_v50  ;;  %1391 = vmatmul.bf16.gmra.mxu0 %v4580_v42 }
 0x149   :  { %1480 = vmatmul.bf16.gmra.mxu1 %v4584_v44 }
 0x14d   :  { %v1254_v55 = vpop.f32.mrf.mxu2  ;;  %v1078_v57 = vpop.f32.mrf.mxu0 }
 0x14e   :  { %v6635_v56 = vadd.f32 %v1254_v55, %v1166_v53  ;;  %v1167_v59 = vpop.f32.mrf.mxu1  ;;  %v1079_v60 = vadd.f32 %v6284_v0, %v1078_v57 }
 0x150   :  { %v6638_v61 = vadd.f32 %v1167_v59, %v1079_v60  ;;  %v4651_v60 = vld [vmem:[%s8775_s0 + $0x100] sm:$0xf] }
 0x155   :  { %v6652_v6 = vpop.f32.mrf.mxu2  ;;  %v1081_v11 = vpop.f32.mrf.mxu0 }
 0x156   :  { %v1170_v13 = vpop.f32.mrf.mxu1  ;;  %v1082_v14 = vadd.f32 %v6284_v0, %v1081_v11  ;;  %v5634_v11 = vld [vmem:[%s8776_s3 + $0x38] sm:$0xff] }
 0x157   :  { %1631 = vmatpush.bf16.msrb.mxu2 %v5634_v11  ;;  %v5628_v11 = vld [vmem:[%s8776_s3 + $0x8] sm:$0xff] }
 0x158   :  { %v1171_v15 = vadd.f32 %v1170_v13, %v1082_v14  ;;  %1396 = vmatmul.bf16.gmra.mxu0 %v4604_v7  ;;  %v4652_v7 = vor.u32 %v5518_v62, %v4651_v60 }
 0x159   :  { %1485 = vmatmul.bf16.gmra.mxu1 %v4608_v9  ;;  %v4656_v9 = vor.u32 %v5515_v63, %v4653_v2 }
 0x15d   :  { %v1259_v20 = vpop.f32.mrf.mxu2  ;;  %v1083_v24 = vpop.f32.mrf.mxu0 }
 0x15e   :  { %v6655_v21 = vadd.f32 %v1259_v20, %v1171_v15  ;;  %v1172_v25 = vpop.f32.mrf.mxu1  ;;  %v1084_v26 = vadd.f32 %v6284_v0, %v1083_v24  ;;  %v5633_v24 = vld [vmem:[%s8776_s3 + $0x30] sm:$0xff] }
 0x15f   :  { %1632 = vmatpush.bf16.msrb.mxu2 %v5633_v24 }
 0x160   :  { %v6658_v27 = vadd.f32 %v1172_v25, %v1084_v26  ;;  %v5632_v26 = vld [vmem:[%s8776_s3 + $0x28] sm:$0xff] }
 0x163   :  { %1633 = vmatpush.bf16.msrb.mxu2 %v5632_v26  ;;  %v5627_v26 = vld [vmem:[%s8776_s3] sm:$0xff] }
 0x165   :  { %v6672_v36 = vpop.f32.mrf.mxu2  ;;  %v1086_v40 = vpop.f32.mrf.mxu0 }
 0x166   :  { %v1175_v42 = vpop.f32.mrf.mxu1  ;;  %v1087_v44 = vadd.f32 %v6284_v0, %v1086_v40  ;;  %v5631_v40 = vld [vmem:[%s8776_s3 + $0x20] sm:$0xff] }
 0x167   :  { %1634 = vmatpush.bf16.msrb.mxu2 %v5631_v40 }
 0x168   :  { %v1176_v47 = vadd.f32 %v1175_v42, %v1087_v44  ;;  %1401 = vmatmul.bf16.gmra.mxu0 %v4628_v38  ;;  %v5524_v42 = vld [vmem:[%s8775_s0 + $0x144] sm:$0xf0]  ;;  %v5521_v44 = vld [vmem:[%s8775_s0 + $0x134] sm:$0xf] }
 0x169   :  { %1490 = vmatmul.bf16.gmra.mxu1 %v4632_v39  ;;  %v4675_v39 = vld [vmem:[%s8775_s0 + $0x130] sm:$0xf] }
 0x16d   :  { %v1264_v49 = vpop.f32.mrf.mxu2  ;;  %v1088_v53 = vpop.f32.mrf.mxu0 }
 0x16e   :  { %v6675_v50 = vadd.f32 %v1264_v49, %v1176_v47  ;;  %v1177_v55 = vpop.f32.mrf.mxu1  ;;  %v1089_v57 = vadd.f32 %v6284_v0, %v1088_v53  ;;  %v4677_v47 = vld [vmem:[%s8775_s0 + $0x148] sm:$0xf0]  ;;  %v4676_v53 = vor.u32 %v5524_v42, %v4675_v39 }
 0x170   :  { %v6678_v59 = vadd.f32 %v1177_v55, %v1089_v57  ;;  %v4680_v55 = vor.u32 %v5521_v44, %v4677_v47  ;;  %v5630_v57 = vld [vmem:[%s8776_s3 + $0x18] sm:$0xff] }
 0x171   :  { %1635 = vmatpush.bf16.msrb.mxu2 %v5630_v57 }
 0x175   :  { %v6692_v3 = vpop.f32.mrf.mxu2  ;;  %v1091_v13 = vpop.f32.mrf.mxu0 }
 0x176   :  { %v1180_v14 = vpop.f32.mrf.mxu1  ;;  %v1092_v15 = vadd.f32 %v6284_v0, %v1091_v13 }
 0x178   :  { %v1181_v20 = vadd.f32 %v1180_v14, %v1092_v15  ;;  %1406 = vmatmul.bf16.gmra.mxu0 %v4652_v7  ;;  %v5629_v7 = vld [vmem:[%s8776_s3 + $0x10] sm:$0xff] }
 0x179   :  { %1495 = vmatmul.bf16.gmra.mxu1 %v4656_v9  ;;  %1636 = vmatpush.bf16.msrb.mxu2 %v5629_v7 }
 0x17d   :  { %v1269_v25 = vpop.f32.mrf.mxu2  ;;  %v1093_v31 = vpop.f32.mrf.mxu0  ;;  %1637 = vmatpush.bf16.msrb.mxu2 %v5628_v11  ;;  %v5536_v11 = vld [vmem:[%s8775_s0 + $0x1a4] sm:$0xf0] }
 0x17e   :  { %v6704_v28 = vadd.f32 %v1269_v25, %v1181_v20  ;;  %v1182_v32 = vpop.f32.mrf.mxu1  ;;  %v1094_v34 = vadd.f32 %v6284_v0, %v1093_v31  ;;  %v4699_v25 = vld [vmem:[%s8775_s0 + $0x160] sm:$0xf]  ;;  %v5530_v31 = vld [vmem:[%s8775_s0 + $0x174] sm:$0xf0] }
 0x17f   :  { %v4700_v40 = vor.u32 %v5530_v31, %v4699_v25 }
 0x180   :  { %v6707_v38 = vadd.f32 %v1182_v32, %v1094_v34  ;;  %v5527_v32 = vld [vmem:[%s8775_s0 + $0x164] sm:$0xf]  ;;  %v4701_v34 = vld [vmem:[%s8775_s0 + $0x178] sm:$0xf0] }
 0x181   :  { %1638 = vmatpush.bf16.msrb.mxu2 %v5627_v26  ;;  %v4704_v42 = vor.u32 %v5527_v32, %v4701_v34 }
 0x185   :  { %v6724_v49 = vpop.f32.mrf.mxu2  ;;  %v1096_v60 = vpop.f32.mrf.mxu0 }
 0x186   :  { %v1185_v62 = vpop.f32.mrf.mxu1  ;;  %v1097_v63 = vadd.f32 %v6284_v0, %v1096_v60 }
 0x188   :  { %v1186_v2 = vadd.f32 %v1185_v62, %v1097_v63  ;;  %1411 = vmatmul.bf16.gmra.mxu0 %v4676_v53 }
 0x189   :  { %1500 = vmatmul.bf16.gmra.mxu1 %v4680_v55 }
 0x18d   :  { %v1274_v9 = vpop.f32.mrf.mxu2  ;;  %v1098_v14 = vpop.f32.mrf.mxu0 }
 0x18e   :  { %v6736_v13 = vadd.f32 %v1274_v9, %v1186_v2  ;;  %v1187_v15 = vpop.f32.mrf.mxu1  ;;  %v1099_v20 = vadd.f32 %v6284_v0, %v1098_v14  ;;  %v4723_v9 = vld [vmem:[%s8775_s0 + $0x190] sm:$0xf]  ;;  %v5533_v14 = vld [vmem:[%s8775_s0 + $0x194] sm:$0xf] }
 0x190   :  { %v6739_v24 = vadd.f32 %v1187_v15, %v1099_v20  ;;  %v4725_v15 = vld [vmem:[%s8775_s0 + $0x1a8] sm:$0xf0]  ;;  %v4724_v20 = vor.u32 %v5536_v11, %v4723_v9 }
 0x195   :  { %v6756_v39 = vpop.f32.mrf.mxu2  ;;  %v1101_v44 = vpop.f32.mrf.mxu0 }
 0x196   :  { %v1190_v47 = vpop.f32.mrf.mxu1  ;;  %v1102_v53 = vadd.f32 %v6284_v0, %v1101_v44 }
 0x198   :  { %v1191_v55 = vadd.f32 %v1190_v47, %v1102_v53  ;;  %1416 = vmatmul.bf16.gmra.mxu0 %v4700_v40  ;;  %v4747_v47 = vld [vmem:[%s8775_s0 + $0x1c0] sm:$0xf]  ;;  %v5542_v53 = vld [vmem:[%s8775_s0 + $0x1d4] sm:$0xf0] }
 0x199   :  { %1505 = vmatmul.bf16.gmra.mxu1 %v4704_v42 }
 0x19d   :  { %v1279_v57 = vpop.f32.mrf.mxu2  ;;  %v1103_v62 = vpop.f32.mrf.mxu0 }
 0x19e   :  { %v6759_v60 = vadd.f32 %v1279_v57, %v1191_v55  ;;  %v1192_v63 = vpop.f32.mrf.mxu1  ;;  %v1104_v2 = vadd.f32 %v6284_v0, %v1103_v62  ;;  %v4728_v0 = vor.u32 %v5533_v14, %v4725_v15  ;;  %v6794_v55 = vpop.f32.mrf.mxu3  ;;  %v4748_v62 = vor.u32 %v5542_v53, %v4747_v47 }
 0x1a0   :  { %v6762_v7 = vadd.f32 %v1192_v63, %v1104_v2 }
 0x1a5   :  { %v1382_v25 = vpop.f32.mrf.mxu0 }
 0x1a6   :  { %v1471_v26 = vpop.f32.mrf.mxu1  ;;  %v1383_v31 = vadd.f32 %v1382_v25, %v6312_v23  ;;  %v5539_v23 = vld [vmem:[%s8775_s0 + $0x1c4] sm:$0xf]  ;;  %v1315_v11 = vpop.f32.mrf.mxu3 }
 0x1a8   :  { %1421 = vmatmul.bf16.gmra.mxu0 %v4724_v20  ;;  %v6778_v42 = vadd.f32 %v1471_v26, %v1383_v31  ;;  %v4771_v31 = vld [vmem:[%s8775_s0 + $0x1f0] sm:$0xf] }
 0x1a9   :  { %1510 = vmatmul.bf16.gmra.mxu1 %v4728_v0 }
 0x1ad   :  { %v1384_v32 = vpop.f32.mrf.mxu0 }
 0x1ae   :  { %v1473_v34 = vpop.f32.mrf.mxu1  ;;  %v1385_v40 = vadd.f32 %v1384_v32, %v6339_v43  ;;  %v4749_v43 = vld [vmem:[%s8775_s0 + $0x1d8] sm:$0xf0]  ;;  %v5548_v32 = vld [vmem:[%s8775_s0 + $0x204] sm:$0xf0] }
 0x1af   :  { %v4752_v63 = vor.u32 %v5539_v23, %v4749_v43  ;;  %v6818_v43 = vpop.f32.mrf.mxu3 }
 0x1b0   :  { %v6780_v44 = vadd.f32 %v1473_v34, %v1385_v40  ;;  %v4772_v40 = vor.u32 %v5548_v32, %v4771_v31 }
 0x1b2   :  { %v1551_v57 = vpack.c.bf16 %v6780_v44, %v6778_v42 }
 0x1b4   :  { %1639 = vmatmul.bf16.vlgmr.msrb.gmra.mxu2 %v1551_v57 }
 0x1b5   :  { %v1387_v2 = vpop.f32.mrf.mxu0 }
 0x1b6   :  { %v1476_v9 = vpop.f32.mrf.mxu1  ;;  %v1388_v14 = vadd.f32 %v1387_v2, %v6342_v51  ;;  %v5545_v51 = vld [vmem:[%s8775_s0 + $0x1f4] sm:$0xf] }
 0x1b8   :  { %1426 = vmatmul.bf16.gmra.mxu0 %v4748_v62  ;;  %v6800_v25 = vadd.f32 %v1476_v9, %v1388_v14  ;;  %v1320_v9 = vpop.f32.mrf.mxu3 }
 0x1b9   :  { %1515 = vmatmul.bf16.gmra.mxu1 %v4752_v63 }
 0x1bd   :  { %v1389_v15 = vpop.f32.mrf.mxu0 }
 0x1be   :  { %v1478_v20 = vpop.f32.mrf.mxu1  ;;  %v1390_v0 = vadd.f32 %v1389_v15, %v6369_v8  ;;  %v4773_v8 = vld [vmem:[%s8775_s0 + $0x208] sm:$0xf0] }
 0x1bf   :  { %v4776_v47 = vor.u32 %v5545_v51, %v4773_v8 }
 0x1c0   :  { %v6802_v26 = vadd.f32 %v1478_v20, %v1390_v0  ;;  %v4795_v20 = vld [vmem:[%s8775_s0 + $0x220] sm:$0xf]  ;;  %v5554_v0 = vld [vmem:[%s8775_s0 + $0x234] sm:$0xf0] }
 0x1c1   :  { %v4796_v32 = vor.u32 %v5554_v0, %v4795_v20  ;;  %v5560_v20 = vld [vmem:[%s8775_s0 + $0x264] sm:$0xf0] }
 0x1c2   :  { %v1552_v34 = vpack.c.bf16 %v6802_v26, %v6800_v25 }
 0x1c4   :  { %1644 = vmatmul.bf16.gmra.mxu2 %v1552_v34 }
 0x1c5   :  { %v1392_v53 = vpop.f32.mrf.mxu0 }
 0x1c6   :  { %v1481_v23 = vpop.f32.mrf.mxu1  ;;  %v1393_v57 = vadd.f32 %v1392_v53, %v6372_v16  ;;  %v5551_v16 = vld [vmem:[%s8775_s0 + $0x224] sm:$0xf] }
 0x1c8   :  { %1431 = vmatmul.bf16.gmra.mxu0 %v4772_v40  ;;  %v6822_v14 = vadd.f32 %v1481_v23, %v1393_v57  ;;  %v6840_v40 = vpop.f32.mrf.mxu3 }
 0x1c9   :  { %1520 = vmatmul.bf16.gmra.mxu1 %v4776_v47 }
 0x1cd   :  { %v1394_v62 = vpop.f32.mrf.mxu0 }
 0x1ce   :  { %v1483_v63 = vpop.f32.mrf.mxu1  ;;  %v1395_v2 = vadd.f32 %v1394_v62, %v6399_v37  ;;  %v4797_v37 = vld [vmem:[%s8775_s0 + $0x238] sm:$0xf0] }
 0x1cf   :  { %v4800_v51 = vor.u32 %v5551_v16, %v4797_v37 }
 0x1d0   :  { %v6824_v15 = vadd.f32 %v1483_v63, %v1395_v2  ;;  %v4819_v2 = vld [vmem:[%s8775_s0 + $0x250] sm:$0xf]  ;;  %v1325_v16 = vpop.f32.mrf.mxu3 }
 0x1d1   :  { %v4820_v37 = vor.u32 %v5560_v20, %v4819_v2 }
 0x1d2   :  { %8824 = vst [vmem:[#allocation2_spill] sm:$0xff] %v6824_v15  ;;  %v1553_v31 = vpack.c.bf16 %v6824_v15, %v6822_v14 }
 0x1d4   :  { %1649 = vmatmul.bf16.gmra.mxu2 %v1553_v31 }
 0x1d5   :  { %v1397_v8 = vpop.f32.mrf.mxu0 }
 0x1d6   :  { %v1486_v34 = vpop.f32.mrf.mxu1  ;;  %v1398_v47 = vadd.f32 %v1397_v8, %v6402_v46  ;;  %v5557_v46 = vld [vmem:[%s8775_s0 + $0x254] sm:$0xf]  ;;  %v1227_v8 = vadd.f32 %v6478_v29, %v6449_v18  ;;  %v4843_v18 = vld [vmem:[%s8775_s0 + $0x280] sm:$0xf]  ;;  %v5566_v29 = vld [vmem:[%s8775_s0 + $0x294] sm:$0xf0] }
 0x1d8   :  { %1436 = vmatmul.bf16.gmra.mxu0 %v4796_v32  ;;  %v6844_v62 = vadd.f32 %v1486_v34, %v1398_v47  ;;  %v1314_v34 = vadd.f32 %v6794_v55, %v6443_v12  ;;  %v1316_v47 = vadd.f32 %v1315_v11, %v1227_v8  ;;  %v6866_v15 = vpop.f32.mrf.mxu3  ;;  %v5563_v12 = vld [vmem:[%s8775_s0 + $0x284] sm:$0xf]  ;;  %v4845_v55 = vld [vmem:[%s8775_s0 + $0x298] sm:$0xf0] }
 0x1d9   :  { %1525 = vmatmul.bf16.gmra.mxu1 %v4800_v51  ;;  %v4848_v20 = vor.u32 %v5563_v12, %v4845_v55 }
 0x1da   :  { %8825 = vst [vmem:[#allocation3_spill] sm:$0xff] %v6844_v62 }
 0x1dd   :  { %v1399_v53 = vpop.f32.mrf.mxu0 }
 0x1de   :  { %v1488_v23 = vpop.f32.mrf.mxu1  ;;  %v1400_v57 = vadd.f32 %v1399_v53, %v6429_v4  ;;  %v4821_v4 = vld [vmem:[%s8775_s0 + $0x268] sm:$0xf0] }
 0x1df   :  { %v4824_v31 = vor.u32 %v5557_v46, %v4821_v4 }
 0x1e0   :  { %v6846_v63 = vadd.f32 %v1488_v23, %v1400_v57 }
 0x1e2   :  { %8826 = vst [vmem:[#allocation4_spill] sm:$0xff] %v6846_v63  ;;  %v1554_v0 = vpack.c.bf16 %v6846_v63, %v6844_v62 }
 0x1e4   :  { %1654 = vmatmul.bf16.gmra.mxu2 %v1554_v0 }
 0x1e5   :  { %v1402_v32 = vpop.f32.mrf.mxu0 }
 0x1e6   :  { %v1491_v51 = vpop.f32.mrf.mxu1  ;;  %v1403_v53 = vadd.f32 %v1402_v32, %v1314_v34  ;;  %v1319_v32 = vadd.f32 %v6818_v43, %v6499_v48  ;;  %v5569_v48 = vld [vmem:[%s8775_s0 + $0x2b4] sm:$0xf] }
 0x1e8   :  { %1441 = vmatmul.bf16.gmra.mxu0 %v4820_v37  ;;  %v6868_v0 = vadd.f32 %v1491_v51, %v1403_v53  ;;  %v1232_v37 = vadd.f32 %v6534_v1, %v6505_v54  ;;  %v5572_v54 = vld [vmem:[%s8775_s0 + $0x2c4] sm:$0xf0]  ;;  %v4869_v1 = vld [vmem:[%s8775_s0 + $0x2c8] sm:$0xf0] }
 0x1e9   :  { %1530 = vmatmul.bf16.gmra.mxu1 %v4824_v31  ;;  %v1330_v31 = vpop.f32.mrf.mxu3  ;;  %v4872_v12 = vor.u32 %v5569_v48, %v4869_v1 }
 0x1ea   :  { %8827 = vst [vmem:[#allocation5_spill] sm:$0xff] %v6868_v0  ;;  %v1321_v51 = vadd.f32 %v1320_v9, %v1232_v37 }
 0x1ed   :  { %v1404_v23 = vpop.f32.mrf.mxu0 }
 0x1ee   :  { %v1493_v57 = vpop.f32.mrf.mxu1  ;;  %v1405_v63 = vadd.f32 %v1404_v23, %v1316_v47 }
 0x1f0   :  { %v6870_v2 = vadd.f32 %v1493_v57, %v1405_v63  ;;  %v4844_v63 = vor.u32 %v5566_v29, %v4843_v18  ;;  %v4867_v18 = vld [vmem:[%s8775_s0 + $0x2b0] sm:$0xf] }
 0x1f1   :  { %v1333_v43 = vpop.f32.mrf.mxu3  ;;  %v4868_v29 = vor.u32 %v5572_v54, %v4867_v18 }
 0x1f2   :  { %8828 = vst [vmem:[#allocation6_spill] sm:$0xff] %v6870_v2  ;;  %v1555_v11 = vpack.c.bf16 %v6870_v2, %v6868_v0 }
 0x1f4   :  { %1659 = vmatmul.bf16.gmra.mxu2 %v1555_v11 }
 0x1f5   :  { %v1407_v46 = vpop.f32.mrf.mxu0 }
 0x1f6   :  { %v1496_v4 = vpop.f32.mrf.mxu1  ;;  %v1408_v8 = vadd.f32 %v1407_v46, %v1319_v32 }
 0x1f8   :  { %1446 = vmatmul.bf16.gmra.mxu0 %v4844_v63  ;;  %v6890_v23 = vadd.f32 %v1496_v4, %v1408_v8  ;;  %v1237_v63 = vadd.f32 %v6572_v33, %v6546_v22  ;;  %v5578_v22 = vld [vmem:[%s8775_s0 + $0x2f4] sm:$0xf0]  ;;  %v4893_v33 = vld [vmem:[%s8775_s0 + $0x2f8] sm:$0xf0] }
 0x1f9   :  { %1535 = vmatmul.bf16.gmra.mxu1 %v4848_v20  ;;  %v1324_v20 = vadd.f32 %v6840_v40, %v6543_v17  ;;  %v1335_v4 = vpop.f32.mrf.mxu3  ;;  %v5575_v17 = vld [vmem:[%s8775_s0 + $0x2e4] sm:$0xf] }
 0x1fa   :  { %8829 = vst [vmem:[#allocation7_spill] sm:$0xff] %v6890_v23  ;;  %v1326_v46 = vadd.f32 %v1325_v16, %v1237_v63  ;;  %v4896_v18 = vor.u32 %v5575_v17, %v4893_v33 }
 0x1fd   :  { %v1409_v34 = vpop.f32.mrf.mxu0 }
 0x1fe   :  { %v1498_v47 = vpop.f32.mrf.mxu1  ;;  %v1410_v53 = vadd.f32 %v1409_v34, %v1321_v51 }
 0x200   :  { %v6892_v57 = vadd.f32 %v1498_v47, %v1410_v53  ;;  %v4891_v53 = vld [vmem:[%s8775_s0 + $0x2e0] sm:$0xf] }
 0x201   :  { %v4892_v16 = vor.u32 %v5578_v22, %v4891_v53  ;;  %v1338_v1 = vpop.f32.mrf.mxu3 }
 0x202   :  { %8830 = vst [vmem:[#allocation8_spill] sm:$0xff] %v6892_v57  ;;  %v1556_v9 = vpack.c.bf16 %v6892_v57, %v6890_v23 }
 0x204   :  { %1664 = vmatmul.bf16.gmra.mxu2 %v1556_v9  ;;  %v1242_v9 = vadd.f32 %v6592_v58, %v6578_v52 }
 0x205   :  { %v1412_v55 = vpop.f32.mrf.mxu0 }
 0x206   :  { %v1501_v11 = vpop.f32.mrf.mxu1  ;;  %v1413_v37 = vadd.f32 %v1412_v55, %v1324_v20 }
 0x208   :  { %1451 = vmatmul.bf16.gmra.mxu0 %v4868_v29  ;;  %v6912_v34 = vadd.f32 %v1501_v11, %v1413_v37  ;;  %v1329_v29 = vadd.f32 %v6866_v15, %v6575_v45  ;;  %v1334_v45 = vadd.f32 %v1333_v43, %v6595_v5  ;;  %v1252_v43 = vadd.f32 %v6632_v41, %v6618_v35 }
 0x209   :  { %1540 = vmatmul.bf16.gmra.mxu1 %v4872_v12  ;;  %v1331_v12 = vadd.f32 %v1330_v31, %v1242_v9 }
 0x20a   :  { %8831 = vst [vmem:[#allocation9_spill] sm:$0xff] %v6912_v34 }
 0x20d   :  { %v1414_v32 = vpop.f32.mrf.mxu0 }
 0x20e   :  { %v1503_v51 = vpop.f32.mrf.mxu1  ;;  %v1415_v8 = vadd.f32 %v1414_v32, %v1326_v46  ;;  %v1340_v46 = vpop.f32.mrf.mxu3 }
 0x20f   :  { %v1341_v9 = vadd.f32 %v1340_v46, %v1252_v43 }
 0x210   :  { %v6914_v47 = vadd.f32 %v1503_v51, %v1415_v8  ;;  %v1247_v8 = vadd.f32 %v6612_v19, %v6598_v10 }
 0x212   :  { %8832 = vst [vmem:[#allocation10_spill] sm:$0xff] %v6914_v47  ;;  %v1557_v40 = vpack.c.bf16 %v6914_v47, %v6912_v34  ;;  %v1336_v31 = vadd.f32 %v1335_v4, %v1247_v8  ;;  %v1339_v4 = vadd.f32 %v1338_v1, %v6615_v30  ;;  %v1257_v30 = vadd.f32 %v6652_v6, %v6638_v61 }
 0x214   :  { %1669 = vmatmul.bf16.gmra.mxu2 %v1557_v40  ;;  %v6943_v40 = vpop.f32.mrf.mxu2 }
 0x215   :  { %v1417_v54 = vpop.f32.mrf.mxu0 }
 0x216   :  { %v1506_v48 = vpop.f32.mrf.mxu1  ;;  %v1418_v55 = vadd.f32 %v1417_v54, %v1329_v29  ;;  %v1343_v15 = vpop.f32.mrf.mxu3 }
 0x217   :  { %v1344_v46 = vadd.f32 %v1343_v15, %v6635_v56  ;;  %v1262_v56 = vadd.f32 %v6672_v36, %v6658_v27 }
 0x218   :  { %1456 = vmatmul.bf16.gmra.mxu0 %v4892_v16  ;;  %v6934_v37 = vadd.f32 %v1506_v48, %v1418_v55 }
 0x219   :  { %1545 = vmatmul.bf16.gmra.mxu1 %v4896_v18 }
 0x21a   :  { %8833 = vst [vmem:[#allocation11_spill] sm:$0xff] %v6934_v37 }
 0x21d   :  { %v1419_v11 = vpop.f32.mrf.mxu0 }
 0x21e   :  { %v1508_v63 = vpop.f32.mrf.mxu1  ;;  %v1420_v20 = vadd.f32 %v1419_v11, %v1331_v12  ;;  %v1345_v48 = vpop.f32.mrf.mxu3 }
 0x220   :  { %v6936_v32 = vadd.f32 %v1508_v63, %v1420_v20 }
 0x222   :  { %8834 = vst [vmem:[#allocation12_spill] sm:$0xff] %v6936_v32  ;;  %v1558_v51 = vpack.c.bf16 %v6936_v32, %v6934_v37 }
 0x224   :  { %1674 = vmatmul.bf16.gmra.mxu2 %v1558_v51 }
 0x225   :  { %v1422_v52 = vpop.f32.mrf.mxu0 }
 0x226   :  { %v1511_v58 = vpop.f32.mrf.mxu1  ;;  %v1423_v53 = vadd.f32 %v1422_v52, %v1334_v45  ;;  %v1348_v11 = vpop.f32.mrf.mxu3  ;;  %v1346_v45 = vadd.f32 %v1345_v48, %v1257_v30 }
 0x227   :  { %v1349_v15 = vadd.f32 %v1348_v11, %v6655_v21  ;;  %v1267_v11 = vadd.f32 %v6692_v3, %v6678_v59 }
 0x228   :  { %v6945_v16 = vadd.f32 %v1511_v58, %v1423_v53 }
 0x22a   :  { %8835 = vst [vmem:[#allocation13_spill] sm:$0xff] %v6945_v16 }
 0x22d   :  { %v1424_v22 = vpop.f32.mrf.mxu0 }
 0x22e   :  { %v1513_v17 = vpop.f32.mrf.mxu1  ;;  %v1425_v33 = vadd.f32 %v1424_v22, %v1336_v31  ;;  %v1350_v1 = vpop.f32.mrf.mxu3 }
 0x22f   :  { %v1351_v48 = vadd.f32 %v1350_v1, %v1262_v56 }
 0x230   :  { %v6947_v18 = vadd.f32 %v1513_v17, %v1425_v33 }
 0x232   :  { %8836 = vst [vmem:[#allocation14_spill] sm:$0xff] %v6947_v18  ;;  %v1559_v54 = vpack.c.bf16 %v6947_v18, %v6945_v16 }
 0x234   :  { %1679 = vmatmul.bf16.gmra.mxu2 %v1559_v54 }
 0x235   :  { %v1427_v10 = vpop.f32.mrf.mxu0 }
 0x236   :  { %v1516_v19 = vpop.f32.mrf.mxu1  ;;  %v1428_v29 = vadd.f32 %v1427_v10, %v1339_v4 }
 0x237   :  { %v6951_v5 = vpop.f32.mrf.mxu2 }
 0x238   :  { %v6958_v51 = vadd.f32 %v1516_v19, %v1428_v29  ;;  %v1353_v19 = vpop.f32.mrf.mxu3 }
 0x239   :  { %v1354_v1 = vadd.f32 %v1353_v19, %v6675_v50  ;;  %v1272_v50 = vadd.f32 %v6724_v49, %v6707_v38 }
 0x23a   :  { %8837 = vst [vmem:[#allocation15_spill] sm:$0xff] %v6958_v51 }
 0x23d   :  { %v1429_v12 = vpop.f32.mrf.mxu0 }
 0x23e   :  { %v1518_v55 = vpop.f32.mrf.mxu1  ;;  %v1430_v63 = vadd.f32 %v1429_v12, %v1341_v9 }
 0x23f   :  { %v6956_v20 = vpop.f32.mrf.mxu2 }
 0x240   :  { %v6960_v52 = vadd.f32 %v1518_v55, %v1430_v63  ;;  %v1355_v9 = vpop.f32.mrf.mxu3 }
 0x242   :  { %8838 = vst [vmem:[#allocation16_spill] sm:$0xff] %v6960_v52  ;;  %v1560_v58 = vpack.c.bf16 %v6960_v52, %v6958_v51 }
 0x244   :  { %1684 = vmatmul.bf16.gmra.mxu2 %v1560_v58 }
 0x245   :  { %v1432_v8 = vpop.f32.mrf.mxu0 }
 0x246   :  { %v1521_v35 = vpop.f32.mrf.mxu1  ;;  %v1433_v31 = vadd.f32 %v1432_v8, %v1344_v46 }
 0x247   :  { %v6964_v41 = vpop.f32.mrf.mxu2 }
 0x248   :  { %v6971_v54 = vadd.f32 %v1521_v35, %v1433_v31  ;;  %v1358_v36 = vpop.f32.mrf.mxu3 }
 0x249   :  { %v1359_v19 = vadd.f32 %v1358_v36, %v6704_v28  ;;  %v1277_v36 = vadd.f32 %v6756_v39, %v6739_v24 }
 0x24a   :  { %8839 = vst [vmem:[#allocation17_spill] sm:$0xff] %v6971_v54 }
 0x24d   :  { %v1434_v53 = vpop.f32.mrf.mxu0 }
 0x24e   :  { %v1523_v22 = vpop.f32.mrf.mxu1  ;;  %v1435_v17 = vadd.f32 %v1434_v53, %v1346_v45  ;;  %v1356_v45 = vadd.f32 %v1355_v9, %v1267_v11 }
 0x24f   :  { %v6969_v33 = vpop.f32.mrf.mxu2 }
 0x250   :  { %v6973_v10 = vadd.f32 %v1523_v22, %v1435_v17 }
 0x252   :  { %8840 = vst [vmem:[#allocation18_spill] sm:$0xff] %v6973_v10  ;;  %v1561_v43 = vpack.c.bf16 %v6973_v10, %v6971_v54 }
 0x254   :  { %1689 = vmatmul.bf16.gmra.mxu2 %v1561_v43 }
 0x255   :  { %v1437_v61 = vpop.f32.mrf.mxu0 }
 0x256   :  { %v1526_v6 = vpop.f32.mrf.mxu1  ;;  %v1438_v29 = vadd.f32 %v1437_v61, %v1349_v15  ;;  %v1360_v61 = vpop.f32.mrf.mxu3 }
 0x257   :  { %v6977_v4 = vpop.f32.mrf.mxu2 }
 0x258   :  { %v6984_v8 = vadd.f32 %v1526_v6, %v1438_v29  ;;  %v1361_v29 = vadd.f32 %v1360_v61, %v1272_v50 }
 0x25a   :  { %8841 = vst [vmem:[#allocation19_spill] sm:$0xff] %v6984_v8 }
 0x25d   :  { %v1439_v12 = vpop.f32.mrf.mxu0 }
 0x25e   :  { %v1528_v55 = vpop.f32.mrf.mxu1  ;;  %v1440_v63 = vadd.f32 %v1439_v12, %v1351_v48  ;;  %v1363_v9 = vpop.f32.mrf.mxu3 }
 0x25f   :  { %v6982_v58 = vpop.f32.mrf.mxu2 }
 0x260   :  { %v6986_v35 = vadd.f32 %v1528_v55, %v1440_v63 }
 0x262   :  { %8842 = vst [vmem:[#allocation20_spill] sm:$0xff] %v6986_v35  ;;  %v1562_v30 = vpack.c.bf16 %v6986_v35, %v6984_v8 }
 0x264   :  { %1694 = vmatmul.bf16.gmra.mxu2 %v1562_v30 }
 0x265   :  { %v1442_v46 = vpop.f32.mrf.mxu0 }
 0x266   :  { %v1531_v27 = vpop.f32.mrf.mxu1  ;;  %v1443_v31 = vadd.f32 %v1442_v46, %v1354_v1 }
 0x267   :  { %v6990_v21 = vpop.f32.mrf.mxu2 }
 0x268   :  { %v6997_v6 = vadd.f32 %v1531_v27, %v1443_v31  ;;  %v1364_v31 = vadd.f32 %v1363_v9, %v6736_v13  ;;  %v1282_v13 = vadd.f32 %v6943_v40, %v6762_v7 }
 0x26a   :  { %8843 = vst [vmem:[#allocation21_spill] sm:$0xff] %v6997_v6 }
 0x26d   :  { %v1444_v53 = vpop.f32.mrf.mxu0 }
 0x26e   :  { %v1533_v22 = vpop.f32.mrf.mxu1  ;;  %v1445_v17 = vadd.f32 %v1444_v53, %v1356_v45  ;;  %v1365_v45 = vpop.f32.mrf.mxu3 }
 0x26f   :  { %v6995_v43 = vpop.f32.mrf.mxu2  ;;  %v1366_v53 = vadd.f32 %v1365_v45, %v1277_v36 }
 0x270   :  { %v6999_v56 = vadd.f32 %v1533_v22, %v1445_v17 }
 0x272   :  { %8844 = vst [vmem:[#allocation22_spill] sm:$0xff] %v6999_v56  ;;  %v1563_v15 = vpack.c.bf16 %v6999_v56, %v6997_v6  ;;  %v1721_v56 = vsel %vm1720_vm0, %v6951_v5, -inf }
 0x274   :  { %1699 = vmatmul.bf16.gmra.mxu2 %v1563_v15 }
 0x275   :  { %v1447_v48 = vpop.f32.mrf.mxu0 }
 0x276   :  { %v1536_v59 = vpop.f32.mrf.mxu1  ;;  %v1448_v12 = vadd.f32 %v1447_v48, %v1359_v19  ;;  %v1368_v48 = vpop.f32.mrf.mxu3 }
 0x277   :  { %v7003_v3 = vpop.f32.mrf.mxu2 }
 0x278   :  { %v7010_v27 = vadd.f32 %v1536_v59, %v1448_v12  ;;  %v1733_v10 = vsel %vm1720_vm0, %v7003_v3, -inf }
 0x27a   :  { %8845 = vst [vmem:[#allocation23_spill] sm:$0xff] %v7010_v27 }
 0x27d   :  { %v1449_v55 = vpop.f32.mrf.mxu0 }
 0x27e   :  { %v1538_v63 = vpop.f32.mrf.mxu1  ;;  %v1450_v30 = vadd.f32 %v1449_v55, %v1361_v29  ;;  %v1370_v9 = vpop.f32.mrf.mxu3  ;;  %v1369_v55 = vadd.f32 %v1368_v48, %v6759_v60 }
 0x27f   :  { %v7008_v46 = vpop.f32.mrf.mxu2 }
 0x280   :  { %v7012_v11 = vadd.f32 %v1538_v63, %v1450_v30  ;;  %v1371_v63 = vadd.f32 %v1370_v9, %v1282_v13 }
 0x282   :  { %8846 = vst [vmem:[#allocation24_spill] sm:$0xff] %v7012_v11  ;;  %v1564_v1 = vpack.c.bf16 %v7012_v11, %v7010_v27 }
 0x284   :  { %1704 = vmatmul.bf16.gmra.mxu2 %v1564_v1 }
 0x285   :  { %v1452_v38 = vpop.f32.mrf.mxu0 }
 0x286   :  { %v1541_v49 = vpop.f32.mrf.mxu1  ;;  %v1453_v22 = vadd.f32 %v1452_v38, %v1364_v31 }
 0x287   :  { %v7016_v28 = vpop.f32.mrf.mxu2 }
 0x288   :  { %v7023_v50 = vadd.f32 %v1541_v49, %v1453_v22  ;;  %v1737_v11 = vsel %vm1720_vm0, %v7016_v28, -inf }
 0x28a   :  { %8847 = vst [vmem:[#allocation25_spill] sm:$0xff] %v7023_v50 }
 0x28d   :  { %v1454_v17 = vpop.f32.mrf.mxu0 }
 0x28e   :  { %v1543_v61 = vpop.f32.mrf.mxu1  ;;  %v1455_v15 = vadd.f32 %v1454_v17, %v1366_v53 }
 0x28f   :  { %v7021_v59 = vpop.f32.mrf.mxu2 }
 0x290   :  { %v7025_v19 = vadd.f32 %v1543_v61, %v1455_v15  ;;  %v1739_v27 = vsel %vm1720_vm0, %v7021_v59, -inf }
 0x292   :  { %8848 = vst [vmem:[#allocation26_spill] sm:$0xff] %v7025_v19  ;;  %v1565_v29 = vpack.c.bf16 %v7025_v19, %v7023_v50  ;;  %v1725_v19 = vsel %vm1720_vm0, %v6977_v4, -inf  ;;  %v1735_v50 = vsel %vm1720_vm0, %v7008_v46, -inf }
 0x293   :  { %v1726_v18 = vmax.f32 %v1721_v56, %v1725_v19 }
 0x294   :  { %1709 = vmatmul.bf16.gmra.mxu2 %v1565_v29 }
 0x295   :  { %v1457_v12 = vpop.f32.mrf.mxu0 }
 0x296   :  { %v1546_v24 = vpop.f32.mrf.mxu1  ;;  %v1458_v30 = vadd.f32 %v1457_v12, %v1369_v55 }
 0x297   :  { %v7029_v39 = vpop.f32.mrf.mxu2 }
 0x298   :  { %v7036_v36 = vadd.f32 %v1546_v24, %v1458_v30 }
 0x29a   :  { %8849 = vst [vmem:[#allocation27_spill] sm:$0xff] %v7036_v36 }
 0x29d   :  { %v1459_v1 = vpop.f32.mrf.mxu0 }
 0x29e   :  { %v1460_v45 = vadd.f32 %v1459_v1, %v1371_v63  ;;  %v1548_v38 = vpop.f32.mrf.mxu1  ;;  %v1727_v1 = vsel %vm1720_vm0, %v6982_v58, -inf }
 0x29f   :  { %v7034_v49 = vpop.f32.mrf.mxu2 }
 0x2a0   :  { %v7038_v31 = vadd.f32 %v1548_v38, %v1460_v45  ;;  %v1729_v45 = vsel %vm1720_vm0, %v6990_v21, -inf  ;;  %v1731_v38 = vsel %vm1720_vm0, %v6995_v43, -inf  ;;  %v1743_v54 = vsel %vm1720_vm0, %v7034_v49, -inf }
 0x2a2   :  { %8850 = vst [vmem:[#allocation28_spill] sm:$0xff] %v7038_v31  ;;  %v1566_v53 = vpack.c.bf16 %v7038_v31, %v7036_v36  ;;  %v1723_v31 = vsel %vm1720_vm0, %v6964_v41, -inf  ;;  %v1724_v36 = vsel %vm1720_vm0, %v6969_v33, -inf }
 0x2a3   :  { %v1730_v35 = vmax.f32 %v1723_v31, %v1729_v45  ;;  %v1732_v8 = vmax.f32 %v1724_v36, %v1731_v38  ;;  %v1741_v36 = vsel %vm1720_vm0, %v7029_v39, -inf  ;;  %v1734_v38 = vmax.f32 %v1726_v18, %v1733_v10 }
 0x2a4   :  { %1714 = vmatmul.bf16.gmra.mxu2 %v1566_v53  ;;  %v1722_v53 = vsel %vm1720_vm0, %v6956_v20, -inf }
 0x2a5   :  { %v1728_v6 = vmax.f32 %v1722_v53, %v1727_v1  ;;  %v1738_v32 = vmax.f32 %v1730_v35, %v1737_v11  ;;  %v1740_v37 = vmax.f32 %v1732_v8, %v1739_v27 }
 0x2a7   :  { %v7042_v22 = vpop.f32.mrf.mxu2  ;;  %v1736_v16 = vmax.f32 %v1728_v6, %v1735_v50  ;;  %v1742_v50 = vmax.f32 %v1734_v38, %v1741_v36 }
 0x2a8   :  { %v1745_v52 = vsel %vm1720_vm0, %v7042_v22, -inf }
 0x2a9   :  { %v1744_v53 = vmax.f32 %v1736_v16, %v1743_v54  ;;  %v1746_v56 = vmax.f32 %v1738_v32, %v1745_v52 }
 0x2af   :  { %v7044_v7 = vpop.f32.mrf.mxu2 }
 0x2b0   :  { %v1747_v51 = vsel %vm1720_vm0, %v7044_v7, -inf }
 0x2b1   :  { %v1748_v6 = vmax.f32 %v1740_v37, %v1747_v51 }
 0x2b7   :  { %v7046_v60 = vpop.f32.mrf.mxu2 }
 0x2b8   :  { %v1749_v8 = vsel %vm1720_vm0, %v7046_v60, -inf }
 0x2b9   :  { %v1750_v51 = vmax.f32 %v1742_v50, %v1749_v8 }
 0x2bf   :  { %v7048_v40 = vpop.f32.mrf.mxu2 }
 0x2c0   :  { %v1751_v31 = vsel %vm1720_vm0, %v7048_v40, -inf }
 0x2c1   :  { %v1752_v19 = vmax.f32 %v1744_v53, %v1751_v31 }
 0x2c7   :  { %v7050_v17 = vpop.f32.mrf.mxu2 }
 0x2c8   :  { %v1753_v1 = vsel %vm1720_vm0, %v7050_v17, -inf }
 0x2c9   :  { %v1754_v34 = vmax.f32 %v1746_v56, %v1753_v1 }
 0x2cf   :  { %v7052_v61 = vpop.f32.mrf.mxu2 }
 0x2d0   :  { %v1755_v45 = vsel %vm1720_vm0, %v7052_v61, -inf }
 0x2d1   :  { %v1756_v57 = vmax.f32 %v1748_v6, %v1755_v45 }
 0x2d7   :  { %v7054_v15 = vpop.f32.mrf.mxu2 }
 0x2d8   :  { %v1757_v32 = vsel %vm1720_vm0, %v7054_v15, -inf }
 0x2d9   :  { %v1758_v45 = vmax.f32 %v1750_v51, %v1757_v32 }
 0x2df   :  { %v7056_v48 = vpop.f32.mrf.mxu2 }
 0x2e0   :  { %v1759_v35 = vsel %vm1720_vm0, %v7056_v48, -inf }
 0x2e1   :  { %v1760_v52 = vmax.f32 %v1752_v19, %v1759_v35 }
 0x2e7   :  { %v7058_v29 = vpop.f32.mrf.mxu2 }
 0x2e8   :  { %v1761_v27 = vsel %vm1720_vm0, %v7058_v29, -inf }
 0x2e9   :  { %v1762_v54 = vmax.f32 %v1754_v34, %v1761_v27 }
 0x2ef   :  { %v7060_v12 = vpop.f32.mrf.mxu2 }
 0x2f0   :  { %v1763_v11 = vsel %vm1720_vm0, %v7060_v12, -inf }
 0x2f1   :  { %v1764_v10 = vmax.f32 %v1756_v57, %v1763_v11 }
 0x2f7   :  { %v7062_v24 = vpop.f32.mrf.mxu2 }
 0x2f8   :  { %v1765_v36 = vsel %vm1720_vm0, %v7062_v24, -inf }
 0x2f9   :  { %v1766_v57 = vmax.f32 %v1758_v45, %v1765_v36 }
 0x2ff   :  { %v7064_v13 = vpop.f32.mrf.mxu2 }
 0x300   :  { %v1767_v37 = vsel %vm1720_vm0, %v7064_v13, -inf }
 0x301   :  { %v1768_v38 = vmax.f32 %v1760_v52, %v1767_v37 }
 0x307   :  { %v7066_v9 = vpop.f32.mrf.mxu2 }
 0x308   :  { %v1769_v16 = vsel %vm1720_vm0, %v7066_v9, -inf }
 0x309   :  { %v1770_v53 = vmax.f32 %v1762_v54, %v1769_v16 }
 0x30f   :  { %v7068_v55 = vpop.f32.mrf.mxu2 }
 0x310   :  { %v1771_v18 = vsel %vm1720_vm0, %v7068_v55, -inf }
 0x311   :  { %v1772_v56 = vmax.f32 %v1764_v10, %v1771_v18 }
 0x317   :  { %v7070_v63 = vpop.f32.mrf.mxu2 }
 0x318   :  { %v1773_v8 = vsel %vm1720_vm0, %v7070_v63, -inf }
 0x319   :  { %v1774_v50 = vmax.f32 %v1766_v57, %v1773_v8 }
 0x31f   :  { %v7072_v30 = vpop.f32.mrf.mxu2 }
 0x320   :  { %v1775_v31 = vsel %vm1720_vm0, %v7072_v30, -inf }
 0x321   :  { %v1776_v35 = vmax.f32 %v1768_v38, %v1775_v31 }
 0x323   :  { %v1781_v23 = vmax.f32 %v1774_v50, %v1776_v35 }
 0x327   :  { %v7104_v47 = vpop.f32.mrf.mxu2 }
 0x328   :  { %v1777_v1 = vsel %vm1720_vm0, %v7104_v47, -inf }
 0x329   :  { %v1778_v27 = vmax.f32 %v1770_v53, %v1777_v1 }
 0x32f   :  { %v1717_v6 = vpop.f32.mrf.mxu2 }
 0x330   :  { %v1779_v34 = vsel %vm1720_vm0, %v1717_v6, -inf }
 0x331   :  { %v1780_v11 = vmax.f32 %v1772_v56, %v1779_v34 }
 0x333   :  { %v1782_v19 = vmax.f32 %v1778_v27, %v1780_v11 }
 0x335   :  { %v1783_v2 = vmax.f32 %v1781_v23, %v1782_v19 }
 0x337   :  { %v1784_v0 = vrot.slane %v1783_v2, 4 }
 0x339   :  { %v1785_v62 = vmax.f32 %v1783_v2, %v1784_v0 }
 0x33b   :  { %v1786_v32 = vrot.slane %v1785_v62, 2 }
 0x33d   :  { %v1787_v37 = vmax.f32 %v1785_v62, %v1786_v32 }
 0x33f   :  { %v1788_v16 = vrot.slane %v1787_v37, 1 }
 0x341   :  { %v7139_v18 = vmax.f32 %v1787_v37, %v1788_v16 }
 0x343   :  { %v1804_v51 = vsub.f32 %v7042_v22, %v7139_v18  ;;  %v1805_v52 = vsub.f32 %v7044_v7, %v7139_v18  ;;  %v1802_v54 = vsub.f32 %v7029_v39, %v7139_v18  ;;  %v1803_v10 = vsub.f32 %v7034_v49, %v7139_v18 }
 0x344   :  { %v1800_v62 = vsub.f32 %v7016_v28, %v7139_v18  ;;  %v1801_v2 = vsub.f32 %v7021_v59, %v7139_v18  ;;  %v1798_v22 = vsub.f32 %v7003_v3, %v7139_v18  ;;  %v1799_v39 = vsub.f32 %v7008_v46, %v7139_v18 }
 0x345   :  { %v1850_v23 = vmul.f32 1.442695, %v1804_v51  ;;  %v1852_v36 = vmul.f32 1.442695, %v1805_v52  ;;  %v1846_v0 = vmul.f32 1.442695, %v1802_v54  ;;  %v1821_v1 = vsub.f32 %v1717_v6, %v7139_v18 }
 0x346   :  { %v1848_v31 = vmul.f32 1.442695, %v1803_v10  ;;  %v1842_v7 = vmul.f32 1.442695, %v1800_v62  ;;  %v1844_v49 = vmul.f32 1.442695, %v1801_v2  ;;  %v1794_v28 = vsub.f32 %v6977_v4, %v7139_v18 }
 0x347   :  { %5769 = vpow2.f32 %v1850_v23  ;;  %v1796_v59 = vsub.f32 %v6990_v21, %v7139_v18  ;;  %v1838_v38 = vmul.f32 1.442695, %v1798_v22  ;;  %v1797_v53 = vsub.f32 %v6995_v43, %v7139_v18 }
 0x348   :  { %5771 = vpow2.f32 %v1852_v36  ;;  %v1840_v46 = vmul.f32 1.442695, %v1799_v39  ;;  %v1884_v6 = vmul.f32 1.442695, %v1821_v1  ;;  %v1820_v4 = vsub.f32 %v7104_v47, %v7139_v18 }
 0x349   :  { %5773 = vpow2.f32 %v1846_v0  ;;  %v1818_v21 = vsub.f32 %v7070_v63, %v7139_v18  ;;  %v1830_v57 = vmul.f32 1.442695, %v1794_v28  ;;  %v1819_v43 = vsub.f32 %v7072_v30, %v7139_v18 }
 0x34a   :  { %5775 = vpow2.f32 %v1848_v31  ;;  %v1834_v35 = vmul.f32 1.442695, %v1796_v59  ;;  %v1795_v27 = vsub.f32 %v6982_v58, %v7139_v18  ;;  %v1836_v11 = vmul.f32 1.442695, %v1797_v53 }
 0x34b   :  { %5777 = vpow2.f32 %v1842_v7  ;;  %v1792_v50 = vsub.f32 %v6964_v41, %v7139_v18  ;;  %v1882_v19 = vmul.f32 1.442695, %v1820_v4  ;;  %v1816_v30 = vsub.f32 %v7066_v9, %v7139_v18 }
 0x34c   :  { %5779 = vpow2.f32 %v1844_v49  ;;  %v1878_v37 = vmul.f32 1.442695, %v1818_v21  ;;  %v1817_v58 = vsub.f32 %v7068_v55, %v7139_v18  ;;  %v1880_v16 = vmul.f32 1.442695, %v1819_v43 }
 0x34d   :  { %v7160_v45 = vpop.eup %5769  ;;  %5781 = vpow2.f32 %v1838_v38  ;;  %v1793_v41 = vsub.f32 %v6969_v33, %v7139_v18  ;;  %v1832_v51 = vmul.f32 1.442695, %v1795_v27  ;;  %v1790_v54 = vsub.f32 %v6951_v5, %v7139_v18 }
 0x34e   :  { %v7164_v3 = vpop.eup %5771  ;;  %5783 = vpow2.f32 %v1840_v46  ;;  %v1826_v10 = vmul.f32 1.442695, %v1792_v50  ;;  %v1814_v55 = vsub.f32 %v7062_v24, %v7139_v18  ;;  %v1874_v36 = vmul.f32 1.442695, %v1816_v30 }
 0x34f   :  { %v7168_v56 = vpop.eup %5773  ;;  %v1925_v8 = vpack.c.bf16 %v7164_v3, %v7160_v45  ;;  %5785 = vpow2.f32 %v1884_v6  ;;  %v1815_v62 = vsub.f32 %v7064_v13, %v7139_v18  ;;  %v1876_v0 = vmul.f32 1.442695, %v1817_v58 }
 0x350   :  { %v7174_v34 = vpop.eup %5775  ;;  %5787 = vpow2.f32 %v1830_v57  ;;  %v1791_v2 = vsub.f32 %v6956_v20, %v7139_v18  ;;  %v1828_v31 = vmul.f32 1.442695, %v1793_v41  ;;  %v1822_v24 = vmul.f32 1.442695, %v1790_v54 }
 0x351   :  { %2094 = vmatpush.bf16.msrb.mxu3 %v1925_v8  ;;  %v7182_v47 = vpop.eup %5777  ;;  %v1924_v63 = vpack.c.bf16 %v7174_v34, %v7168_v56  ;;  %5789 = vpow2.f32 %v1834_v35  ;;  %v1812_v13 = vsub.f32 %v7058_v29, %v7139_v18  ;;  %v1870_v49 = vmul.f32 1.442695, %v1814_v55  ;;  %v5636_v55 = vld [vmem:[%s8777_s14 + $0x4] sm:$0xf0] }
 0x352   :  { %v7188_v32 = vpop.eup %5779  ;;  %5791 = vpow2.f32 %v1836_v11  ;;  %v1813_v20 = vsub.f32 %v7060_v12, %v7139_v18  ;;  %v1872_v28 = vmul.f32 1.442695, %v1815_v62  ;;  %v1824_v38 = vmul.f32 1.442695, %v1791_v2 }
 0x353   :  { %v7196_v52 = vpop.eup %5781  ;;  %5793 = vpow2.f32 %v1882_v19  ;;  %v1923_v9 = vpack.c.bf16 %v7188_v32, %v7182_v47  ;;  %v1810_v12 = vsub.f32 %v7054_v15, %v7139_v18  ;;  %v1866_v4 = vmul.f32 1.442695, %v1812_v13 }
 0x354   :  { %v7202_v23 = vpop.eup %5783  ;;  %5795 = vpow2.f32 %v1878_v37  ;;  %v1811_v21 = vsub.f32 %v7056_v48, %v7139_v18  ;;  %v1868_v57 = vmul.f32 1.442695, %v1813_v20  ;;  %v1808_v50 = vsub.f32 %v7050_v17, %v7139_v18 }
 0x355   :  { %2095 = vmatpush.bf16.msrb.mxu3 %v1924_v63  ;;  %v7206_v33 = vpop.eup %5785  ;;  %5797 = vpow2.f32 %v1880_v16  ;;  %v1922_v7 = vpack.c.bf16 %v7202_v23, %v7196_v52  ;;  %v1862_v48 = vmul.f32 1.442695, %v1810_v12  ;;  %v1809_v63 = vsub.f32 %v7052_v61, %v7139_v18  ;;  %v5125_v12 = vld [vmem:[%s8777_s14 + $0x8] sm:$0xf0] }
 0x356   :  { %v7210_v5 = vpop.eup %5787  ;;  %5799 = vpow2.f32 %v1832_v51  ;;  %v1864_v30 = vmul.f32 1.442695, %v1811_v21  ;;  %v1806_v51 = vsub.f32 %v7046_v60, %v7139_v18  ;;  %v1858_v54 = vmul.f32 1.442695, %v1808_v50  ;;  %v5638_v21 = vld [vmem:[%s8777_s14 + $0x14] sm:$0xf0] }
 0x357   :  { %v7214_v22 = vpop.eup %5789  ;;  %5801 = vpow2.f32 %v1826_v10  ;;  %v1807_v61 = vsub.f32 %v7048_v40, %v7139_v18  ;;  %v1860_v10 = vmul.f32 1.442695, %v1809_v63  ;;  %v5637_v50 = vld [vmem:[%s8777_s14 + $0x14] sm:$0xf]  ;;  %v5139_v63 = vld [vmem:[%s8777_s14 + $0x20] sm:$0xf] }
 0x358   :  { %v7218_v39 = vpop.eup %5791  ;;  %5803 = vpow2.f32 %v1874_v36  ;;  %v1854_v18 = vmul.f32 1.442695, %v1806_v51  ;;  %v5639_v51 = vld [vmem:[%s8777_s14 + $0x24] sm:$0xf] }
 0x359   :  { %2096 = vmatpush.bf16.msrb.mxu3 %v1923_v9  ;;  %v7222_v1 = vpop.eup %5793  ;;  %5805 = vpow2.f32 %v1876_v0  ;;  %v1921_v29 = vpack.c.bf16 %v7218_v39, %v7214_v22  ;;  %v5123_v9 = vld [vmem:[%s8777_s14] sm:$0xf]  ;;  %v1856_v2 = vmul.f32 1.442695, %v1807_v61  ;;  %v5147_v61 = vld [vmem:[%s8777_s14 + $0x30] sm:$0xf] }
 0x35a   :  { %v7226_v59 = vpop.eup %5795  ;;  %5807 = vpow2.f32 %v1828_v31  ;;  %v1933_v53 = vpack.c.bf16 %v7206_v33, %v7222_v1  ;;  %v5124_v0 = vor.u32 %v5636_v55, %v5123_v9 }
 0x35b   :  { %v7230_v46 = vpop.eup %5797  ;;  %5809 = vpow2.f32 %v1822_v24 }
 0x35c   :  { %v7234_v6 = vpop.eup %5799  ;;  %5811 = vpow2.f32 %v1870_v49  ;;  %2183 = vmatpush.bf16.msra.mxu0 %v1933_v53  ;;  %v1932_v35 = vpack.c.bf16 %v7230_v46, %v7226_v59 }
 0x35d   :  { %2097 = vmatpush.bf16.msrb.mxu3 %v1922_v7  ;;  %v7238_v8 = vpop.eup %5801  ;;  %5813 = vpow2.f32 %v1872_v28  ;;  %v1920_v15 = vpack.c.bf16 %v7234_v6, %v7210_v5 }
 0x35e   :  { %v7242_v43 = vpop.eup %5803  ;;  %5815 = vpow2.f32 %v1824_v38 }
 0x35f   :  { %v7246_v27 = vpop.eup %5805  ;;  %5817 = vpow2.f32 %v1866_v4  ;;  %v5131_v4 = vld [vmem:[%s8777_s14 + $0x10] sm:$0xf] }
 0x360   :  { %v7250_v11 = vpop.eup %5807  ;;  %2184 = vmatpush.bf16.msra.mxu0 %v1932_v35  ;;  %5819 = vpow2.f32 %v1868_v57  ;;  %v1931_v58 = vpack.c.bf16 %v7246_v27, %v7242_v43 }
 0x361   :  { %2098 = vmatpush.bf16.msrb.mxu3 %v1921_v29  ;;  %v7254_v19 = vpop.eup %5809  ;;  %v1919_v17 = vpack.c.bf16 %v7250_v11, %v7238_v8  ;;  %5821 = vpow2.f32 %v1862_v48  ;;  %v5635_v29 = vld [vmem:[%s8777_s14 + $0x4] sm:$0xf]  ;;  %v5133_v48 = vld [vmem:[%s8777_s14 + $0x18] sm:$0xf0] }
 0x362   :  { %v7258_v37 = vpop.eup %5811  ;;  %5823 = vpow2.f32 %v1864_v30  ;;  %v5128_v35 = vor.u32 %v5635_v29, %v5125_v12  ;;  %v5640_v30 = vld [vmem:[%s8777_s14 + $0x24] sm:$0xf0]  ;;  %v5163_v29 = vld [vmem:[%s8777_s14 + $0x50] sm:$0xf]  ;;  %v5646_v12 = vld [vmem:[%s8777_s14 + $0x54] sm:$0xf0] }
 0x363   :  { %v7262_v16 = vpop.eup %5813  ;;  %5825 = vpow2.f32 %v1858_v54  ;;  %v5141_v54 = vld [vmem:[%s8777_s14 + $0x28] sm:$0xf0] }
 0x364   :  { %v7266_v41 = vpop.eup %5815  ;;  %2185 = vmatpush.bf16.msra.mxu0 %v1931_v58  ;;  %v1930_v60 = vpack.c.bf16 %v7262_v16, %v7258_v37  ;;  %5827 = vpow2.f32 %v1860_v10  ;;  %v5136_v58 = vor.u32 %v5637_v50, %v5133_v48  ;;  %v5642_v10 = vld [vmem:[%s8777_s14 + $0x34] sm:$0xf0]  ;;  %v5144_v9 = vor.u32 %v5639_v51, %v5141_v54  ;;  %v5648_v50 = vld [vmem:[%s8777_s14 + $0x64] sm:$0xf0] }
 0x365   :  { %2099 = vmatpush.bf16.msrb.mxu3 %v1920_v15  ;;  %v7278_v36 = vpop.eup %5817  ;;  %v1918_v40 = vpack.c.bf16 %v7266_v41, %v7254_v19  ;;  %5829 = vpow2.f32 %v1854_v18  ;;  %v5132_v15 = vor.u32 %v5638_v21, %v5131_v4  ;;  %v5148_v55 = vor.u32 %v5642_v10, %v5147_v61  ;;  %v5155_v18 = vld [vmem:[%s8777_s14 + $0x40] sm:$0xf]  ;;  %v5650_v51 = vld [vmem:[%s8777_s14 + $0x74] sm:$0xf0]  ;;  %v5649_v10 = vld [vmem:[%s8777_s14 + $0x74] sm:$0xf] }
 0x366   :  { %v7282_v62 = vpop.eup %5819  ;;  %5831 = vpow2.f32 %v1856_v2  ;;  %v5164_v21 = vor.u32 %v5646_v12, %v5163_v29 }
 0x367   :  { %v7286_v31 = vpop.eup %5821  ;;  %v1929_v24 = vpack.c.bf16 %v7282_v62, %v7278_v36 }
 0x368   :  { %2186 = vmatpush.bf16.msra.mxu0 %v1930_v60  ;;  %v7290_v7 = vpop.eup %5823  ;;  %v5641_v60 = vld [vmem:[%s8777_s14 + $0x34] sm:$0xf] }
 0x369   :  { %2100 = vmatpush.bf16.msrb.mxu3 %v1919_v17  ;;  %v7292_v13 = vpop.eup %5825  ;;  %v1928_v49 = vpack.c.bf16 %v7290_v7, %v7286_v31  ;;  %v5140_v17 = vor.u32 %v5640_v30, %v5139_v63  ;;  %v5647_v30 = vld [vmem:[%s8777_s14 + $0x64] sm:$0xf] }
 0x36a   :  { %v7296_v20 = vpop.eup %5827 }
 0x36b   :  { %v7298_v28 = vpop.eup %5829  ;;  %v1927_v38 = vpack.c.bf16 %v7296_v20, %v7292_v13 }
 0x36c   :  { %2187 = vmatpush.bf16.msra.mxu0 %v1929_v24  ;;  %v7302_v53 = vpop.eup %5831 }
 0x36d   :  { %2101 = vmatpush.bf16.msrb.mxu3 %v1918_v40  ;;  %v1926_v57 = vpack.c.bf16 %v7302_v53, %v7298_v28  ;;  %v5149_v40 = vld [vmem:[%s8777_s14 + $0x38] sm:$0xf0] }
 0x36e   :  { %v5152_v2 = vor.u32 %v5641_v60, %v5149_v40  ;;  %v5652_v60 = vld [vmem:[%s8777_s14 + $0x84] sm:$0xf0] }
 0x370   :  { %2102 = vmatmul.bf16.vlgmr.msrb.gmra.mxu3 %v5124_v0  ;;  %2188 = vmatpush.bf16.msra.mxu0 %v1928_v49  ;;  %v5644_v0 = vld [vmem:[%s8777_s14 + $0x44] sm:$0xf0]  ;;  %v5643_v49 = vld [vmem:[%s8777_s14 + $0x44] sm:$0xf] }
 0x371   :  { %v5156_v24 = vor.u32 %v5644_v0, %v5155_v18 }
 0x374   :  { %2189 = vmatpush.bf16.msra.mxu0 %v1927_v38  ;;  %v5157_v38 = vld [vmem:[%s8777_s14 + $0x48] sm:$0xf0] }
 0x375   :  { %v5160_v4 = vor.u32 %v5643_v49, %v5157_v38  ;;  %v5195_v49 = vld [vmem:[%s8777_s14 + $0x90] sm:$0xf]  ;;  %v5654_v38 = vld [vmem:[%s8777_s14 + $0x94] sm:$0xf0] }
 0x378   :  { %2190 = vmatpush.bf16.msra.mxu0 %v1926_v57  ;;  %v5645_v57 = vld [vmem:[%s8777_s14 + $0x54] sm:$0xf] }
 0x37b   :  { %2191 = vmatmul.bf16.vlgmr.msra.gmra.mxu0 %v5128_v35  ;;  %v5165_v35 = vld [vmem:[%s8777_s14 + $0x58] sm:$0xf0] }
 0x37c   :  { %v5168_v48 = vor.u32 %v5645_v57, %v5165_v35 }
 0x380   :  { %2107 = vmatmul.bf16.gmra.mxu3 %v5132_v15  ;;  %v5171_v15 = vld [vmem:[%s8777_s14 + $0x60] sm:$0xf] }
 0x381   :  { %v5172_v63 = vor.u32 %v5648_v50, %v5171_v15 }
 0x38b   :  { %2196 = vmatmul.bf16.gmra.mxu0 %v5136_v58  ;;  %v5173_v58 = vld [vmem:[%s8777_s14 + $0x68] sm:$0xf0] }
 0x38c   :  { %v5176_v54 = vor.u32 %v5647_v30, %v5173_v58  ;;  %v5653_v58 = vld [vmem:[%s8777_s14 + $0x94] sm:$0xf] }
 0x390   :  { %2112 = vmatmul.bf16.gmra.mxu3 %v5140_v17  ;;  %v5179_v17 = vld [vmem:[%s8777_s14 + $0x70] sm:$0xf] }
 0x391   :  { %v5180_v61 = vor.u32 %v5650_v51, %v5179_v17  ;;  %v5197_v17 = vld [vmem:[%s8777_s14 + $0x98] sm:$0xf0]  ;;  %v5203_v51 = vld [vmem:[%s8777_s14 + $0xa0] sm:$0xf] }
 0x39b   :  { %2201 = vmatmul.bf16.gmra.mxu0 %v5144_v9  ;;  %v5181_v9 = vld [vmem:[%s8777_s14 + $0x78] sm:$0xf0] }
 0x39c   :  { %v5184_v40 = vor.u32 %v5649_v10, %v5181_v9 }
 0x3a0   :  { %2117 = vmatmul.bf16.gmra.mxu3 %v5148_v55  ;;  %v5187_v55 = vld [vmem:[%s8777_s14 + $0x80] sm:$0xf] }
 0x3a1   :  { %v5188_v18 = vor.u32 %v5652_v60, %v5187_v55 }
 0x3ab   :  { %2206 = vmatmul.bf16.gmra.mxu0 %v5152_v2  ;;  %v5651_v2 = vld [vmem:[%s8777_s14 + $0x84] sm:$0xf] }
 0x3b0   :  { %2122 = vmatmul.bf16.gmra.mxu3 %v5156_v24  ;;  %v5189_v24 = vld [vmem:[%s8777_s14 + $0x88] sm:$0xf0] }
 0x3b1   :  { %v5192_v29 = vor.u32 %v5651_v2, %v5189_v24 }
 0x3bb   :  { %2211 = vmatmul.bf16.gmra.mxu0 %v5160_v4 }
 0x3c0   :  { %2127 = vmatmul.bf16.gmra.mxu3 %v5164_v21  ;;  %v5196_v21 = vor.u32 %v5654_v38, %v5195_v49 }
 0x3cb   :  { %2216 = vmatmul.bf16.gmra.mxu0 %v5168_v48 }
 0x3d0   :  { %2132 = vmatmul.bf16.gmra.mxu3 %v5172_v63 }
 0x3db   :  { %2221 = vmatmul.bf16.gmra.mxu0 %v5176_v54  ;;  %v5200_v54 = vor.u32 %v5653_v58, %v5197_v17 }
 0x3e0   :  { %2137 = vmatmul.bf16.gmra.mxu3 %v5180_v61 }
 0x3eb   :  { %2226 = vmatmul.bf16.gmra.mxu0 %v5184_v40 }
 0x3f0   :  { %2142 = vmatmul.bf16.gmra.mxu3 %v5188_v18 }
 0x3f3   :  { %v2103_v0 = vpop.f32.mrf.mxu3 }
 0x3f8   :  { %v2192_v4 = vpop.f32.mrf.mxu0 }
 0x3f9   :  { %v2193_v57 = vadd.f32 %v2192_v4, %v2103_v0  ;;  %v5211_v4 = vld [vmem:[%s8777_s14 + $0xb0] sm:$0xf] }
 0x3fb   :  { %v2105_v12 = vpop.f32.mrf.mxu3  ;;  %2231 = vmatmul.bf16.gmra.mxu0 %v5192_v29  ;;  %5833 = vrcp.f32 %v2193_v57 }
 0x400   :  { %2147 = vmatmul.bf16.gmra.mxu3 %v5196_v21  ;;  %v2194_v15 = vpop.f32.mrf.mxu0 }
 0x401   :  { %v5834_v50 = vpop.eup %5833  ;;  %v2195_v48 = vadd.f32 %v2194_v15, %v2105_v12  ;;  %v5655_v12 = vld [vmem:[%s8777_s14 + $0xa4] sm:$0xf] }
 0x402   :  { %v2304_v63 = vmul.f32 %v5834_v50, %v7254_v19  ;;  %v5656_v19 = vld [vmem:[%s8777_s14 + $0xa4] sm:$0xf0] }
 0x403   :  { %v2108_v35 = vpop.f32.mrf.mxu3  ;;  %5835 = vrcp.f32 %v2195_v48  ;;  %v5204_v9 = vor.u32 %v5656_v19, %v5203_v51 }
 0x404   :  { %v2336_v30 = vsel %vm1720_vm0, %v2304_v63, 0.0 }
 0x405   :  { %2337 = vadd.xlane.f32.xlu0 %v2336_v30 }
 0x408   :  { %v2197_v10 = vpop.f32.mrf.mxu0 }
 0x409   :  { %v5836_v55 = vpop.eup %5835  ;;  %v2198_v60 = vadd.f32 %v2197_v10, %v2108_v35  ;;  %v5657_v10 = vld [vmem:[%s8777_s14 + $0xb4] sm:$0xf] }
 0x40a   :  { %v2305_v40 = vmul.f32 %v5836_v55, %v7266_v41  ;;  %v5205_v41 = vld [vmem:[%s8777_s14 + $0xa8] sm:$0xf0] }
 0x40b   :  { %v2110_v61 = vpop.f32.mrf.mxu3  ;;  %2236 = vmatmul.bf16.gmra.mxu0 %v5200_v54  ;;  %5837 = vrcp.f32 %v2198_v60  ;;  %v5208_v21 = vor.u32 %v5655_v12, %v5205_v41 }
 0x40c   :  { %v2339_v18 = vsel %vm1720_vm0, %v2305_v40, 0.0 }
 0x40d   :  { %2340 = vadd.xlane.f32.xlu0 %v2339_v18 }
 0x410   :  { %2152 = vmatmul.bf16.gmra.mxu3 %v5204_v9  ;;  %v2199_v2 = vpop.f32.mrf.mxu0  ;;  %v5219_v9 = vld [vmem:[%s8777_s14 + $0xc0] sm:$0xf] }
 0x411   :  { %v5838_v24 = vpop.eup %5837  ;;  %v2200_v49 = vadd.f32 %v2199_v2, %v2110_v61 }
 0x412   :  { %v2306_v38 = vmul.f32 %v5838_v24, %v7238_v8  ;;  %v5658_v8 = vld [vmem:[%s8777_s14 + $0xb4] sm:$0xf0] }
 0x413   :  { %v2113_v0 = vpop.f32.mrf.mxu3  ;;  %5839 = vrcp.f32 %v2200_v49  ;;  %v5212_v15 = vor.u32 %v5658_v8, %v5211_v4 }
 0x414   :  { %v2342_v29 = vsel %vm1720_vm0, %v2306_v38, 0.0 }
 0x415   :  { %2343 = vadd.xlane.f32.xlu1 %v2342_v29 }
 0x418   :  { %v2202_v35 = vpop.f32.mrf.mxu0 }
 0x419   :  { %v5840_v50 = vpop.eup %5839  ;;  %v2203_v48 = vadd.f32 %v2202_v35, %v2113_v0 }
 0x41a   :  { %v2307_v63 = vmul.f32 %v5840_v50, %v7250_v11  ;;  %v5213_v11 = vld [vmem:[%s8777_s14 + $0xb8] sm:$0xf0] }
 0x41b   :  { %v2115_v57 = vpop.f32.mrf.mxu3  ;;  %2241 = vmatmul.bf16.gmra.mxu0 %v5208_v21  ;;  %5841 = vrcp.f32 %v2203_v48  ;;  %v5216_v55 = vor.u32 %v5657_v10, %v5213_v11  ;;  %v5659_v21 = vld [vmem:[%s8777_s14 + $0xc4] sm:$0xf] }
 0x41c   :  { %v2345_v30 = vsel %vm1720_vm0, %v2307_v63, 0.0 }
 0x41d   :  { %2346 = vadd.xlane.f32.xlu1 %v2345_v30 }
 0x420   :  { %2157 = vmatmul.bf16.gmra.mxu3 %v5212_v15  ;;  %v2204_v17 = vpop.f32.mrf.mxu0 }
 0x421   :  { %v5842_v51 = vpop.eup %5841  ;;  %v2205_v19 = vadd.f32 %v2204_v17, %v2115_v57  ;;  %v5227_v57 = vld [vmem:[%s8777_s14 + $0xd0] sm:$0xf] }
 0x422   :  { %v2308_v54 = vmul.f32 %v5842_v51, %v7210_v5  ;;  %v5660_v5 = vld [vmem:[%s8777_s14 + $0xc4] sm:$0xf0] }
 0x423   :  { %v2118_v58 = vpop.f32.mrf.mxu3  ;;  %5843 = vrcp.f32 %v2205_v19  ;;  %v5220_v18 = vor.u32 %v5660_v5, %v5219_v9  ;;  %v5661_v9 = vld [vmem:[%s8777_s14 + $0xd4] sm:$0xf]  ;;  %v5235_v5 = vld [vmem:[%s8777_s14 + $0xe0] sm:$0xf] }
 0x424   :  { %v2348_v61 = vsel %vm1720_vm0, %v2308_v54, 0.0 }
 0x425   :  { %2349 = vadd.xlane.f32.xlu2 %v2348_v61 }
 0x428   :  { %v2207_v40 = vpop.f32.mrf.mxu0 }
 0x429   :  { %v5844_v0 = vpop.eup %5843  ;;  %v2208_v2 = vadd.f32 %v2207_v40, %v2118_v58 }
 0x42a   :  { %v2309_v24 = vmul.f32 %v5844_v0, %v7234_v6  ;;  %v5221_v6 = vld [vmem:[%s8777_s14 + $0xc8] sm:$0xf0]  ;;  %v5335_v0 = vld [vmem:[%s8778_s4 + $0xa8] sm:$0xf] }
 0x42b   :  { %v2120_v60 = vpop.f32.mrf.mxu3  ;;  %2246 = vmatmul.bf16.gmra.mxu0 %v5216_v55  ;;  %5845 = vrcp.f32 %v2208_v2  ;;  %v5224_v35 = vor.u32 %v5659_v21, %v5221_v6  ;;  %v5690_v21 = vld [vmem:[%s8778_s4 + $0xb8] sm:$0xf0] }
 0x42c   :  { %v2351_v49 = vsel %vm1720_vm0, %v2309_v24, 0.0 }
 0x42d   :  { %2352 = vadd.xlane.f32.xlu2 %v2351_v49  ;;  %v5689_v49 = vld [vmem:[%s8778_s4 + $0xb0] sm:$0xf0] }
 0x430   :  { %2162 = vmatmul.bf16.gmra.mxu3 %v5220_v18  ;;  %v2209_v29 = vpop.f32.mrf.mxu0 }
 0x431   :  { %v5846_v12 = vpop.eup %5845  ;;  %v2210_v41 = vadd.f32 %v2209_v29, %v2120_v60  ;;  %v5337_v29 = vld [vmem:[%s8778_s4 + $0xb4] sm:$0xf0] }
 0x432   :  { %v2310_v4 = vmul.f32 %v5846_v12, %v7214_v22  ;;  %v5662_v22 = vld [vmem:[%s8777_s14 + $0xd4] sm:$0xf0] }
 0x433   :  { %v2123_v38 = vpop.f32.mrf.mxu3  ;;  %5847 = vrcp.f32 %v2210_v41  ;;  %v5228_v48 = vor.u32 %v5662_v22, %v5227_v57  ;;  %v5336_v41 = vor.u32 %v5689_v49, %v5335_v0  ;;  %v5323_v57 = vld [vmem:[%s8778_s4 + $0x90] sm:$0xf] }
 0x434   :  { %v2354_v8 = vsel %vm1720_vm0, %v2310_v4, 0.0 }
 0x435   :  { %2355 = vadd.xlane.f32.xlu0 %v2354_v8  ;;  %v5343_v8 = vld [vmem:[%s8778_s4 + $0xb0] sm:$0xf]  ;;  %2648 = vmatpush.bf16.msra.mxu1 %v5336_v41 }
 0x436   :  { %v5344_v6 = vor.u32 %v5690_v21, %v5343_v8  ;;  %v5243_v41 = vld [vmem:[%s8777_s14 + $0xf0] sm:$0xf]  ;;  %v5681_v21 = vld [vmem:[%s8778_s4 + $0x70] sm:$0xf0] }
 0x438   :  { %v2212_v50 = vpop.f32.mrf.mxu0  ;;  %2826 = vmatpush.bf16.msra.mxu3 %v5344_v6 }
 0x439   :  { %v5848_v63 = vpop.eup %5847  ;;  %v2213_v30 = vadd.f32 %v2212_v50, %v2123_v38  ;;  %v5688_v38 = vld [vmem:[%s8778_s4 + $0xac] sm:$0xf]  ;;  %v5325_v50 = vld [vmem:[%s8778_s4 + $0x9c] sm:$0xf0] }
 0x43a   :  { %v2311_v58 = vmul.f32 %v5848_v63, %v7218_v39  ;;  %v5229_v39 = vld [vmem:[%s8777_s14 + $0xd8] sm:$0xf0]  ;;  %v5340_v4 = vor.u32 %v5688_v38, %v5337_v29  ;;  %v5331_v63 = vld [vmem:[%s8778_s4 + $0x98] sm:$0xf]  ;;  %v5301_v29 = vld [vmem:[%s8778_s4 + $0x6c] sm:$0xf0] }
 0x43b   :  { %v2125_v15 = vpop.f32.mrf.mxu3  ;;  %2251 = vmatmul.bf16.gmra.mxu0 %v5224_v35  ;;  %5849 = vrcp.f32 %v2213_v30  ;;  %v5232_v55 = vor.u32 %v5661_v9, %v5229_v39  ;;  %v5687_v30 = vld [vmem:[%s8778_s4 + $0xa0] sm:$0xf0]  ;;  %v5313_v39 = vld [vmem:[%s8778_s4 + $0x84] sm:$0xf0] }
 0x43c   :  { %v2357_v17 = vsel %vm1720_vm0, %v2311_v58, 0.0  ;;  %2737 = vmatpush.bf16.msra.mxu2 %v5340_v4  ;;  %v5332_v58 = vor.u32 %v5687_v30, %v5331_v63  ;;  %v5666_v4 = vld [vmem:[%s8777_s14 + $0xf4] sm:$0xf0] }
 0x43d   :  { %2358 = vadd.xlane.f32.xlu1 %v2357_v17 }
 0x43e   :  { %2827 = vmatpush.bf16.msra.mxu3 %v5332_v58 }
 0x440   :  { %2167 = vmatmul.bf16.gmra.mxu3 %v5228_v48  ;;  %v2214_v19 = vpop.f32.mrf.mxu0 }
 0x441   :  { %v5850_v54 = vpop.eup %5849  ;;  %v2215_v61 = vadd.f32 %v2214_v19, %v2125_v15  ;;  %v5685_v15 = vld [vmem:[%s8778_s4 + $0x94] sm:$0xf]  ;;  %v5311_v19 = vld [vmem:[%s8778_s4 + $0x78] sm:$0xf] }
 0x442   :  { %v2312_v10 = vmul.f32 %v5850_v54, %v7196_v52  ;;  %v5664_v52 = vld [vmem:[%s8777_s14 + $0xe4] sm:$0xf0]  ;;  %v5328_v48 = vor.u32 %v5685_v15, %v5325_v50  ;;  %v5683_v54 = vld [vmem:[%s8778_s4 + $0x80] sm:$0xf0]  ;;  %v5677_v50 = vld [vmem:[%s8778_s4 + $0x50] sm:$0xf0] }
 0x443   :  { %v2128_v51 = vpop.f32.mrf.mxu3  ;;  %5851 = vrcp.f32 %v2215_v61  ;;  %v5236_v18 = vor.u32 %v5664_v52, %v5235_v5  ;;  %v5682_v61 = vld [vmem:[%s8778_s4 + $0x7c] sm:$0xf]  ;;  %v5312_v9 = vor.u32 %v5683_v54, %v5311_v19  ;;  %v5319_v5 = vld [vmem:[%s8778_s4 + $0x80] sm:$0xf]  ;;  %v5684_v52 = vld [vmem:[%s8778_s4 + $0x88] sm:$0xf0] }
 0x444   :  { %v2360_v11 = vsel %vm1720_vm0, %v2312_v10, 0.0  ;;  %2738 = vmatpush.bf16.msra.mxu2 %v5328_v48  ;;  %v5320_v0 = vor.u32 %v5684_v52, %v5319_v5  ;;  %v5287_v15 = vld [vmem:[%s8778_s4 + $0x48] sm:$0xf]  ;;  %v5676_v48 = vld [vmem:[%s8778_s4 + $0x4c] sm:$0xf] }
 0x445   :  { %2361 = vadd.xlane.f32.xlu2 %v2360_v11  ;;  %v5288_v58 = vor.u32 %v5677_v50, %v5287_v15  ;;  %v5295_v19 = vld [vmem:[%s8778_s4 + $0x50] sm:$0xf]  ;;  %v5678_v54 = vld [vmem:[%s8778_s4 + $0x58] sm:$0xf0]  ;;  %v5277_v52 = vld [vmem:[%s8778_s4 + $0x3c] sm:$0xf0] }
 0x446   :  { %2828 = vmatpush.bf16.msra.mxu3 %v5320_v0  ;;  %v5667_v15 = vld [vmem:[%s8778_s4 + $0x4] sm:$0xf] }
 0x448   :  { %v2217_v40 = vpop.f32.mrf.mxu0 }
 0x449   :  { %v5852_v2 = vpop.eup %5851  ;;  %v2218_v24 = vadd.f32 %v2217_v40, %v2128_v51  ;;  %v5237_v40 = vld [vmem:[%s8777_s14 + $0xe8] sm:$0xf0] }
 0x44a   :  { %v2313_v12 = vmul.f32 %v5852_v2, %v7202_v23  ;;  %v5686_v23 = vld [vmem:[%s8778_s4 + $0x98] sm:$0xf0]  ;;  %v5299_v2 = vld [vmem:[%s8778_s4 + $0x60] sm:$0xf] }
 0x44b   :  { %v2130_v60 = vpop.f32.mrf.mxu3  ;;  %2256 = vmatmul.bf16.gmra.mxu0 %v5232_v55  ;;  %5853 = vrcp.f32 %v2218_v24  ;;  %v5324_v35 = vor.u32 %v5686_v23, %v5323_v57  ;;  %v5679_v24 = vld [vmem:[%s8778_s4 + $0x64] sm:$0xf] }
 0x44c   :  { %v2363_v22 = vsel %vm1720_vm0, %v2313_v12, 0.0  ;;  %v5307_v12 = vld [vmem:[%s8778_s4 + $0x68] sm:$0xf]  ;;  %v5304_v8 = vor.u32 %v5679_v24, %v5301_v29  ;;  %v5671_v24 = vld [vmem:[%s8778_s4 + $0x20] sm:$0xf0] }
 0x44d   :  { %2364 = vadd.xlane.f32.xlu0 %v2363_v22  ;;  %2649 = vmatpush.bf16.msra.mxu1 %v5324_v35  ;;  %v5308_v6 = vor.u32 %v5681_v21, %v5307_v12  ;;  %v5244_v35 = vor.u32 %v5666_v4, %v5243_v41  ;;  %v5265_v41 = vld [vmem:[%s8778_s4 + $0x24] sm:$0xf0]  ;;  %v5271_v4 = vld [vmem:[%s8778_s4 + $0x20] sm:$0xf] }
 0x44f   :  { %2829 = vmatpush.bf16.msra.mxu3 %v5308_v6  ;;  %v5665_v6 = vld [vmem:[%s8777_s14 + $0xf4] sm:$0xf] }
 0x450   :  { %2172 = vmatmul.bf16.gmra.mxu3 %v5236_v18  ;;  %v2219_v51 = vpop.f32.mrf.mxu0  ;;  %v5316_v18 = vor.u32 %v5682_v61, %v5313_v39  ;;  %v5673_v39 = vld [vmem:[%s8778_s4 + $0x34] sm:$0xf] }
 0x451   :  { %v5854_v10 = vpop.eup %5853  ;;  %v2220_v11 = vadd.f32 %v2219_v51, %v2130_v60  ;;  %v5663_v60 = vld [vmem:[%s8777_s14 + $0xe4] sm:$0xf]  ;;  %2650 = vmatpush.bf16.msra.mxu1 %v5312_v9  ;;  %v5289_v51 = vld [vmem:[%s8778_s4 + $0x54] sm:$0xf0]  ;;  %v5674_v9 = vld [vmem:[%s8778_s4 + $0x38] sm:$0xf0] }
 0x452   :  { %v2314_v55 = vmul.f32 %v5854_v10, %v7182_v47  ;;  %v5680_v47 = vld [vmem:[%s8778_s4 + $0x68] sm:$0xf0]  ;;  %2739 = vmatpush.bf16.msra.mxu2 %v5316_v18  ;;  %v5240_v57 = vor.u32 %v5663_v60, %v5237_v40  ;;  %v5292_v10 = vor.u32 %v5676_v48, %v5289_v51  ;;  %v5280_v60 = vor.u32 %v5673_v39, %v5277_v52  ;;  %v5675_v40 = vld [vmem:[%s8778_s4 + $0x40] sm:$0xf0]  ;;  %v5669_v51 = vld [vmem:[%s8778_s4 + $0x10] sm:$0xf0] }
 0x453   :  { %v2133_v17 = vpop.f32.mrf.mxu3  ;;  %5855 = vrcp.f32 %v2220_v11  ;;  %v5300_v38 = vor.u32 %v5680_v47, %v5299_v2  ;;  %v5296_v11 = vor.u32 %v5678_v54, %v5295_v19  ;;  %v5263_v47 = vld [vmem:[%s8778_s4 + $0x18] sm:$0xf] }
 0x454   :  { %v2366_v49 = vsel %vm1720_vm0, %v2314_v55, 0.0  ;;  %v5283_v55 = vld [vmem:[%s8778_s4 + $0x38] sm:$0xf]  ;;  %v5264_v12 = vor.u32 %v5671_v24, %v5263_v47 }
 0x455   :  { %2367 = vadd.xlane.f32.xlu1 %v2366_v49  ;;  %2651 = vmatpush.bf16.msra.mxu1 %v5300_v38  ;;  %v5284_v18 = vor.u32 %v5675_v40, %v5283_v55  ;;  %v5670_v49 = vld [vmem:[%s8778_s4 + $0x1c] sm:$0xf] }
 0x456   :  { %2740 = vmatpush.bf16.msra.mxu2 %v5304_v8  ;;  %2830 = vmatpush.bf16.msra.mxu3 %v5296_v11  ;;  %v5672_v8 = vld [vmem:[%s8778_s4 + $0x28] sm:$0xf0] }
 0x458   :  { %v2222_v22 = vpop.f32.mrf.mxu0 }
 0x459   :  { %v5856_v63 = vpop.eup %5855  ;;  %v2223_v30 = vadd.f32 %v2222_v22, %v2133_v17  ;;  %v5275_v17 = vld [vmem:[%s8778_s4 + $0x30] sm:$0xf]  ;;  %2652 = vmatpush.bf16.msra.mxu1 %v5288_v58  ;;  %v5272_v22 = vor.u32 %v5672_v8, %v5271_v4 }
 0x45a   :  { %v2315_v61 = vmul.f32 %v5856_v63, %v7188_v32  ;;  %v5276_v32 = vor.u32 %v5674_v9, %v5275_v17  ;;  %2741 = vmatpush.bf16.msra.mxu2 %v5292_v10  ;;  %2831 = vmatpush.bf16.msra.mxu3 %v5284_v18  ;;  %v5253_v63 = vld [vmem:[%s8778_s4 + $0xc] sm:$0xf0] }
 0x45b   :  { %v2135_v23 = vpop.f32.mrf.mxu3  ;;  %2261 = vmatmul.bf16.gmra.mxu0 %v5240_v57  ;;  %5857 = vrcp.f32 %v2223_v30  ;;  %v5245_v57 = vld [vmem:[%s8777_s14 + $0xf8] sm:$0xf0]  ;;  %v5259_v30 = vld [vmem:[%s8778_s4 + $0x8] sm:$0xf]  ;;  %v5256_v58 = vor.u32 %v5667_v15, %v5253_v63 }
 0x45c   :  { %v2369_v5 = vsel %vm1720_vm0, %v2315_v61, 0.0  ;;  %v5260_v19 = vor.u32 %v5669_v51, %v5259_v30  ;;  %v5248_v54 = vor.u32 %v5665_v6, %v5245_v57 }
 0x45d   :  { %2370 = vadd.xlane.f32.xlu2 %v2369_v5  ;;  %2653 = vmatpush.bf16.msra.mxu1 %v5276_v32 }
 0x45e   :  { %2742 = vmatpush.bf16.msra.mxu2 %v5280_v60  ;;  %2832 = vmatpush.bf16.msra.mxu3 %v5272_v22 }
 0x460   :  { %2177 = vmatmul.bf16.gmra.mxu3 %v5244_v35  ;;  %v2224_v2 = vpop.f32.mrf.mxu0  ;;  %v5251_v35 = vld [vmem:[%s8778_s4] sm:$0xf] }
 0x461   :  { %v5858_v38 = vpop.eup %5857  ;;  %v2225_v29 = vadd.f32 %v2224_v2, %v2135_v23  ;;  %v5268_v23 = vor.u32 %v5670_v49, %v5265_v41  ;;  %2654 = vmatpush.bf16.msra.mxu1 %v5264_v12 }
 0x462   :  { %v2316_v21 = vmul.f32 %v5858_v38, %v7168_v56  ;;  %v5668_v56 = vld [vmem:[%s8778_s4 + $0x8] sm:$0xf0]  ;;  %2833 = vmatpush.bf16.msra.mxu3 %v5260_v19 }
 0x463   :  { %v2138_v0 = vpop.f32.mrf.mxu3  ;;  %5859 = vrcp.f32 %v2225_v29  ;;  %v5252_v48 = vor.u32 %v5668_v56, %v5251_v35  ;;  %2743 = vmatpush.bf16.msra.mxu2 %v5268_v23 }
 0x464   :  { %v2372_v50 = vsel %vm1720_vm0, %v2316_v21, 0.0 }
 0x465   :  { %2373 = vadd.xlane.f32.xlu0 %v2372_v50  ;;  %2655 = vmatpush.bf16.msra.mxu1 %v5252_v48 }
 0x467   :  { %2744 = vmatpush.bf16.msra.mxu2 %v5256_v58 }
 0x468   :  { %v2227_v10 = vpop.f32.mrf.mxu0 }
 0x469   :  { %v5860_v11 = vpop.eup %5859  ;;  %v2228_v17 = vadd.f32 %v2227_v10, %v2138_v0 }
 0x46a   :  { %v2317_v9 = vmul.f32 %v5860_v11, %v7174_v34 }
 0x46b   :  { %v2140_v61 = vpop.f32.mrf.mxu3  ;;  %2266 = vmatmul.bf16.gmra.mxu0 %v5248_v54  ;;  %5861 = vrcp.f32 %v2228_v17 }
 0x46c   :  { %v2375_v39 = vsel %vm1720_vm0, %v2317_v9, 0.0 }
 0x46d   :  { %2376 = vadd.xlane.f32.xlu1 %v2375_v39 }
 0x470   :  { %v2229_v32 = vpop.f32.mrf.mxu0 }
 0x471   :  { %v5862_v52 = vpop.eup %5861  ;;  %v2230_v55 = vadd.f32 %v2229_v32, %v2140_v61 }
 0x472   :  { %v2318_v60 = vmul.f32 %v5862_v52, %v7160_v45  ;;  %v8851_v52 = vld [vmem:[#allocation2_spill] sm:$0xff] }
 0x473   :  { %v2143_v5 = vpop.f32.mrf.mxu3  ;;  %5863 = vrcp.f32 %v2230_v55 }
 0x474   :  { %v2378_v40 = vsel %vm1720_vm0, %v2318_v60, 0.0 }
 0x475   :  { %2379 = vadd.xlane.f32.xlu2 %v2378_v40 }
 0x478   :  { %v2232_v0 = vpop.f32.mrf.mxu0  ;;  %v2338_v2 = vpop.xlane.xlu0 %2337 }
 0x479   :  { %v5864_v34 = vpop.eup %5863  ;;  %v2233_v47 = vadd.f32 %v2232_v0, %v2143_v5  ;;  %v2432_v45 = vmul.f32 %v2338_v2, %v6778_v42 }
 0x47a   :  { %v2319_v24 = vmul.f32 %v5864_v34, %v7164_v3 }
 0x47b   :  { %v2145_v18 = vpop.f32.mrf.mxu3  ;;  %5865 = vrcp.f32 %v2233_v47 }
 0x47c   :  { %v2381_v49 = vsel %vm1720_vm0, %v2319_v24, 0.0 }
 0x47d   :  { %2382 = vadd.xlane.f32.xlu0 %v2381_v49 }
 0x480   :  { %v2234_v29 = vpop.f32.mrf.mxu0  ;;  %v2341_v12 = vpop.xlane.xlu0 %2340 }
 0x481   :  { %v5866_v41 = vpop.eup %5865  ;;  %v2433_v4 = vmul.f32 %v2341_v12, %v6780_v44  ;;  %v2235_v8 = vadd.f32 %v2234_v29, %v2145_v18 }
 0x482   :  { %v2320_v21 = vmul.f32 %v5866_v41, %v7298_v28  ;;  %v8852_v41 = vld [vmem:[#allocation3_spill] sm:$0xff] }
 0x483   :  { %v2148_v38 = vpop.f32.mrf.mxu3  ;;  %v2464_v6 = vpack.c.bf16 %v2433_v4, %v2432_v45  ;;  %5867 = vrcp.f32 %v2235_v8  ;;  %v8853_v4 = vld [vmem:[#allocation4_spill] sm:$0xff] }
 0x484   :  { %v2384_v57 = vsel %vm1720_vm0, %v2320_v21, 0.0 }
 0x485   :  { %2656 = vmatmul.bf16.vlgmr.msra.gmra.mxu1 %v2464_v6  ;;  %2745 = vmatmul.bf16.vlgmr.msra.gmra.mxu2 %v2464_v6 }
 0x486   :  { %2834 = vmatmul.bf16.vlgmr.msra.gmra.mxu3 %v2464_v6  ;;  %2385 = vadd.xlane.f32.xlu1 %v2384_v57 }
 0x488   :  { %v2237_v23 = vpop.f32.mrf.mxu0  ;;  %v2344_v22 = vpop.xlane.xlu1 %2343 }
 0x489   :  { %v5868_v35 = vpop.eup %5867  ;;  %v2238_v56 = vadd.f32 %v2237_v23, %v2148_v38  ;;  %v2434_v63 = vmul.f32 %v2344_v22, %v6800_v25 }
 0x48a   :  { %v2321_v42 = vmul.f32 %v5868_v35, %v7302_v53 }
 0x48b   :  { %v2150_v3 = vpop.f32.mrf.mxu3  ;;  %5869 = vrcp.f32 %v2238_v56 }
 0x48c   :  { %v2387_v44 = vsel %vm1720_vm0, %v2321_v42, 0.0 }
 0x48d   :  { %2388 = vadd.xlane.f32.xlu2 %v2387_v44 }
 0x490   :  { %v2239_v15 = vpop.f32.mrf.mxu0  ;;  %v2347_v50 = vpop.xlane.xlu1 %2346 }
 0x491   :  { %v5870_v48 = vpop.eup %5869  ;;  %v2435_v30 = vmul.f32 %v2347_v50, %v6802_v26  ;;  %v2240_v58 = vadd.f32 %v2239_v15, %v2150_v3 }
 0x492   :  { %v2322_v51 = vmul.f32 %v5870_v48, %v7292_v13  ;;  %v8854_v48 = vld [vmem:[#allocation5_spill] sm:$0xff] }
 0x493   :  { %v2153_v28 = vpop.f32.mrf.mxu3  ;;  %v2465_v19 = vpack.c.bf16 %v2435_v30, %v2434_v63  ;;  %5871 = vrcp.f32 %v2240_v58  ;;  %v8855_v30 = vld [vmem:[#allocation6_spill] sm:$0xff] }
 0x494   :  { %v2390_v54 = vsel %vm1720_vm0, %v2322_v51, 0.0 }
 0x495   :  { %2661 = vmatmul.bf16.gmra.mxu1 %v2465_v19  ;;  %2750 = vmatmul.bf16.gmra.mxu2 %v2465_v19 }
 0x496   :  { %2839 = vmatmul.bf16.gmra.mxu3 %v2465_v19  ;;  %2391 = vadd.xlane.f32.xlu0 %v2390_v54 }
 0x498   :  { %v2242_v61 = vpop.f32.mrf.mxu0  ;;  %v2350_v10 = vpop.xlane.xlu2 %2349 }
 0x499   :  { %v5872_v11 = vpop.eup %5871  ;;  %v2243_v17 = vadd.f32 %v2242_v61, %v2153_v28  ;;  %v2436_v32 = vmul.f32 %v2350_v10, %v6822_v14 }
 0x49a   :  { %v2323_v25 = vmul.f32 %v5872_v11, %v7296_v20 }
 0x49b   :  { %v2155_v53 = vpop.f32.mrf.mxu3  ;;  %5873 = vrcp.f32 %v2243_v17 }
 0x49c   :  { %v2393_v26 = vsel %vm1720_vm0, %v2323_v25, 0.0 }
 0x49d   :  { %2394 = vadd.xlane.f32.xlu1 %v2393_v26 }
 0x4a0   :  { %v2244_v9 = vpop.f32.mrf.mxu0  ;;  %v2353_v39 = vpop.xlane.xlu2 %2352 }
 0x4a1   :  { %v5874_v5 = vpop.eup %5873  ;;  %v2437_v55 = vmul.f32 %v2353_v39, %v8851_v52  ;;  %v2245_v60 = vadd.f32 %v2244_v9, %v2155_v53  ;;  %v8857_v52 = vld [vmem:[#allocation8_spill] sm:$0xff] }
 0x4a2   :  { %v2324_v40 = vmul.f32 %v5874_v5, %v7286_v31  ;;  %v8856_v5 = vld [vmem:[#allocation7_spill] sm:$0xff] }
 0x4a3   :  { %v2158_v13 = vpop.f32.mrf.mxu3  ;;  %v2466_v18 = vpack.c.bf16 %v2437_v55, %v2436_v32  ;;  %5875 = vrcp.f32 %v2245_v60 }
 0x4a4   :  { %v2396_v0 = vsel %vm1720_vm0, %v2324_v40, 0.0 }
 0x4a5   :  { %2666 = vmatmul.bf16.gmra.mxu1 %v2466_v18  ;;  %2755 = vmatmul.bf16.gmra.mxu2 %v2466_v18 }
 0x4a6   :  { %2844 = vmatmul.bf16.gmra.mxu3 %v2466_v18  ;;  %2397 = vadd.xlane.f32.xlu2 %v2396_v0 }
 0x4a8   :  { %v2247_v2 = vpop.f32.mrf.mxu0  ;;  %v2356_v49 = vpop.xlane.xlu0 %2355 }
 0x4a9   :  { %v5876_v34 = vpop.eup %5875  ;;  %v2248_v47 = vadd.f32 %v2247_v2, %v2158_v13  ;;  %v2438_v45 = vmul.f32 %v2356_v49, %v8852_v41 }
 0x4aa   :  { %v2325_v24 = vmul.f32 %v5876_v34, %v7290_v7 }
 0x4ab   :  { %v2160_v20 = vpop.f32.mrf.mxu3  ;;  %5877 = vrcp.f32 %v2248_v47 }
 0x4ac   :  { %v2399_v14 = vsel %vm1720_vm0, %v2325_v24, 0.0 }
 0x4ad   :  { %2400 = vadd.xlane.f32.xlu0 %v2399_v14  ;;  %v5696_v14 = vld [vmem:[%s8779_s6 + $0x28] sm:$0xff] }
 0x4b0   :  { %v2249_v38 = vpop.f32.mrf.mxu0  ;;  %v2359_v29 = vpop.xlane.xlu1 %2358 }
 0x4b1   :  { %v5878_v12 = vpop.eup %5877  ;;  %v2439_v8 = vmul.f32 %v2359_v29, %v8853_v4  ;;  %v2250_v21 = vadd.f32 %v2249_v38, %v2160_v20  ;;  %v5697_v20 = vld [vmem:[%s8779_s6 + $0x30] sm:$0xff]  ;;  %v5695_v38 = vld [vmem:[%s8779_s6 + $0x20] sm:$0xff] }
 0x4b2   :  { %v2326_v6 = vmul.f32 %v5878_v12, %v7278_v36  ;;  %v8859_v4 = vld [vmem:[#allocation10_spill] sm:$0xff] }
 0x4b3   :  { %v2163_v31 = vpop.f32.mrf.mxu3  ;;  %v2467_v57 = vpack.c.bf16 %v2439_v8, %v2438_v45  ;;  %5879 = vrcp.f32 %v2250_v21 }
 0x4b4   :  { %v2402_v7 = vsel %vm1720_vm0, %v2326_v6, 0.0 }
 0x4b5   :  { %2671 = vmatmul.bf16.gmra.mxu1 %v2467_v57  ;;  %2760 = vmatmul.bf16.gmra.mxu2 %v2467_v57 }
 0x4b6   :  { %2849 = vmatmul.bf16.gmra.mxu3 %v2467_v57  ;;  %2403 = vadd.xlane.f32.xlu1 %v2402_v7 }
 0x4b8   :  { %v2252_v23 = vpop.f32.mrf.mxu0  ;;  %v2362_v44 = vpop.xlane.xlu2 %2361 }
 0x4b9   :  { %v5880_v22 = vpop.eup %5879  ;;  %v2253_v35 = vadd.f32 %v2252_v23, %v2163_v31  ;;  %v2440_v63 = vmul.f32 %v2362_v44, %v8854_v48  ;;  %v5694_v23 = vld [vmem:[%s8779_s6 + $0x18] sm:$0xff] }
 0x4ba   :  { %v2327_v56 = vmul.f32 %v5880_v22, %v7282_v62  ;;  %v5693_v22 = vld [vmem:[%s8779_s6 + $0x10] sm:$0xff] }
 0x4bb   :  { %v2165_v3 = vpop.f32.mrf.mxu3  ;;  %5881 = vrcp.f32 %v2253_v35 }
 0x4bc   :  { %v2405_v42 = vsel %vm1720_vm0, %v2327_v56, 0.0 }
 0x4bd   :  { %2406 = vadd.xlane.f32.xlu2 %v2405_v42 }
 0x4c0   :  { %v2254_v28 = vpop.f32.mrf.mxu0  ;;  %v2365_v15 = vpop.xlane.xlu0 %2364 }
 0x4c1   :  { %v5882_v50 = vpop.eup %5881  ;;  %v2441_v58 = vmul.f32 %v2365_v15, %v8855_v30  ;;  %v2255_v51 = vadd.f32 %v2254_v28, %v2165_v3  ;;  %v5692_v15 = vld [vmem:[%s8779_s6 + $0x8] sm:$0xff] }
 0x4c2   :  { %v2328_v19 = vmul.f32 %v5882_v50, %v7258_v37 }
 0x4c3   :  { %v2168_v36 = vpop.f32.mrf.mxu3  ;;  %v2468_v54 = vpack.c.bf16 %v2441_v58, %v2440_v63  ;;  %5883 = vrcp.f32 %v2255_v51  ;;  %v5691_v63 = vld [vmem:[%s8779_s6] sm:$0xff]  ;;  %v8861_v51 = vld [vmem:[#allocation12_spill] sm:$0xff] }
 0x4c4   :  { %v2408_v62 = vsel %vm1720_vm0, %v2328_v19, 0.0 }
 0x4c5   :  { %2676 = vmatmul.bf16.gmra.mxu1 %v2468_v54  ;;  %2765 = vmatmul.bf16.gmra.mxu2 %v2468_v54 }
 0x4c6   :  { %2854 = vmatmul.bf16.gmra.mxu3 %v2468_v54  ;;  %2409 = vadd.xlane.f32.xlu0 %v2408_v62 }
 0x4c8   :  { %v2257_v61 = vpop.f32.mrf.mxu0  ;;  %v2368_v26 = vpop.xlane.xlu1 %2367 }
 0x4c9   :  { %v5884_v10 = vpop.eup %5883  ;;  %v2258_v11 = vadd.f32 %v2257_v61, %v2168_v36  ;;  %v2442_v32 = vmul.f32 %v2368_v26, %v8856_v5 }
 0x4ca   :  { %v2329_v17 = vmul.f32 %v5884_v10, %v7262_v16  ;;  %v5698_v16 = vld [vmem:[%s8779_s6 + $0x38] sm:$0xff] }
 0x4cb   :  { %v2170_v53 = vpop.f32.mrf.mxu3  ;;  %5885 = vrcp.f32 %v2258_v11  ;;  %3255 = vmatpush.bf16.msrb.mxu0 %v5698_v16 }
 0x4cc   :  { %v2411_v25 = vsel %vm1720_vm0, %v2329_v17, 0.0 }
 0x4cd   :  { %2412 = vadd.xlane.f32.xlu1 %v2411_v25 }
 0x4cf   :  { %3256 = vmatpush.bf16.msrb.mxu0 %v5697_v20 }
 0x4d0   :  { %v2259_v13 = vpop.f32.mrf.mxu0  ;;  %v2371_v9 = vpop.xlane.xlu2 %2370 }
 0x4d1   :  { %v5886_v39 = vpop.eup %5885  ;;  %v2443_v55 = vmul.f32 %v2371_v9, %v8857_v52  ;;  %v2260_v60 = vadd.f32 %v2259_v13, %v2170_v53 }
 0x4d2   :  { %v2330_v40 = vmul.f32 %v5886_v39, %v7242_v43  ;;  %v7745_v39 = vld [vmem:[%s8780_s5] sm:$0x7] }
 0x4d3   :  { %v2173_v37 = vpop.f32.mrf.mxu3  ;;  %v2469_v18 = vpack.c.bf16 %v2443_v55, %v2442_v32  ;;  %5887 = vrcp.f32 %v2260_v60  ;;  %3257 = vmatpush.bf16.msrb.mxu0 %v5696_v14  ;;  %v7748_v52 = vperm.slane %v7745_v39, 0 }
 0x4d4   :  { %v2414_v0 = vsel %vm1720_vm0, %v2330_v40, 0.0  ;;  %v7752_v40 = vperm.slane %v7745_v39, 1 }
 0x4d5   :  { %2681 = vmatmul.bf16.gmra.mxu1 %v2469_v18  ;;  %2770 = vmatmul.bf16.gmra.mxu2 %v2469_v18 }
 0x4d6   :  { %2859 = vmatmul.bf16.gmra.mxu3 %v2469_v18  ;;  %2415 = vadd.xlane.f32.xlu2 %v2414_v0 }
 0x4d7   :  { %3258 = vmatpush.bf16.msrb.mxu0 %v5695_v38 }
 0x4d8   :  { %v2262_v2 = vpop.f32.mrf.mxu0  ;;  %v2374_v31 = vpop.xlane.xlu0 %2373 }
 0x4d9   :  { %v5888_v34 = vpop.eup %5887  ;;  %v2263_v43 = vadd.f32 %v2262_v2, %v2173_v37  ;;  %v8862_v37 = vld [vmem:[#allocation13_spill] sm:$0xff] }
 0x4da   :  { %v2331_v47 = vmul.f32 %v5888_v34, %v7246_v27  ;;  %v8858_v27 = vld [vmem:[#allocation9_spill] sm:$0xff] }
 0x4db   :  { %v2175_v24 = vpop.f32.mrf.mxu3  ;;  %5889 = vrcp.f32 %v2263_v43  ;;  %v2444_v45 = vmul.f32 %v2374_v31, %v8858_v27  ;;  %3259 = vmatpush.bf16.msrb.mxu0 %v5694_v23  ;;  %v8865_v31 = vld [vmem:[#allocation16_spill] sm:$0xff] }
 0x4dc   :  { %v2417_v49 = vsel %vm1720_vm0, %v2331_v47, 0.0 }
 0x4dd   :  { %2418 = vadd.xlane.f32.xlu0 %v2417_v49 }
 0x4df   :  { %3260 = vmatpush.bf16.msrb.mxu0 %v5693_v22 }
 0x4e0   :  { %v2264_v29 = vpop.f32.mrf.mxu0  ;;  %v2377_v12 = vpop.xlane.xlu1 %2376 }
 0x4e1   :  { %v5890_v41 = vpop.eup %5889  ;;  %v2445_v8 = vmul.f32 %v2377_v12, %v8859_v4  ;;  %v2265_v21 = vadd.f32 %v2264_v29, %v2175_v24  ;;  %v8864_v24 = vld [vmem:[#allocation15_spill] sm:$0xff] }
 0x4e2   :  { %v2332_v6 = vmul.f32 %v5890_v41, %v7226_v59 }
 0x4e3   :  { %v2470_v57 = vpack.c.bf16 %v2445_v8, %v2444_v45  ;;  %5891 = vrcp.f32 %v2265_v21  ;;  %v2178_v3 = vpop.f32.mrf.mxu3  ;;  %3261 = vmatpush.bf16.msrb.mxu0 %v5692_v15 }
 0x4e4   :  { %v2420_v7 = vsel %vm1720_vm0, %v2332_v6, 0.0 }
 0x4e5   :  { %2686 = vmatmul.bf16.gmra.mxu1 %v2470_v57  ;;  %2775 = vmatmul.bf16.gmra.mxu2 %v2470_v57 }
 0x4e6   :  { %2864 = vmatmul.bf16.gmra.mxu3 %v2470_v57  ;;  %2421 = vadd.xlane.f32.xlu1 %v2420_v7 }
 0x4e7   :  { %3262 = vmatpush.bf16.msrb.mxu0 %v5691_v63 }
 0x4e8   :  { %v2267_v59 = vpop.f32.mrf.mxu0  ;;  %v2380_v36 = vpop.xlane.xlu2 %2379 }
 0x4e9   :  { %v5892_v35 = vpop.eup %5891  ;;  %v2268_v56 = vadd.f32 %v2267_v59, %v2178_v3 }
 0x4ea   :  { %v2333_v42 = vmul.f32 %v5892_v35, %v7230_v46  ;;  %v8860_v46 = vld [vmem:[#allocation11_spill] sm:$0xff] }
 0x4eb   :  { %5893 = vrcp.f32 %v2268_v56  ;;  %v2180_v28 = vpop.f32.mrf.mxu3  ;;  %v2446_v58 = vmul.f32 %v2380_v36, %v8860_v46  ;;  %v8866_v56 = vld [vmem:[#allocation17_spill] sm:$0xff]  ;;  %v8867_v36 = vld [vmem:[#allocation18_spill] sm:$0xff] }
 0x4ec   :  { %v2423_v44 = vsel %vm1720_vm0, %v2333_v42, 0.0 }
 0x4ed   :  { %2424 = vadd.xlane.f32.xlu2 %v2423_v44 }
 0x4f0   :  { %v2269_v50 = vpop.f32.mrf.mxu0  ;;  %v2383_v48 = vpop.xlane.xlu0 %2382 }
 0x4f1   :  { %v5894_v30 = vpop.eup %5893  ;;  %v2447_v19 = vmul.f32 %v2383_v48, %v8861_v51  ;;  %v2270_v54 = vadd.f32 %v2269_v50, %v2180_v28 }
 0x4f2   :  { %v2334_v62 = vmul.f32 %v5894_v30, %v7222_v1  ;;  %v8863_v1 = vld [vmem:[#allocation14_spill] sm:$0xff] }
 0x4f3   :  { %v2471_v53 = vpack.c.bf16 %v2447_v19, %v2446_v58  ;;  %5895 = vrcp.f32 %v2270_v54 }
 0x4f4   :  { %v2426_v61 = vsel %vm1720_vm0, %v2334_v62, 0.0 }
 0x4f5   :  { %2691 = vmatmul.bf16.gmra.mxu1 %v2471_v53  ;;  %2780 = vmatmul.bf16.gmra.mxu2 %v2471_v53 }
 0x4f6   :  { %2869 = vmatmul.bf16.gmra.mxu3 %v2471_v53  ;;  %2427 = vadd.xlane.f32.xlu0 %v2426_v61 }
 0x4f9   :  { %v5896_v10 = vpop.eup %5895  ;;  %v2386_v25 = vpop.xlane.xlu1 %2385 }
 0x4fa   :  { %v2335_v11 = vmul.f32 %v5896_v10, %v7206_v33  ;;  %v2448_v13 = vmul.f32 %v2386_v25, %v8862_v37 }
 0x4fc   :  { %v2429_v17 = vsel %vm1720_vm0, %v2335_v11, 0.0 }
 0x4fd   :  { %2430 = vadd.xlane.f32.xlu1 %v2429_v17 }
 0x500   :  { %v2389_v26 = vpop.xlane.xlu2 %2388 }
 0x501   :  { %v2449_v9 = vmul.f32 %v2389_v26, %v8863_v1  ;;  %v8868_v26 = vld [vmem:[#allocation19_spill] sm:$0xff]  ;;  %v8869_v1 = vld [vmem:[#allocation20_spill] sm:$0xff] }
 0x502   :  { %v2657_v5 = vpop.f32.mrf.mxu1 }
 0x503   :  { %v2472_v32 = vpack.c.bf16 %v2449_v9, %v2448_v13  ;;  %v2658_v55 = vadd.f32 %v2657_v5, %v7748_v52 }
 0x505   :  { %2696 = vmatmul.bf16.gmra.mxu1 %v2472_v32  ;;  %2785 = vmatmul.bf16.gmra.mxu2 %v2472_v32  ;;  %v2915_v16 = vmax.f32 %v2658_v55, 0.0 }
 0x506   :  { %2874 = vmatmul.bf16.gmra.mxu3 %v2472_v32 }
 0x508   :  { %v2746_v33 = vpop.f32.mrf.mxu2 }
 0x509   :  { %v2392_v20 = vpop.xlane.xlu0 %2391  ;;  %v2747_v2 = vadd.f32 %v2746_v33, %v7752_v40  ;;  %v7771_v61 = vpop.f32.mrf.mxu3 }
 0x50a   :  { %v2659_v60 = vpop.f32.mrf.mxu1  ;;  %v2450_v14 = vmul.f32 %v2392_v20, %v8864_v24 }
 0x50b   :  { %v2660_v18 = vadd.f32 %v2659_v60, %v7748_v52  ;;  %v2916_v12 = vmax.f32 %v2747_v2, 0.0 }
 0x50d   :  { %v2918_v0 = vmax.f32 %v2660_v18, 0.0 }
 0x50f   :  { %v3011_v34 = vpack.c.bf16 %v2918_v0, %v2915_v16 }
 0x510   :  { %v2748_v43 = vpop.f32.mrf.mxu2  ;;  %v2395_v47 = vpop.xlane.xlu1 %2394 }
 0x511   :  { %v2749_v49 = vadd.f32 %v2748_v43, %v7752_v40  ;;  %v2451_v38 = vmul.f32 %v2395_v47, %v8865_v31  ;;  %3263 = vmatmul.bf16.vlgmr.msrb.gmra.mxu0 %v3011_v34  ;;  %v7780_v0 = vpop.f32.mrf.mxu3 }
 0x512   :  { %v2662_v29 = vpop.f32.mrf.mxu1 }
 0x513   :  { %v2919_v41 = vmax.f32 %v2749_v49, 0.0  ;;  %v2473_v27 = vpack.c.bf16 %v2451_v38, %v2450_v14  ;;  %v2663_v8 = vadd.f32 %v2662_v29, %v7748_v52  ;;  %v8870_v38 = vld [vmem:[#allocation21_spill] sm:$0xff] }
 0x515   :  { %v7759_v45 = vpack.c.bf16 %v2919_v41, %v2916_v12  ;;  %2701 = vmatmul.bf16.gmra.mxu1 %v2473_v27  ;;  %2790 = vmatmul.bf16.gmra.mxu2 %v2473_v27  ;;  %v2921_v57 = vmax.f32 %v2663_v8, 0.0  ;;  %v8871_v41 = vld [vmem:[#allocation22_spill] sm:$0xff] }
 0x516   :  { %2879 = vmatmul.bf16.gmra.mxu3 %v2473_v27 }
 0x518   :  { %v2751_v4 = vpop.f32.mrf.mxu2 }
 0x519   :  { %v2398_v3 = vpop.xlane.xlu2 %2397  ;;  %v2752_v23 = vadd.f32 %v2751_v4, %v7752_v40 }
 0x51a   :  { %v2664_v21 = vpop.f32.mrf.mxu1  ;;  %v2452_v42 = vmul.f32 %v2398_v3, %v8866_v56  ;;  %v5706_v3 = vld [vmem:[%s8779_s6 + $0x78] sm:$0xff] }
 0x51b   :  { %v2665_v6 = vadd.f32 %v2664_v21, %v7748_v52  ;;  %v2922_v50 = vmax.f32 %v2752_v23, 0.0  ;;  %v5714_v23 = vld [vmem:[%s8779_s6 + $0xb8] sm:$0xff]  ;;  %3344 = vmatpush.bf16.msrb.mxu1 %v5706_v3 }
 0x51c   :  { %3433 = vmatpush.bf16.msrb.mxu2 %v5714_v23 }
 0x51d   :  { %v2924_v7 = vmax.f32 %v2665_v6, 0.0 }
 0x51f   :  { %v3014_v22 = vpack.c.bf16 %v2924_v7, %v2921_v57  ;;  %v7787_v57 = vpop.f32.mrf.mxu3 }
 0x520   :  { %v2753_v59 = vpop.f32.mrf.mxu2  ;;  %v2401_v35 = vpop.xlane.xlu0 %2400 }
 0x521   :  { %v2754_v44 = vadd.f32 %v2753_v59, %v7752_v40  ;;  %v2453_v28 = vmul.f32 %v2401_v35, %v8867_v36  ;;  %3268 = vmatmul.bf16.gmra.mxu0 %v3014_v22  ;;  %v5705_v36 = vld [vmem:[%s8779_s6 + $0x70] sm:$0xff] }
 0x522   :  { %v2667_v15 = vpop.f32.mrf.mxu1  ;;  %3345 = vmatpush.bf16.msrb.mxu1 %v5705_v36 }
 0x523   :  { %v2925_v48 = vmax.f32 %v2754_v44, 0.0  ;;  %v2474_v63 = vpack.c.bf16 %v2453_v28, %v2452_v42  ;;  %v2668_v58 = vadd.f32 %v2667_v15, %v7748_v52  ;;  %v5713_v28 = vld [vmem:[%s8779_s6 + $0xb0] sm:$0xff] }
 0x524   :  { %3434 = vmatpush.bf16.msrb.mxu2 %v5713_v28 }
 0x525   :  { %2706 = vmatmul.bf16.gmra.mxu1 %v2474_v63  ;;  %2795 = vmatmul.bf16.gmra.mxu2 %v2474_v63  ;;  %v7767_v30 = vpack.c.bf16 %v2925_v48, %v2922_v50  ;;  %v2927_v54 = vmax.f32 %v2668_v58, 0.0  ;;  %v5712_v58 = vld [vmem:[%s8779_s6 + $0xa8] sm:$0xff] }
 0x526   :  { %2884 = vmatmul.bf16.gmra.mxu3 %v2474_v63 }
 0x527   :  { %v7805_v15 = vpop.f32.mrf.mxu3 }
 0x528   :  { %v2756_v46 = vpop.f32.mrf.mxu2  ;;  %3435 = vmatpush.bf16.msrb.mxu2 %v5712_v58 }
 0x529   :  { %v2404_v53 = vpop.xlane.xlu1 %2403  ;;  %v2757_v10 = vadd.f32 %v2756_v46, %v7752_v40  ;;  %v5704_v46 = vld [vmem:[%s8779_s6 + $0x68] sm:$0xff] }
 0x52a   :  { %v2669_v51 = vpop.f32.mrf.mxu1  ;;  %v2454_v37 = vmul.f32 %v2404_v53, %v8868_v26  ;;  %3346 = vmatpush.bf16.msrb.mxu1 %v5704_v46 }
 0x52b   :  { %v2670_v19 = vadd.f32 %v2669_v51, %v7748_v52  ;;  %v2928_v32 = vmax.f32 %v2757_v10, 0.0  ;;  %v8873_v10 = vld [vmem:[#allocation24_spill] sm:$0xff] }
 0x52d   :  { %v2930_v62 = vmax.f32 %v2670_v19, 0.0 }
 0x52f   :  { %v3017_v11 = vpack.c.bf16 %v2930_v62, %v2927_v54  ;;  %v8872_v54 = vld [vmem:[#allocation23_spill] sm:$0xff] }
 0x530   :  { %v2758_v17 = vpop.f32.mrf.mxu2  ;;  %v2407_v25 = vpop.xlane.xlu2 %2406 }
 0x531   :  { %v2759_v13 = vadd.f32 %v2758_v17, %v7752_v40  ;;  %v2455_v9 = vmul.f32 %v2407_v25, %v8869_v1  ;;  %3273 = vmatmul.bf16.gmra.mxu0 %v3017_v11  ;;  %v5711_v1 = vld [vmem:[%s8779_s6 + $0xa0] sm:$0xff] }
 0x532   :  { %v2672_v5 = vpop.f32.mrf.mxu1  ;;  %3436 = vmatpush.bf16.msrb.mxu2 %v5711_v1 }
 0x533   :  { %v2931_v33 = vmax.f32 %v2759_v13, 0.0  ;;  %v2475_v55 = vpack.c.bf16 %v2455_v9, %v2454_v37  ;;  %v2673_v16 = vadd.f32 %v2672_v5, %v7748_v52  ;;  %v5703_v13 = vld [vmem:[%s8779_s6 + $0x60] sm:$0xff]  ;;  %v5702_v5 = vld [vmem:[%s8779_s6 + $0x58] sm:$0xff] }
 0x534   :  { %3347 = vmatpush.bf16.msrb.mxu1 %v5703_v13 }
 0x535   :  { %2711 = vmatmul.bf16.gmra.mxu1 %v2475_v55  ;;  %2800 = vmatmul.bf16.gmra.mxu2 %v2475_v55  ;;  %v7777_v60 = vpack.c.bf16 %v2931_v33, %v2928_v32  ;;  %v2933_v34 = vmax.f32 %v2673_v16, 0.0  ;;  %v5710_v32 = vld [vmem:[%s8779_s6 + $0x98] sm:$0xff]  ;;  %v7831_v33 = vpop.f32.mrf.mxu3 }
 0x536   :  { %2889 = vmatmul.bf16.gmra.mxu3 %v2475_v55  ;;  %3437 = vmatpush.bf16.msrb.mxu2 %v5710_v32 }
 0x538   :  { %v2761_v18 = vpop.f32.mrf.mxu2  ;;  %3348 = vmatpush.bf16.msrb.mxu1 %v5702_v5 }
 0x539   :  { %v2410_v47 = vpop.xlane.xlu0 %2409  ;;  %v2762_v24 = vadd.f32 %v2761_v18, %v7752_v40 }
 0x53a   :  { %v2674_v20 = vpop.f32.mrf.mxu1  ;;  %v2456_v29 = vmul.f32 %v2410_v47, %v8870_v38  ;;  %v5709_v47 = vld [vmem:[%s8779_s6 + $0x90] sm:$0xff]  ;;  %v5708_v38 = vld [vmem:[%s8779_s6 + $0x88] sm:$0xff] }
 0x53b   :  { %v2675_v2 = vadd.f32 %v2674_v20, %v7748_v52  ;;  %v2934_v8 = vmax.f32 %v2762_v24, 0.0  ;;  %3438 = vmatpush.bf16.msrb.mxu2 %v5709_v47 }
 0x53d   :  { %v2936_v43 = vmax.f32 %v2675_v2, 0.0 }
 0x53f   :  { %v3020_v14 = vpack.c.bf16 %v2936_v43, %v2933_v34  ;;  %v5701_v43 = vld [vmem:[%s8779_s6 + $0x50] sm:$0xff]  ;;  %3439 = vmatpush.bf16.msrb.mxu2 %v5708_v38 }
 0x540   :  { %v2763_v49 = vpop.f32.mrf.mxu2  ;;  %v2413_v31 = vpop.xlane.xlu1 %2412  ;;  %3349 = vmatpush.bf16.msrb.mxu1 %v5701_v43 }
 0x541   :  { %v2764_v12 = vadd.f32 %v2763_v49, %v7752_v40  ;;  %v2457_v27 = vmul.f32 %v2413_v31, %v8871_v41  ;;  %3278 = vmatmul.bf16.gmra.mxu0 %v3020_v14  ;;  %v5700_v31 = vld [vmem:[%s8779_s6 + $0x48] sm:$0xff]  ;;  %v8874_v41 = vld [vmem:[#allocation25_spill] sm:$0xff] }
 0x542   :  { %v2677_v4 = vpop.f32.mrf.mxu1 }
 0x543   :  { %v2937_v21 = vmax.f32 %v2764_v12, 0.0  ;;  %v2476_v6 = vpack.c.bf16 %v2457_v27, %v2456_v29  ;;  %v2678_v59 = vadd.f32 %v2677_v4, %v7748_v52 }
 0x544   :  { %3350 = vmatpush.bf16.msrb.mxu1 %v5700_v31 }
 0x545   :  { %2716 = vmatmul.bf16.gmra.mxu1 %v2476_v6  ;;  %2805 = vmatmul.bf16.gmra.mxu2 %v2476_v6  ;;  %v7789_v7 = vpack.c.bf16 %v2937_v21, %v2934_v8  ;;  %v2939_v42 = vmax.f32 %v2678_v59, 0.0  ;;  %v8875_v8 = vld [vmem:[#allocation26_spill] sm:$0xff] }
 0x546   :  { %2894 = vmatmul.bf16.gmra.mxu3 %v2476_v6  ;;  %v7851_v6 = vpop.f32.mrf.mxu3 }
 0x548   :  { %v2766_v22 = vpop.f32.mrf.mxu2 }
 0x549   :  { %v2416_v50 = vpop.xlane.xlu2 %2415  ;;  %v2767_v48 = vadd.f32 %v2766_v22, %v7752_v40 }
 0x54a   :  { %v2679_v35 = vpop.f32.mrf.mxu1  ;;  %v2458_v62 = vmul.f32 %v2416_v50, %v8872_v54 }
 0x54b   :  { %v2680_v56 = vadd.f32 %v2679_v35, %v7748_v52  ;;  %v2940_v25 = vmax.f32 %v2767_v48, 0.0  ;;  %v5699_v35 = vld [vmem:[%s8779_s6 + $0x40] sm:$0xff] }
 0x54c   :  { %3351 = vmatpush.bf16.msrb.mxu1 %v5699_v35 }
 0x54d   :  { %v2942_v44 = vmax.f32 %v2680_v56, 0.0  ;;  %v5707_v56 = vld [vmem:[%s8779_s6 + $0x80] sm:$0xff] }
 0x54e   :  { %3440 = vmatpush.bf16.msrb.mxu2 %v5707_v56  ;;  %v7863_v48 = vpop.f32.mrf.mxu3 }
 0x54f   :  { %v3023_v63 = vpack.c.bf16 %v2942_v44, %v2939_v42 }
 0x550   :  { %v2768_v51 = vpop.f32.mrf.mxu2  ;;  %v2419_v19 = vpop.xlane.xlu0 %2418 }
 0x551   :  { %v2769_v53 = vadd.f32 %v2768_v51, %v7752_v40  ;;  %v2459_v11 = vmul.f32 %v2419_v19, %v8873_v10  ;;  %3283 = vmatmul.bf16.gmra.mxu0 %v3023_v63 }
 0x552   :  { %v2682_v17 = vpop.f32.mrf.mxu1 }
 0x553   :  { %v2943_v26 = vmax.f32 %v2769_v53, 0.0  ;;  %v2477_v37 = vpack.c.bf16 %v2459_v11, %v2458_v62  ;;  %v2683_v18 = vadd.f32 %v2682_v17, %v7748_v52  ;;  %v8876_v53 = vld [vmem:[#allocation27_spill] sm:$0xff]  ;;  %v8877_v17 = vld [vmem:[#allocation28_spill] sm:$0xff] }
 0x555   :  { %2721 = vmatmul.bf16.gmra.mxu1 %v2477_v37  ;;  %2810 = vmatmul.bf16.gmra.mxu2 %v2477_v37  ;;  %v7823_v9 = vpack.c.bf16 %v2943_v26, %v2940_v25  ;;  %v2945_v2 = vmax.f32 %v2683_v18, 0.0  ;;  %v7874_v18 = vperm.slane %v7745_v39, 2 }
 0x556   :  { %2899 = vmatmul.bf16.gmra.mxu3 %v2477_v37  ;;  %v7871_v32 = vpop.f32.mrf.mxu3 }
 0x557   :  { %v2836_v43 = vadd.f32 %v7771_v61, %v7874_v18  ;;  %v2841_v35 = vadd.f32 %v7787_v57, %v7874_v18 }
 0x558   :  { %v2771_v55 = vpop.f32.mrf.mxu2 }
 0x559   :  { %v2422_v24 = vpop.xlane.xlu1 %2421  ;;  %v2772_v14 = vadd.f32 %v2771_v55, %v7752_v40  ;;  %v2917_v39 = vmax.f32 %v2836_v43, 0.0 }
 0x55a   :  { %v2684_v16 = vpop.f32.mrf.mxu1  ;;  %v2460_v27 = vmul.f32 %v2422_v24, %v8874_v41 }
 0x55b   :  { %v2685_v20 = vadd.f32 %v2684_v16, %v7748_v52  ;;  %v2946_v23 = vmax.f32 %v2772_v14, 0.0 }
 0x55d   :  { %v2948_v34 = vmax.f32 %v2685_v20, 0.0 }
 0x55f   :  { %v3026_v49 = vpack.c.bf16 %v2948_v34, %v2945_v2  ;;  %v2838_v2 = vadd.f32 %v7780_v0, %v7874_v18 }
 0x560   :  { %v2773_v29 = vpop.f32.mrf.mxu2  ;;  %v2425_v12 = vpop.xlane.xlu2 %2424 }
 0x561   :  { %v2774_v4 = vadd.f32 %v2773_v29, %v7752_v40  ;;  %v2461_v21 = vmul.f32 %v2425_v12, %v8875_v8  ;;  %3288 = vmatmul.bf16.gmra.mxu0 %v3026_v49  ;;  %v2920_v14 = vmax.f32 %v2838_v2, 0.0  ;;  %v7884_v12 = vpop.f32.mrf.mxu3 }
 0x562   :  { %v2687_v3 = vpop.f32.mrf.mxu1 }
 0x563   :  { %v2949_v22 = vmax.f32 %v2774_v4, 0.0  ;;  %v2478_v59 = vpack.c.bf16 %v2461_v21, %v2460_v27  ;;  %v2688_v36 = vadd.f32 %v2687_v3, %v7748_v52  ;;  %v3013_v0 = vpack.c.bf16 %v2920_v14, %v2917_v39 }
 0x565   :  { %2726 = vmatmul.bf16.gmra.mxu1 %v2478_v59  ;;  %2815 = vmatmul.bf16.gmra.mxu2 %v2478_v59  ;;  %v7859_v42 = vpack.c.bf16 %v2949_v22, %v2946_v23  ;;  %v2951_v63 = vmax.f32 %v2688_v36, 0.0  ;;  %v2843_v23 = vadd.f32 %v7805_v15, %v7874_v18 }
 0x566   :  { %2904 = vmatmul.bf16.gmra.mxu3 %v2478_v59 }
 0x568   :  { %v2776_v44 = vpop.f32.mrf.mxu2 }
 0x569   :  { %v2428_v58 = vpop.xlane.xlu0 %2427  ;;  %v2777_v51 = vadd.f32 %v2776_v44, %v7752_v40  ;;  %v7893_v59 = vpop.f32.mrf.mxu3 }
 0x56a   :  { %v2689_v28 = vpop.f32.mrf.mxu1  ;;  %v2462_v10 = vmul.f32 %v2428_v58, %v8876_v53 }
 0x56b   :  { %v2690_v50 = vadd.f32 %v2689_v28, %v7748_v52  ;;  %v2952_v37 = vmax.f32 %v2777_v51, 0.0 }
 0x56d   :  { %v2954_v46 = vmax.f32 %v2690_v50, 0.0 }
 0x56f   :  { %v3029_v19 = vpack.c.bf16 %v2954_v46, %v2951_v63  ;;  %v2923_v63 = vmax.f32 %v2841_v35, 0.0 }
 0x570   :  { %v2778_v54 = vpop.f32.mrf.mxu2  ;;  %v2431_v62 = vpop.xlane.xlu1 %2430 }
 0x571   :  { %v2779_v11 = vadd.f32 %v2778_v54, %v7752_v40  ;;  %v2463_v25 = vmul.f32 %v2431_v62, %v8877_v17  ;;  %3293 = vmatmul.bf16.gmra.mxu0 %v3029_v19  ;;  %v7902_v57 = vpop.f32.mrf.mxu3 }
 0x572   :  { %v2692_v26 = vpop.f32.mrf.mxu1 }
 0x573   :  { %v2955_v13 = vmax.f32 %v2779_v11, 0.0  ;;  %v2479_v1 = vpack.c.bf16 %v2463_v25, %v2462_v10  ;;  %v2693_v16 = vadd.f32 %v2692_v26, %v7748_v52  ;;  %v2848_v11 = vadd.f32 %v7851_v6, %v7874_v18 }
 0x574   :  { %v2846_v25 = vadd.f32 %v7831_v33, %v7874_v18 }
 0x575   :  { %2731 = vmatmul.bf16.gmra.mxu1 %v2479_v1  ;;  %2820 = vmatmul.bf16.gmra.mxu2 %v2479_v1  ;;  %v7869_v5 = vpack.c.bf16 %v2955_v13, %v2952_v37  ;;  %v2957_v47 = vmax.f32 %v2693_v16, 0.0 }
 0x576   :  { %2909 = vmatmul.bf16.gmra.mxu3 %v2479_v1 }
 0x578   :  { %v2781_v55 = vpop.f32.mrf.mxu2 }
 0x579   :  { %v2782_v49 = vadd.f32 %v2781_v55, %v7752_v40  ;;  %v7911_v55 = vpop.f32.mrf.mxu3 }
 0x57a   :  { %v2694_v20 = vpop.f32.mrf.mxu1 }
 0x57b   :  { %v2695_v34 = vadd.f32 %v2694_v20, %v7748_v52  ;;  %v2958_v27 = vmax.f32 %v2782_v49, 0.0  ;;  %v2929_v20 = vmax.f32 %v2846_v25, 0.0 }
 0x57d   :  { %v2960_v24 = vmax.f32 %v2695_v34, 0.0 }
 0x57f   :  { %v3032_v31 = vpack.c.bf16 %v2960_v24, %v2957_v47 }
 0x580   :  { %v2783_v38 = vpop.f32.mrf.mxu2 }
 0x581   :  { %v2784_v29 = vadd.f32 %v2783_v38, %v7752_v40  ;;  %3298 = vmatmul.bf16.gmra.mxu0 %v3032_v31  ;;  %v7918_v49 = vpop.f32.mrf.mxu3  ;;  %v2853_v38 = vadd.f32 %v7871_v32, %v7874_v18 }
 0x582   :  { %v2697_v41 = vpop.f32.mrf.mxu1 }
 0x583   :  { %v2961_v4 = vmax.f32 %v2784_v29, 0.0  ;;  %v2698_v21 = vadd.f32 %v2697_v41, %v7748_v52  ;;  %v2851_v29 = vadd.f32 %v7863_v48, %v7874_v18 }
 0x585   :  { %3352 = vmatmul.bf16.vlgmr.msrb.gmra.mxu1 %v7759_v45  ;;  %3441 = vmatmul.bf16.vlgmr.msrb.gmra.mxu2 %v3013_v0  ;;  %v7887_v61 = vpack.c.bf16 %v2961_v4, %v2958_v27  ;;  %v2963_v56 = vmax.f32 %v2698_v21, 0.0  ;;  %v2926_v45 = vmax.f32 %v2843_v23, 0.0  ;;  %v2935_v21 = vmax.f32 %v2851_v29, 0.0 }
 0x587   :  { %v3016_v19 = vpack.c.bf16 %v2926_v45, %v2923_v63 }
 0x588   :  { %v2786_v8 = vpop.f32.mrf.mxu2 }
 0x589   :  { %v2787_v36 = vadd.f32 %v2786_v8, %v7752_v40 }
 0x58a   :  { %v2699_v3 = vpop.f32.mrf.mxu1 }
 0x58b   :  { %v2700_v22 = vadd.f32 %v2699_v3, %v7748_v52  ;;  %v2964_v15 = vmax.f32 %v2787_v36, 0.0 }
 0x58d   :  { %v2966_v44 = vmax.f32 %v2700_v22, 0.0 }
 0x58f   :  { %v3035_v28 = vpack.c.bf16 %v2966_v44, %v2963_v56  ;;  %v2867_v56 = vpop.f32.mrf.mxu3 }
 0x590   :  { %v2788_v50 = vpop.f32.mrf.mxu2 }
 0x591   :  { %v2789_v46 = vadd.f32 %v2788_v50, %v7752_v40  ;;  %3303 = vmatmul.bf16.gmra.mxu0 %v3035_v28  ;;  %v2858_v28 = vadd.f32 %v7893_v59, %v7874_v18  ;;  %v7933_v50 = vpop.f32.mrf.mxu0 }
 0x592   :  { %v2702_v58 = vpop.f32.mrf.mxu1 }
 0x593   :  { %v2967_v51 = vmax.f32 %v2789_v46, 0.0  ;;  %v2703_v53 = vadd.f32 %v2702_v58, %v7748_v52  ;;  %v2856_v46 = vadd.f32 %v7884_v12, %v7874_v18 }
 0x595   :  { %3357 = vmatmul.bf16.gmra.mxu1 %v7767_v30  ;;  %3446 = vmatmul.bf16.gmra.mxu2 %v3016_v19  ;;  %v7900_v54 = vpack.c.bf16 %v2967_v51, %v2964_v15  ;;  %v2969_v26 = vmax.f32 %v2703_v53, 0.0  ;;  %v2932_v30 = vmax.f32 %v2848_v11, 0.0  ;;  %v2944_v51 = vmax.f32 %v2858_v28, 0.0 }
 0x597   :  { %v3019_v47 = vpack.c.bf16 %v2932_v30, %v2929_v20  ;;  %v2863_v20 = vadd.f32 %v7911_v55, %v7874_v18 }
 0x598   :  { %v2791_v62 = vpop.f32.mrf.mxu2 }
 0x599   :  { %v2792_v13 = vadd.f32 %v2791_v62, %v7752_v40 }
 0x59a   :  { %v2704_v10 = vpop.f32.mrf.mxu1 }
 0x59b   :  { %v2705_v17 = vadd.f32 %v2704_v10, %v7748_v52  ;;  %v2970_v6 = vmax.f32 %v2792_v13, 0.0  ;;  %v2941_v10 = vmax.f32 %v2856_v46, 0.0 }
 0x59d   :  { %v2972_v37 = vmax.f32 %v2705_v17, 0.0 }
 0x59f   :  { %v3038_v1 = vpack.c.bf16 %v2972_v37, %v2969_v26  ;;  %v3025_v26 = vpack.c.bf16 %v2944_v51, %v2941_v10  ;;  %v7942_v37 = vpop.f32.mrf.mxu0 }
 0x5a0   :  { %v2793_v16 = vpop.f32.mrf.mxu2 }
 0x5a1   :  { %v2794_v2 = vadd.f32 %v2793_v16, %v7752_v40  ;;  %3308 = vmatmul.bf16.gmra.mxu0 %v3038_v1 }
 0x5a2   :  { %v2707_v34 = vpop.f32.mrf.mxu1 }
 0x5a3   :  { %v2973_v43 = vmax.f32 %v2794_v2, 0.0  ;;  %v2708_v14 = vadd.f32 %v2707_v34, %v7748_v52  ;;  %v2861_v34 = vadd.f32 %v7902_v57, %v7874_v18 }
 0x5a5   :  { %3362 = vmatmul.bf16.gmra.mxu1 %v7777_v60  ;;  %3451 = vmatmul.bf16.gmra.mxu2 %v3019_v47  ;;  %v7915_v33 = vpack.c.bf16 %v2973_v43, %v2970_v6  ;;  %v2975_v41 = vmax.f32 %v2708_v14, 0.0  ;;  %v2938_v60 = vmax.f32 %v2853_v38, 0.0  ;;  %v2947_v38 = vmax.f32 %v2861_v34, 0.0 }
 0x5a7   :  { %v3022_v32 = vpack.c.bf16 %v2938_v60, %v2935_v21  ;;  %v7955_v47 = vpop.f32.mrf.mxu0 }
 0x5a8   :  { %v2796_v24 = vpop.f32.mrf.mxu2 }
 0x5a9   :  { %v2797_v27 = vadd.f32 %v2796_v24, %v7752_v40 }
 0x5aa   :  { %v2709_v31 = vpop.f32.mrf.mxu1 }
 0x5ab   :  { %v2710_v39 = vadd.f32 %v2709_v31, %v7748_v52  ;;  %v2976_v22 = vmax.f32 %v2797_v27, 0.0 }
 0x5ad   :  { %v2978_v0 = vmax.f32 %v2710_v39, 0.0 }
 0x5af   :  { %v3041_v4 = vpack.c.bf16 %v2978_v0, %v2975_v41 }
 0x5b0   :  { %v2798_v8 = vpop.f32.mrf.mxu2 }
 0x5b1   :  { %v2799_v3 = vadd.f32 %v2798_v8, %v7752_v40  ;;  %3313 = vmatmul.bf16.gmra.mxu0 %v3041_v4  ;;  %v7964_v4 = vpop.f32.mrf.mxu0 }
 0x5b2   :  { %v2712_v23 = vpop.f32.mrf.mxu1 }
 0x5b3   :  { %v2979_v35 = vmax.f32 %v2799_v3, 0.0  ;;  %v2713_v45 = vadd.f32 %v2712_v23, %v7748_v52  ;;  %v2868_v3 = vadd.f32 %v2867_v56, %v7874_v18 }
 0x5b5   :  { %3367 = vmatmul.bf16.gmra.mxu1 %v7789_v7  ;;  %3456 = vmatmul.bf16.gmra.mxu2 %v3022_v32  ;;  %v7928_v48 = vpack.c.bf16 %v2979_v35, %v2976_v22  ;;  %v2981_v58 = vmax.f32 %v2713_v45, 0.0  ;;  %v7938_v7 = vpop.f32.mrf.mxu3  ;;  %v5722_v35 = vld [vmem:[%s8782_s8 + $0x38] sm:$0xff]  ;;  %v5721_v45 = vld [vmem:[%s8782_s8 + $0x30] sm:$0xff] }
 0x5b6   :  { %3634 = vmatpush.bf16.msrb.mxu3 %v5722_v35 }
 0x5b8   :  { %v2801_v44 = vpop.f32.mrf.mxu2 }
 0x5b9   :  { %v2802_v19 = vadd.f32 %v2801_v44, %v7752_v40  ;;  %v7981_v51 = vpop.f32.mrf.mxu0 }
 0x5ba   :  { %v2714_v36 = vpop.f32.mrf.mxu1  ;;  %3635 = vmatpush.bf16.msrb.mxu3 %v5721_v45 }
 0x5bb   :  { %v2715_v63 = vadd.f32 %v2714_v36, %v7748_v52  ;;  %v2982_v17 = vmax.f32 %v2802_v19, 0.0  ;;  %v2956_v36 = vmax.f32 %v2868_v3, 0.0 }
 0x5bd   :  { %v2984_v15 = vmax.f32 %v2715_v63, 0.0  ;;  %v7947_v30 = vpop.f32.mrf.mxu3 }
 0x5bf   :  { %v3044_v62 = vpack.c.bf16 %v2984_v15, %v2981_v58 }
 0x5c0   :  { %v2803_v53 = vpop.f32.mrf.mxu2 }
 0x5c1   :  { %v2804_v11 = vadd.f32 %v2803_v53, %v7752_v40  ;;  %3318 = vmatmul.bf16.gmra.mxu0 %v3044_v62  ;;  %v5720_v53 = vld [vmem:[%s8782_s8 + $0x28] sm:$0xff] }
 0x5c2   :  { %v2717_v59 = vpop.f32.mrf.mxu1  ;;  %3636 = vmatpush.bf16.msrb.mxu3 %v5720_v53  ;;  %v8037_v53 = vld [vmem:[%s8781_s7] ss:$0 sm:$0xff] }
 0x5c3   :  { %v2985_v25 = vmax.f32 %v2804_v11, 0.0  ;;  %v2718_v1 = vadd.f32 %v2717_v59, %v7748_v52  ;;  %v5719_v59 = vld [vmem:[%s8782_s8 + $0x20] sm:$0xff] }
 0x5c5   :  { %3372 = vmatmul.bf16.gmra.mxu1 %v7823_v9  ;;  %3461 = vmatmul.bf16.gmra.mxu2 %v3025_v26  ;;  %v7945_v12 = vpack.c.bf16 %v2985_v25, %v2982_v17  ;;  %v2987_v6 = vmax.f32 %v2718_v1, 0.0  ;;  %v2950_v9 = vmax.f32 %v2863_v20, 0.0  ;;  %v7959_v29 = vpop.f32.mrf.mxu3  ;;  %v5718_v1 = vld [vmem:[%s8782_s8 + $0x18] sm:$0xff]  ;;  %v8003_v20 = vpop.f32.mrf.mxu0 }
 0x5c6   :  { %3637 = vmatpush.bf16.msrb.mxu3 %v5719_v59 }
 0x5c7   :  { %v3028_v60 = vpack.c.bf16 %v2950_v9, %v2947_v38 }
 0x5c8   :  { %v2806_v13 = vpop.f32.mrf.mxu2 }
 0x5c9   :  { %v2807_v24 = vadd.f32 %v2806_v13, %v7752_v40  ;;  %v2873_v13 = vadd.f32 %v7947_v30, %v7874_v18 }
 0x5ca   :  { %v2719_v16 = vpop.f32.mrf.mxu1  ;;  %3638 = vmatpush.bf16.msrb.mxu3 %v5718_v1 }
 0x5cb   :  { %v2720_v2 = vadd.f32 %v2719_v16, %v7748_v52  ;;  %v2988_v41 = vmax.f32 %v2807_v24, 0.0  ;;  %v2871_v16 = vadd.f32 %v7938_v7, %v7874_v18 }
 0x5cd   :  { %v2990_v43 = vmax.f32 %v2720_v2, 0.0  ;;  %v7969_v22 = vpop.f32.mrf.mxu3 }
 0x5cf   :  { %v3047_v14 = vpack.c.bf16 %v2990_v43, %v2987_v6  ;;  %v5717_v6 = vld [vmem:[%s8782_s8 + $0x10] sm:$0xff]  ;;  %v2962_v43 = vmax.f32 %v2873_v13, 0.0 }
 0x5d0   :  { %v2808_v31 = vpop.f32.mrf.mxu2  ;;  %3639 = vmatpush.bf16.msrb.mxu3 %v5717_v6 }
 0x5d1   :  { %v2809_v39 = vadd.f32 %v2808_v31, %v7752_v40  ;;  %3323 = vmatmul.bf16.gmra.mxu0 %v3047_v14  ;;  %v2959_v31 = vmax.f32 %v2871_v16, 0.0 }
 0x5d2   :  { %v2722_v55 = vpop.f32.mrf.mxu1 }
 0x5d3   :  { %v2991_v0 = vmax.f32 %v2809_v39, 0.0  ;;  %v2723_v8 = vadd.f32 %v2722_v55, %v7748_v52 }
 0x5d5   :  { %3377 = vmatmul.bf16.gmra.mxu1 %v7859_v42  ;;  %3466 = vmatmul.bf16.gmra.mxu2 %v3028_v60  ;;  %v7962_v57 = vpack.c.bf16 %v2991_v0, %v2988_v41  ;;  %v2866_v42 = vadd.f32 %v7918_v49, %v7874_v18  ;;  %v2993_v32 = vmax.f32 %v2723_v8, 0.0  ;;  %v7989_v11 = vpop.f32.mrf.mxu3  ;;  %v3034_v41 = vpack.c.bf16 %v2962_v43, %v2959_v31  ;;  %v5716_v0 = vld [vmem:[%s8782_s8 + $0x8] sm:$0xff]  ;;  %v8019_v8 = vpop.f32.mrf.mxu0 }
 0x5d6   :  { %3640 = vmatpush.bf16.msrb.mxu3 %v5716_v0 }
 0x5d7   :  { %v2953_v46 = vmax.f32 %v2866_v42, 0.0  ;;  %v2878_v42 = vadd.f32 %v7969_v22, %v7874_v18 }
 0x5d8   :  { %v2811_v27 = vpop.f32.mrf.mxu2 }
 0x5d9   :  { %v2812_v56 = vadd.f32 %v2811_v27, %v7752_v40  ;;  %v3031_v62 = vpack.c.bf16 %v2956_v36, %v2953_v46  ;;  %v5715_v27 = vld [vmem:[%s8782_s8] sm:$0xff]  ;;  %v2968_v36 = vmax.f32 %v2878_v42, 0.0 }
 0x5da   :  { %v2724_v21 = vpop.f32.mrf.mxu1  ;;  %3641 = vmatpush.bf16.msrb.mxu3 %v5715_v27 }
 0x5db   :  { %v2725_v23 = vadd.f32 %v2724_v21, %v7748_v52  ;;  %v2994_v49 = vmax.f32 %v2812_v56, 0.0 }
 0x5dd   :  { %v2996_v44 = vmax.f32 %v2725_v23, 0.0  ;;  %v2882_v24 = vpop.f32.mrf.mxu3 }
 0x5df   :  { %v3050_v28 = vpack.c.bf16 %v2996_v44, %v2993_v32  ;;  %v2876_v32 = vadd.f32 %v7959_v29, %v7874_v18 }
 0x5e0   :  { %v2813_v63 = vpop.f32.mrf.mxu2 }
 0x5e1   :  { %v2814_v58 = vadd.f32 %v2813_v63, %v7752_v40  ;;  %3328 = vmatmul.bf16.gmra.mxu0 %v3050_v28  ;;  %v2965_v46 = vmax.f32 %v2876_v32, 0.0 }
 0x5e2   :  { %v2727_v15 = vpop.f32.mrf.mxu1 }
 0x5e3   :  { %v2997_v19 = vmax.f32 %v2814_v58, 0.0  ;;  %v2728_v25 = vadd.f32 %v2727_v15, %v7748_v52  ;;  %v8028_v58 = vpop.f32.mrf.mxu0 }
 0x5e5   :  { %3382 = vmatmul.bf16.gmra.mxu1 %v7869_v5  ;;  %3471 = vmatmul.bf16.gmra.mxu2 %v3031_v62  ;;  %v7987_v10 = vpack.c.bf16 %v2997_v19, %v2994_v49  ;;  %v2999_v2 = vmax.f32 %v2728_v25, 0.0  ;;  %v2885_v23 = vpop.f32.mrf.mxu3  ;;  %v2883_v25 = vadd.f32 %v2882_v24, %v7874_v18 }
 0x5e7   :  { %v2974_v1 = vmax.f32 %v2883_v25, 0.0 }
 0x5e8   :  { %v2816_v17 = vpop.f32.mrf.mxu2 }
 0x5e9   :  { %v2817_v30 = vadd.f32 %v2816_v17, %v7752_v40 }
 0x5ea   :  { %v2729_v26 = vpop.f32.mrf.mxu1 }
 0x5eb   :  { %v2730_v5 = vadd.f32 %v2729_v26, %v7748_v52  ;;  %v3000_v39 = vmax.f32 %v2817_v30, 0.0  ;;  %v3267_v26 = vadd.f32 %v8037_v53, %v7942_v37  ;;  %v8046_v31 = vpop.f32.mrf.mxu0 }
 0x5ed   :  { %v3002_v34 = vmax.f32 %v2730_v5, 0.0  ;;  %v2887_v62 = vpop.f32.mrf.mxu3 }
 0x5ef   :  { %v3053_v9 = vpack.c.bf16 %v3002_v34, %v2999_v2 }
 0x5f0   :  { %v2818_v14 = vpop.f32.mrf.mxu2 }
 0x5f1   :  { %v2819_v38 = vadd.f32 %v2818_v14, %v7752_v40  ;;  %3333 = vmatmul.bf16.gmra.mxu0 %v3053_v9 }
 0x5f2   :  { %v2732_v7 = vpop.f32.mrf.mxu1 }
 0x5f3   :  { %v3003_v55 = vmax.f32 %v2819_v38, 0.0  ;;  %v2733_v3 = vadd.f32 %v2732_v7, %v7748_v52  ;;  %v3270_v7 = vadd.f32 %v8037_v53, %v7955_v47  ;;  %v8055_v27 = vpop.f32.mrf.mxu0 }
 0x5f5   :  { %3387 = vmatmul.bf16.gmra.mxu1 %v7887_v61  ;;  %3476 = vmatmul.bf16.gmra.mxu2 %v3034_v41  ;;  %v8014_v60 = vpack.c.bf16 %v3003_v55, %v3000_v39  ;;  %v3005_v44 = vmax.f32 %v2733_v3, 0.0  ;;  %v2890_v5 = vpop.f32.mrf.mxu3  ;;  %v2888_v39 = vadd.f32 %v2887_v62, %v7874_v18  ;;  %v3272_v55 = vadd.f32 %v8037_v53, %v7964_v4 }
 0x5f6   :  { %v2886_v41 = vadd.f32 %v2885_v23, %v7874_v18 }
 0x5f8   :  { %v2821_v21 = vpop.f32.mrf.mxu2  ;;  %v2977_v42 = vmax.f32 %v2886_v41, 0.0 }
 0x5f9   :  { %v2822_v56 = vadd.f32 %v2821_v21, %v7752_v40  ;;  %v2980_v21 = vmax.f32 %v2888_v39, 0.0 }
 0x5fa   :  { %v2734_v35 = vpop.f32.mrf.mxu1 }
 0x5fb   :  { %v2735_v61 = vadd.f32 %v2734_v35, %v7748_v52  ;;  %v3006_v22 = vmax.f32 %v2822_v56, 0.0  ;;  %v3037_v52 = vpack.c.bf16 %v2968_v36, %v2965_v46  ;;  %v3043_v36 = vpack.c.bf16 %v2980_v21, %v2977_v42  ;;  %v8058_v23 = vpop.f32.mrf.mxu0 }
 0x5fc   :  { %v3287_v42 = vadd.f32 %v8037_v53, %v8055_v27 }
 0x5fd   :  { %v3008_v45 = vmax.f32 %v2735_v61, 0.0  ;;  %v2892_v37 = vpop.f32.mrf.mxu3 }
 0x5fe   :  { %v2893_v46 = vadd.f32 %v2892_v37, %v7874_v18 }
 0x5ff   :  { %v3056_v28 = vpack.c.bf16 %v3008_v45, %v3005_v44 }
 0x600   :  { %v2823_v63 = vpop.f32.mrf.mxu2 }
 0x601   :  { %v2824_v15 = vadd.f32 %v2823_v63, %v7752_v40  ;;  %3338 = vmatmul.bf16.gmra.mxu0 %v3056_v28  ;;  %v3265_v40 = vadd.f32 %v8037_v53, %v7933_v50  ;;  %v3275_v63 = vadd.f32 %v8037_v53, %v7981_v51 }
 0x602   :  { %v3353_v49 = vpop.f32.mrf.mxu1 }
 0x603   :  { %v3009_v19 = vmax.f32 %v2824_v15, 0.0  ;;  %v3354_v13 = vadd.f32 %v3353_v49, %v3265_v40  ;;  %v3277_v49 = vadd.f32 %v8037_v53, %v8003_v20  ;;  %v8066_v25 = vpop.f32.mrf.mxu0 }
 0x605   :  { %3392 = vmatmul.bf16.gmra.mxu1 %v7900_v54  ;;  %3481 = vmatmul.bf16.gmra.mxu2 %v3037_v52  ;;  %v8032_v29 = vpack.c.bf16 %v3009_v19, %v3006_v22  ;;  %v2881_v54 = vadd.f32 %v7989_v11, %v7874_v18  ;;  %v2895_v32 = vpop.f32.mrf.mxu3  ;;  %v2891_v22 = vadd.f32 %v2890_v5, %v7874_v18 }
 0x607   :  { %v2971_v6 = vmax.f32 %v2881_v54, 0.0 }
 0x608   :  { %v3442_v59 = vpop.f32.mrf.mxu2 }
 0x609   :  { %v3443_v16 = vadd.f32 %v3442_v59, %v3354_v13  ;;  %v3040_v50 = vpack.c.bf16 %v2974_v1, %v2971_v6 }
 0x60a   :  { %v3355_v17 = vpop.f32.mrf.mxu1 }
 0x60b   :  { %v3356_v2 = vadd.f32 %v3355_v17, %v3267_v26  ;;  %v3522_v9 = vmax.f32 %v3443_v16, 0.0  ;;  %v2983_v17 = vmax.f32 %v2891_v22, 0.0  ;;  %v8072_v6 = vpop.f32.mrf.mxu0 }
 0x60d   :  { %v2897_v15 = vpop.f32.mrf.mxu3 }
 0x610   :  { %v3444_v34 = vpop.f32.mrf.mxu2 }
 0x611   :  { %v3445_v43 = vadd.f32 %v3444_v34, %v3356_v2  ;;  %v3280_v2 = vadd.f32 %v8037_v53, %v8019_v8  ;;  %v2898_v34 = vadd.f32 %v2897_v15, %v7874_v18 }
 0x612   :  { %v3358_v30 = vpop.f32.mrf.mxu1 }
 0x613   :  { %v3523_v14 = vmax.f32 %v3445_v43, 0.0  ;;  %v3359_v0 = vadd.f32 %v3358_v30, %v3270_v7  ;;  %v3282_v43 = vadd.f32 %v8037_v53, %v8028_v58  ;;  %v2896_v30 = vadd.f32 %v2895_v32, %v7874_v18 }
 0x615   :  { %v3554_v24 = vpack.c.bf16 %v3523_v14, %v3522_v9  ;;  %3397 = vmatmul.bf16.gmra.mxu1 %v7915_v33  ;;  %3486 = vmatmul.bf16.gmra.mxu2 %v3040_v50  ;;  %v2900_v20 = vpop.f32.mrf.mxu3 }
 0x617   :  { %3642 = vmatmul.bf16.vlgmr.msrb.gmra.mxu3 %v3554_v24 }
 0x618   :  { %v3447_v11 = vpop.f32.mrf.mxu2 }
 0x619   :  { %v3448_v33 = vadd.f32 %v3447_v11, %v3359_v0  ;;  %v2989_v11 = vmax.f32 %v2896_v30, 0.0  ;;  %v3296_v0 = vpop.f32.mrf.mxu0 }
 0x61a   :  { %v3360_v38 = vpop.f32.mrf.mxu1 }
 0x61b   :  { %v3361_v3 = vadd.f32 %v3360_v38, %v3272_v55  ;;  %v3524_v45 = vmax.f32 %v3448_v33, 0.0 }
 0x61d   :  { %v2902_v24 = vpop.f32.mrf.mxu3 }
 0x620   :  { %v3449_v35 = vpop.f32.mrf.mxu2 }
 0x621   :  { %v3450_v61 = vadd.f32 %v3449_v35, %v3361_v3  ;;  %v3285_v3 = vadd.f32 %v8037_v53, %v8046_v31  ;;  %v2903_v35 = vadd.f32 %v2902_v24, %v7874_v18 }
 0x622   :  { %v3363_v44 = vpop.f32.mrf.mxu1 }
 0x623   :  { %v3525_v47 = vmax.f32 %v3450_v61, 0.0  ;;  %v3364_v19 = vadd.f32 %v3363_v44, %v3275_v63  ;;  %v2901_v61 = vadd.f32 %v2900_v20, %v7874_v18  ;;  %v2998_v44 = vmax.f32 %v2903_v35, 0.0 }
 0x624   :  { %v8818_v35 = vmov 0  }
 0x625   :  { %3402 = vmatmul.bf16.gmra.mxu1 %v7928_v48  ;;  %3491 = vmatmul.bf16.gmra.mxu2 %v3043_v36  ;;  %v3555_v4 = vpack.c.bf16 %v3525_v47, %v3524_v45  ;;  %v2986_v48 = vmax.f32 %v2893_v46, 0.0  ;;  %v2905_v21 = vpop.f32.mrf.mxu3  ;;  %v8084_v47 = vpop.f32.mrf.mxu0 }
 0x626   :  { %5727 = vset.pattern.permute.xlu1 %v8818_v35  ;;  %5728 = vset.pattern.permute.xlu2 %v8818_v35 }
 0x627   :  { %3647 = vmatmul.bf16.gmra.mxu3 %v3555_v4  ;;  %v3046_v13 = vpack.c.bf16 %v2986_v48, %v2983_v17  ;;  %v2995_v4 = vmax.f32 %v2901_v61, 0.0  ;;  %v3290_v48 = vadd.f32 %v8037_v53, %v8058_v23  ;;  %5729 = vset.pattern.permute.xlu0 %v8818_v35 }
 0x628   :  { %v3452_v56 = vpop.f32.mrf.mxu2 }
 0x629   :  { %v3453_v52 = vadd.f32 %v3452_v56, %v3364_v19  ;;  %v3052_v31 = vpack.c.bf16 %v2998_v44, %v2995_v4 }
 0x62a   :  { %v3365_v28 = vpop.f32.mrf.mxu1 }
 0x62b   :  { %v3366_v62 = vadd.f32 %v3365_v28, %v3277_v49  ;;  %v3526_v54 = vmax.f32 %v3453_v52, 0.0 }
 0x62d   :  { %v2907_v15 = vpop.f32.mrf.mxu3  ;;  %v3301_v22 = vpop.f32.mrf.mxu0 }
 0x62e   :  { %v2908_v52 = vadd.f32 %v2907_v15, %v7874_v18 }
 0x630   :  { %v3454_v59 = vpop.f32.mrf.mxu2 }
 0x631   :  { %v3455_v40 = vadd.f32 %v3454_v59, %v3366_v62  ;;  %v3292_v62 = vadd.f32 %v8037_v53, %v8066_v25  ;;  %v2906_v59 = vadd.f32 %v2905_v21, %v7874_v18 }
 0x632   :  { %v3368_v26 = vpop.f32.mrf.mxu1 }
 0x633   :  { %v3527_v51 = vmax.f32 %v3455_v40, 0.0  ;;  %v3369_v9 = vadd.f32 %v3368_v26, %v3280_v2  ;;  %v3004_v26 = vmax.f32 %v2908_v52, 0.0 }
 0x635   :  { %3407 = vmatmul.bf16.gmra.mxu1 %v7945_v12  ;;  %3496 = vmatmul.bf16.gmra.mxu2 %v3046_v13  ;;  %v3556_v1 = vpack.c.bf16 %v3527_v51, %v3526_v54  ;;  %v2992_v12 = vmax.f32 %v2898_v34, 0.0  ;;  %v2910_v40 = vpop.f32.mrf.mxu3  ;;  %v3001_v13 = vmax.f32 %v2906_v59, 0.0  ;;  %v3304_v23 = vpop.f32.mrf.mxu0 }
 0x637   :  { %3652 = vmatmul.bf16.gmra.mxu3 %v3556_v1  ;;  %v3049_v55 = vpack.c.bf16 %v2992_v12, %v2989_v11  ;;  %v3055_v2 = vpack.c.bf16 %v3004_v26, %v3001_v13 }
 0x638   :  { %v3457_v5 = vpop.f32.mrf.mxu2 }
 0x639   :  { %v3458_v14 = vadd.f32 %v3457_v5, %v3369_v9  ;;  %v3295_v9 = vadd.f32 %v8037_v53, %v8072_v6 }
 0x63a   :  { %v3370_v16 = vpop.f32.mrf.mxu1 }
 0x63b   :  { %v3371_v50 = vadd.f32 %v3370_v16, %v3282_v43  ;;  %v3528_v39 = vmax.f32 %v3458_v14, 0.0  ;;  %v3297_v14 = vadd.f32 %v8037_v53, %v3296_v0 }
 0x63d   :  { %v2912_v25 = vpop.f32.mrf.mxu3 }
 0x63e   :  { %v2913_v12 = vadd.f32 %v2912_v25, %v7874_v18 }
 0x640   :  { %v3459_v37 = vpop.f32.mrf.mxu2  ;;  %v3010_v11 = vmax.f32 %v2913_v12, 0.0 }
 0x641   :  { %v3460_v38 = vadd.f32 %v3459_v37, %v3371_v50  ;;  %v2911_v50 = vadd.f32 %v2910_v40, %v7874_v18  ;;  %v3306_v37 = vpop.f32.mrf.mxu0 }
 0x642   :  { %v3373_v7 = vpop.f32.mrf.mxu1  ;;  %v3307_v15 = vadd.f32 %v8037_v53, %v3306_v37 }
 0x643   :  { %v3529_v8 = vmax.f32 %v3460_v38, 0.0  ;;  %v3374_v32 = vadd.f32 %v3373_v7, %v3285_v3  ;;  %v3300_v3 = vadd.f32 %v8037_v53, %v8084_v47 }
 0x645   :  { %3412 = vmatmul.bf16.gmra.mxu1 %v7962_v57  ;;  %3501 = vmatmul.bf16.gmra.mxu2 %v3049_v55  ;;  %v3557_v41 = vpack.c.bf16 %v3529_v8, %v3528_v39  ;;  %v3007_v39 = vmax.f32 %v2911_v50, 0.0 }
 0x647   :  { %3657 = vmatmul.bf16.gmra.mxu3 %v3557_v41  ;;  %v3058_v21 = vpack.c.bf16 %v3010_v11, %v3007_v39 }
 0x648   :  { %v3462_v58 = vpop.f32.mrf.mxu2 }
 0x649   :  { %v3463_v57 = vadd.f32 %v3462_v58, %v3374_v32  ;;  %v3309_v6 = vpop.f32.mrf.mxu0 }
 0x64a   :  { %v3375_v33 = vpop.f32.mrf.mxu1  ;;  %v3310_v13 = vadd.f32 %v8037_v53, %v3309_v6 }
 0x64b   :  { %v3376_v45 = vadd.f32 %v3375_v33, %v3287_v42  ;;  %v3530_v63 = vmax.f32 %v3463_v57, 0.0  ;;  %v3302_v42 = vadd.f32 %v8037_v53, %v3301_v22 }
 0x650   :  { %v3464_v36 = vpop.f32.mrf.mxu2 }
 0x651   :  { %v3465_v56 = vadd.f32 %v3464_v36, %v3376_v45  ;;  %v3311_v45 = vpop.f32.mrf.mxu0 }
 0x652   :  { %v3378_v28 = vpop.f32.mrf.mxu1 }
 0x653   :  { %v3531_v46 = vmax.f32 %v3465_v56, 0.0  ;;  %v3379_v17 = vadd.f32 %v3378_v28, %v3290_v48 }
 0x655   :  { %v3558_v49 = vpack.c.bf16 %v3531_v46, %v3530_v63  ;;  %3417 = vmatmul.bf16.gmra.mxu1 %v7987_v10  ;;  %3506 = vmatmul.bf16.gmra.mxu2 %v3052_v31  ;;  %v3305_v46 = vadd.f32 %v8037_v53, %v3304_v23 }
 0x657   :  { %3662 = vmatmul.bf16.gmra.mxu3 %v3558_v49 }
 0x658   :  { %v3467_v27 = vpop.f32.mrf.mxu2 }
 0x659   :  { %v3468_v54 = vadd.f32 %v3467_v27, %v3379_v17  ;;  %v3314_v31 = vpop.f32.mrf.mxu0 }
 0x65a   :  { %v3380_v19 = vpop.f32.mrf.mxu1 }
 0x65b   :  { %v3381_v10 = vadd.f32 %v3380_v19, %v3292_v62  ;;  %v3532_v5 = vmax.f32 %v3468_v54, 0.0  ;;  %v8111_v54 = vld [vmem:[%s8783_s9] ss:$0 sm:$0xff] }
 0x660   :  { %v3469_v51 = vpop.f32.mrf.mxu2 }
 0x661   :  { %v3470_v1 = vadd.f32 %v3469_v51, %v3381_v10  ;;  %v3316_v40 = vpop.f32.mrf.mxu0 }
 0x662   :  { %v3383_v20 = vpop.f32.mrf.mxu1  ;;  %v3317_v39 = vadd.f32 %v8037_v53, %v3316_v40 }
 0x663   :  { %v3533_v16 = vmax.f32 %v3470_v1, 0.0  ;;  %v3384_v24 = vadd.f32 %v3383_v20, %v3295_v9  ;;  %v3312_v20 = vadd.f32 %v8037_v53, %v3311_v45 }
 0x665   :  { %v3559_v34 = vpack.c.bf16 %v3533_v16, %v3532_v5  ;;  %3422 = vmatmul.bf16.gmra.mxu1 %v8014_v60  ;;  %3511 = vmatmul.bf16.gmra.mxu2 %v3055_v2 }
 0x667   :  { %3667 = vmatmul.bf16.gmra.mxu3 %v3559_v34 }
 0x668   :  { %v3472_v43 = vpop.f32.mrf.mxu2 }
 0x669   :  { %v3473_v38 = vadd.f32 %v3472_v43, %v3384_v24  ;;  %v3319_v34 = vpop.f32.mrf.mxu0 }
 0x66a   :  { %v3385_v30 = vpop.f32.mrf.mxu1 }
 0x66b   :  { %v3386_v7 = vadd.f32 %v3385_v30, %v3297_v14  ;;  %v3534_v41 = vmax.f32 %v3473_v38, 0.0 }
 0x670   :  { %v3474_v60 = vpop.f32.mrf.mxu2 }
 0x671   :  { %v3475_v8 = vadd.f32 %v3474_v60, %v3386_v7  ;;  %v3321_v38 = vpop.f32.mrf.mxu0  ;;  %v3315_v60 = vadd.f32 %v8037_v53, %v3314_v31 }
 0x672   :  { %v3388_v55 = vpop.f32.mrf.mxu1  ;;  %v3322_v45 = vadd.f32 %v8037_v53, %v3321_v38 }
 0x673   :  { %v3535_v58 = vmax.f32 %v3475_v8, 0.0  ;;  %v3389_v61 = vadd.f32 %v3388_v55, %v3300_v3 }
 0x675   :  { %v3560_v33 = vpack.c.bf16 %v3535_v58, %v3534_v41  ;;  %3427 = vmatmul.bf16.gmra.mxu1 %v8032_v29  ;;  %3516 = vmatmul.bf16.gmra.mxu2 %v3058_v21 }
 0x677   :  { %3672 = vmatmul.bf16.gmra.mxu3 %v3560_v33 }
 0x678   :  { %v3477_v0 = vpop.f32.mrf.mxu2 }
 0x679   :  { %v3478_v32 = vadd.f32 %v3477_v0, %v3389_v61  ;;  %v3324_v3 = vpop.f32.mrf.mxu0 }
 0x67a   :  { %v3390_v18 = vpop.f32.mrf.mxu1 }
 0x67b   :  { %v3391_v29 = vadd.f32 %v3390_v18, %v3302_v42  ;;  %v3536_v4 = vmax.f32 %v3478_v32, 0.0 }
 0x680   :  { %v3479_v44 = vpop.f32.mrf.mxu2 }
 0x681   :  { %v3480_v57 = vadd.f32 %v3479_v44, %v3391_v29 }
 0x682   :  { %v3393_v36 = vpop.f32.mrf.mxu1 }
 0x683   :  { %v3537_v56 = vmax.f32 %v3480_v57, 0.0  ;;  %v3394_v49 = vadd.f32 %v3393_v36, %v3305_v46  ;;  %v3320_v57 = vadd.f32 %v8037_v53, %v3319_v34 }
 0x685   :  { %v3561_v28 = vpack.c.bf16 %v3537_v56, %v3536_v4  ;;  %v3326_v56 = vpop.f32.mrf.mxu0 }
 0x687   :  { %3677 = vmatmul.bf16.gmra.mxu3 %v3561_v28 }
 0x688   :  { %v3482_v47 = vpop.f32.mrf.mxu2 }
 0x689   :  { %v3483_v27 = vadd.f32 %v3482_v47, %v3394_v49 }
 0x68a   :  { %v3395_v63 = vpop.f32.mrf.mxu1 }
 0x68b   :  { %v3396_v22 = vadd.f32 %v3395_v63, %v3307_v15  ;;  %v3538_v62 = vmax.f32 %v3483_v27, 0.0 }
 0x690   :  { %v3484_v19 = vpop.f32.mrf.mxu2 }
 0x691   :  { %v3485_v48 = vadd.f32 %v3484_v19, %v3396_v22 }
 0x692   :  { %v3398_v52 = vpop.f32.mrf.mxu1 }
 0x693   :  { %v3539_v59 = vmax.f32 %v3485_v48, 0.0  ;;  %v3399_v5 = vadd.f32 %v3398_v52, %v3310_v13  ;;  %v3329_v48 = vpop.f32.mrf.mxu0 }
 0x695   :  { %v3562_v17 = vpack.c.bf16 %v3539_v59, %v3538_v62  ;;  %v3325_v59 = vadd.f32 %v8037_v53, %v3324_v3 }
 0x697   :  { %3682 = vmatmul.bf16.gmra.mxu3 %v3562_v17  ;;  %v3327_v17 = vadd.f32 %v8037_v53, %v3326_v56 }
 0x698   :  { %v3487_v26 = vpop.f32.mrf.mxu2 }
 0x699   :  { %v3488_v2 = vadd.f32 %v3487_v26, %v3399_v5 }
 0x69a   :  { %v3400_v10 = vpop.f32.mrf.mxu1  ;;  %v3643_v51 = vpop.f32.mrf.mxu3 }
 0x69b   :  { %v8114_v1 = vmax.f32 %v3643_v51, 0.0  ;;  %v3401_v23 = vadd.f32 %v3400_v10, %v3312_v20  ;;  %v3540_v12 = vmax.f32 %v3488_v2, 0.0  ;;  %v3331_v5 = vpop.f32.mrf.mxu0 }
 0x69d   :  { %3889 = vperm.xlu1 %5727, %v8114_v1   ;;  %v3759_v16 = vmul.f32 %v8111_v54, %v8114_v1 }
 0x69f   :  { %3791 = vadd.xlane.f32.xlu2 %v3759_v16 }
 0x6a0   :  { %v3489_v25 = vpop.f32.mrf.mxu2 }
 0x6a1   :  { %v3490_v43 = vadd.f32 %v3489_v25, %v3401_v23 }
 0x6a2   :  { %v3403_v30 = vpop.f32.mrf.mxu1  ;;  %v3645_v9 = vpop.f32.mrf.mxu3 }
 0x6a3   :  { %v3541_v14 = vmax.f32 %v3490_v43, 0.0  ;;  %v8120_v50 = vmax.f32 %v3645_v9, 0.0  ;;  %v3404_v8 = vadd.f32 %v3403_v30, %v3315_v60  ;;  %v3330_v9 = vadd.f32 %v8037_v53, %v3329_v48 }
 0x6a5   :  { %v3563_v24 = vpack.c.bf16 %v3541_v14, %v3540_v12  ;;  %v3760_v37 = vmul.f32 %v8111_v54, %v8120_v50  ;;  %v3334_v12 = vpop.f32.mrf.mxu0  ;;  %v3332_v14 = vadd.f32 %v8037_v53, %v3331_v5 }
 0x6a7   :  { %3687 = vmatmul.bf16.gmra.mxu3 %v3563_v24  ;;  %3793 = vadd.xlane.f32.xlu0 %v3760_v37 }
 0x6a8   :  { %v3492_v11 = vpop.f32.mrf.mxu2 }
 0x6a9   :  { %v3493_v55 = vadd.f32 %v3492_v11, %v3404_v8 }
 0x6aa   :  { %v3405_v7 = vpop.f32.mrf.mxu1  ;;  %v3648_v58 = vpop.f32.mrf.mxu3 }
 0x6ab   :  { %v3406_v41 = vadd.f32 %v3405_v7, %v3317_v39  ;;  %v3542_v0 = vmax.f32 %v3493_v55, 0.0  ;;  %v8127_v32 = vmax.f32 %v3648_v58, 0.0 }
 0x6ad   :  { %v3761_v22 = vmul.f32 %v8111_v54, %v8127_v32 }
 0x6b0   :  { %v3494_v21 = vpop.f32.mrf.mxu2 }
 0x6b1   :  { %v3495_v33 = vadd.f32 %v3494_v21, %v3406_v41 }
 0x6b2   :  { %v3408_v6 = vpop.f32.mrf.mxu1  ;;  %v3650_v29 = vpop.f32.mrf.mxu3 }
 0x6b3   :  { %v3543_v18 = vmax.f32 %v3495_v33, 0.0  ;;  %v3409_v36 = vadd.f32 %v3408_v6, %v3320_v57  ;;  %v8132_v4 = vmax.f32 %v3650_v29, 0.0  ;;  %v3336_v33 = vpop.f32.mrf.mxu0 }
 0x6b5   :  { %v3564_v42 = vpack.c.bf16 %v3543_v18, %v3542_v0  ;;  %v3762_v6 = vmul.f32 %v8111_v54, %v8132_v4  ;;  %v8820_v0 = vmov 1  }
 0x6b7   :  { %3692 = vmatmul.bf16.gmra.mxu3 %v3564_v42  ;;  %3894 = vperm.xlu2 %5728, %v8120_v50  }
 0x6b8   :  { %v3497_v61 = vpop.f32.mrf.mxu2 }
 0x6b9   :  { %v3498_v28 = vadd.f32 %v3497_v61, %v3409_v36  ;;  %v3335_v61 = vadd.f32 %v8037_v53, %v3334_v12 }
 0x6ba   :  { %v3410_v44 = vpop.f32.mrf.mxu1  ;;  %v3653_v19 = vpop.f32.mrf.mxu3 }
 0x6bb   :  { %3899 = vperm.xlu0 %5729, %v8127_v32   ;;  %v3411_v47 = vadd.f32 %v3410_v44, %v3322_v45  ;;  %v3544_v15 = vmax.f32 %v3498_v28, 0.0  ;;  %v8141_v37 = vmax.f32 %v3653_v19, 0.0  ;;  %v3337_v44 = vadd.f32 %v8037_v53, %v3336_v33  ;;  %v3339_v56 = vpop.f32.mrf.mxu0 }
 0x6bc   :  { %v3340_v19 = vadd.f32 %v8037_v53, %v3339_v56 }
 0x6bd   :  { %v3763_v41 = vmul.f32 %v8111_v54, %v8141_v37 }
 0x6bf   :  { %3904 = vperm.xlu2 %5728, %v8132_v4  }
 0x6c0   :  { %v3499_v63 = vpop.f32.mrf.mxu2 }
 0x6c1   :  { %v3500_v46 = vadd.f32 %v3499_v63, %v3411_v47 }
 0x6c2   :  { %v3413_v31 = vpop.f32.mrf.mxu1  ;;  %v3655_v51 = vpop.f32.mrf.mxu3 }
 0x6c3   :  { %v3545_v49 = vmax.f32 %v3500_v46, 0.0  ;;  %v3414_v40 = vadd.f32 %v3413_v31, %v3325_v59  ;;  %5734 = vset.pattern.permute.xlu0 %v8820_v0  ;;  %v8157_v59 = vmax.f32 %v3655_v51, 0.0 }
 0x6c5   :  { %v3565_v27 = vpack.c.bf16 %v3545_v49, %v3544_v15 }
 0x6c7   :  { %3697 = vmatmul.bf16.gmra.mxu3 %v3565_v27  ;;  %3795 = vadd.xlane.f32.xlu1 %v3761_v22  ;;  %v3341_v27 = vpop.f32.mrf.mxu0 }
 0x6c8   :  { %v3502_v52 = vpop.f32.mrf.mxu2 }
 0x6c9   :  { %v3503_v26 = vadd.f32 %v3502_v52, %v3414_v40  ;;  %v3342_v52 = vadd.f32 %v8037_v53, %v3341_v27  ;;  %v3764_v53 = vmul.f32 %v8111_v54, %v8157_v59  ;;  %v4309_v27 = vld [vmem:[%s8786_s12 + $0x30] sm:$0xff] }
 0x6ca   :  { %v3415_v62 = vpop.f32.mrf.mxu1  ;;  %v3658_v43 = vpop.f32.mrf.mxu3 }
 0x6cb   :  { %v3416_v10 = vadd.f32 %v3415_v62, %v3327_v17  ;;  %v3546_v2 = vmax.f32 %v3503_v26, 0.0 }
 0x6d0   :  { %v3504_v13 = vpop.f32.mrf.mxu2 }
 0x6d1   :  { %v3505_v20 = vadd.f32 %v3504_v13, %v3416_v10 }
 0x6d2   :  { %v3418_v16 = vpop.f32.mrf.mxu1  ;;  %v3660_v58 = vpop.f32.mrf.mxu3 }
 0x6d3   :  { %v3547_v23 = vmax.f32 %v3505_v20, 0.0  ;;  %v3419_v24 = vadd.f32 %v3418_v16, %v3330_v9  ;;  %v8149_v18 = vmax.f32 %v3660_v58, 0.0 }
 0x6d5   :  { %v3566_v34 = vpack.c.bf16 %v3547_v23, %v3546_v2  ;;  %v3766_v29 = vmul.f32 %v8111_v54, %v8149_v18  ;;  %v3729_v23 = vmax.f32 %v3658_v43, 0.0 }
 0x6d7   :  { %3702 = vmatmul.bf16.gmra.mxu3 %v3566_v34  ;;  %v3765_v43 = vmul.f32 %v8111_v54, %v3729_v23 }
 0x6d8   :  { %v3507_v25 = vpop.f32.mrf.mxu2 }
 0x6d9   :  { %v3508_v11 = vadd.f32 %v3507_v25, %v3419_v24 }
 0x6da   :  { %v3420_v30 = vpop.f32.mrf.mxu1  ;;  %v3663_v22 = vpop.f32.mrf.mxu3 }
 0x6db   :  { %v3421_v38 = vadd.f32 %v3420_v30, %v3332_v14  ;;  %v3548_v8 = vmax.f32 %v3508_v11, 0.0  ;;  %v3731_v17 = vmax.f32 %v3663_v22, 0.0 }
 0x6dd   :  { %v3767_v24 = vmul.f32 %v8111_v54, %v3731_v17 }
 0x6e0   :  { %v3509_v7 = vpop.f32.mrf.mxu2  ;;  %3909 = vperm.xlu1 %5727, %v8141_v37  }
 0x6e1   :  { %v3510_v60 = vadd.f32 %v3509_v7, %v3421_v38 }
 0x6e2   :  { %v3423_v39 = vpop.f32.mrf.mxu1  ;;  %v3665_v16 = vpop.f32.mrf.mxu3 }
 0x6e3   :  { %v3549_v55 = vmax.f32 %v3510_v60, 0.0  ;;  %v3424_v57 = vadd.f32 %v3423_v39, %v3335_v61  ;;  %v3732_v34 = vmax.f32 %v3665_v16, 0.0 }
 0x6e5   :  { %v3567_v21 = vpack.c.bf16 %v3549_v55, %v3548_v8  ;;  %3799 = vadd.xlane.f32.xlu0 %v3763_v41  ;;  %v3768_v8 = vmul.f32 %v8111_v54, %v3732_v34 }
 0x6e7   :  { %3707 = vmatmul.bf16.gmra.mxu3 %v3567_v21 }
 0x6e8   :  { %v3512_v3 = vpop.f32.mrf.mxu2  ;;  %3797 = vadd.xlane.f32.xlu2 %v3762_v6 }
 0x6e9   :  { %v3513_v45 = vadd.f32 %v3512_v3, %v3424_v57  ;;  %v4085_v57 = vld [vmem:[%s8784_s11 + $0x30] sm:$0xff] }
 0x6ea   :  { %v3425_v42 = vpop.f32.mrf.mxu1  ;;  %v3668_v51 = vpop.f32.mrf.mxu3 }
 0x6eb   :  { %v3426_v36 = vadd.f32 %v3425_v42, %v3337_v44  ;;  %v3550_v46 = vmax.f32 %v3513_v45, 0.0  ;;  %v3733_v25 = vmax.f32 %v3668_v51, 0.0  ;;  %v4318_v51 = vld [vmem:[%s8786_s12 + $0x78] sm:$0xff] }
 0x6ed   :  { %3805 = vadd.xlane.f32.xlu0 %v3766_v29  ;;  %v3769_v30 = vmul.f32 %v8111_v54, %v3733_v25 }
 0x6f0   :  { %v3514_v28 = vpop.f32.mrf.mxu2 }
 0x6f1   :  { %v3515_v47 = vadd.f32 %v3514_v28, %v3426_v36  ;;  %v3861_v36 = vld [vmem:[%s8785_s10 + $0x30] sm:$0xff] }
 0x6f2   :  { %v3428_v63 = vpop.f32.mrf.mxu1  ;;  %v3670_v9 = vpop.f32.mrf.mxu3 }
 0x6f3   :  { %v3551_v31 = vmax.f32 %v3515_v47, 0.0  ;;  %v3429_v62 = vadd.f32 %v3428_v63, %v3340_v19  ;;  %v3734_v60 = vmax.f32 %v3670_v9, 0.0 }
 0x6f5   :  { %v3568_v15 = vpack.c.bf16 %v3551_v31, %v3550_v46 }
 0x6f7   :  { %3712 = vmatmul.bf16.gmra.mxu3 %v3568_v15  ;;  %v3770_v15 = vmul.f32 %v8111_v54, %v3734_v60 }
 0x6f8   :  { %v3517_v49 = vpop.f32.mrf.mxu2 }
 0x6f9   :  { %v3518_v40 = vadd.f32 %v3517_v49, %v3429_v62  ;;  %v4086_v62 = vld [vmem:[%s8784_s11 + $0x38] sm:$0xff] }
 0x6fa   :  { %v3430_v48 = vpop.f32.mrf.mxu1  ;;  %v3673_v12 = vpop.f32.mrf.mxu3 }
 0x6fb   :  { %v3431_v26 = vadd.f32 %v3430_v48, %v3342_v52  ;;  %v3552_v20 = vmax.f32 %v3518_v40, 0.0  ;;  %v8173_v14 = vmax.f32 %v3673_v12, 0.0  ;;  %v3862_v40 = vld [vmem:[%s8785_s10 + $0x38] sm:$0xff] }
 0x700   :  { %v3519_v10 = vpop.f32.mrf.mxu2  ;;  %3914 = vperm.xlu2 %5728, %v8157_v59  }
 0x701   :  { %v3520_v13 = vadd.f32 %v3519_v10, %v3431_v26  ;;  %4144 = vperm.xlu0 %5734, %v3731_v17   ;;  %v4310_v26 = vld [vmem:[%s8786_s12 + $0x38] sm:$0xff] }
 0x702   :  { %v3675_v55 = vpop.f32.mrf.mxu3 }
 0x703   :  { %v3553_v5 = vmax.f32 %v3520_v13, 0.0  ;;  %v8193_v58 = vmax.f32 %v3675_v55, 0.0 }
 0x705   :  { %v3569_v2 = vpack.c.bf16 %v3553_v5, %v3552_v20  ;;  %v3772_v33 = vmul.f32 %v8111_v54, %v8193_v58 }
 0x707   :  { %3717 = vmatmul.bf16.gmra.mxu3 %v3569_v2 }
 0x708   :  { %5730 = vset.pattern.permute.xlu2 %v8820_v0 }
 0x709   :  { %4136 = vperm.xlu2 %5730, %v3729_v23   ;;  %5735 = vset.pattern.permute.xlu0 %v8818_v35 }
 0x70a   :  { %3801 = vadd.xlane.f32.xlu1 %v3764_v53  ;;  %3934 = vperm.xlu0 %5735, %v3732_v34   ;;  %v3678_v3 = vpop.f32.mrf.mxu3  ;;  %v4088_v53 = vld [vmem:[%s8784_s11 + $0x48] sm:$0xff] }
 0x70b   :  { %v3737_v12 = vmax.f32 %v3678_v3, 0.0 }
 0x70f   :  { %v8186_v7 = vpop.permute.xlu1 %3889 }
 0x710   :  { %8880 = vst [vmem:[#allocation4_spill] sm:$0xff] %v8186_v7  ;;  %v4089_v7 = vld [vmem:[%s8784_s11 + $0x50] sm:$0xff] }
 0x711   :  { %5731 = vset.pattern.permute.xlu2 %v8818_v35 }
 0x712   :  { %5738 = vset.pattern.permute.xlu0 %v8820_v0  ;;  %v8182_v11 = vpop.xlane.xlu2 %3791  ;;  %v3680_v44 = vpop.f32.mrf.mxu3 }
 0x713   :  { %4152 = vperm.xlu0 %5738, %v3733_v25   ;;  %8878 = vst [vmem:[#allocation2_spill] sm:$0xff] %v8182_v11  ;;  %v8215_v28 = vmax.f32 %v3680_v44, 0.0 }
 0x71a   :  { %v8184_v38 = vpop.permute.xlu2 %3894 }
 0x71b   :  { %5740 = vset.pattern.permute.xlu0 %v8818_v35  ;;  %8879 = vst [vmem:[#allocation3_spill] sm:$0xff] %v8184_v38 }
 0x722   :  { %v8188_v39 = vpop.permute.xlu2 %3904 }
 0x723   :  { %3919 = vperm.xlu1 %5727, %v3729_v23   ;;  %8881 = vst [vmem:[#allocation5_spill] sm:$0xff] %v8188_v39  ;;  %v3864_v23 = vld [vmem:[%s8785_s10 + $0x48] sm:$0xff] }
 0x72b   :  { %5732 = vset.pattern.permute.xlu1 %v8820_v0 }
 0x72c   :  { %4140 = vperm.xlu1 %5732, %v8149_v18  }
 0x732   :  { %3803 = vadd.xlane.f32.xlu2 %v3765_v43 }
 0x734   :  { %5733 = vset.pattern.permute.xlu1 %v8818_v35 }
 0x735   :  { %3929 = vperm.xlu1 %5733, %v3731_v17  }
 0x73a   :  { %v8191_v41 = vpop.xlane.xlu1 %3795 }
 0x73d   :  { %3811 = vadd.xlane.f32.xlu0 %v3769_v30 }
 0x74a   :  { %3924 = vperm.xlu2 %5731, %v8149_v18   ;;  %v8201_v18 = vpop.xlane.xlu0 %3793 }
 0x74b   :  { %8883 = vst [vmem:[#allocation7_spill] sm:$0xff] %v8201_v18  ;;  %v4316_v18 = vld [vmem:[%s8786_s12 + $0x68] sm:$0xff] }
 0x751   :  { %3949 = vperm.xlu0 %5740, %v8173_v14  }
 0x752   :  { %5736 = vset.pattern.permute.xlu2 %v8820_v0  ;;  %v8199_v6 = vpop.permute.xlu1 %3909  ;;  %v8207_v29 = vpop.permute.xlu0 %3899 }
 0x753   :  { %4148 = vperm.xlu2 %5736, %v3732_v34  }
 0x759   :  { %5741 = vset.pattern.permute.xlu0 %v8820_v0 }
 0x75a   :  { %4160 = vperm.xlu0 %5741, %v8173_v14   ;;  %v8217_v46 = vpop.xlane.xlu0 %3799 }
 0x75b   :  { %5737 = vset.pattern.permute.xlu2 %v8818_v35  ;;  %v8195_v21 = vpop.xlane.xlu2 %3797  ;;  %8884 = vst [vmem:[#allocation8_spill] sm:$0xff] %v8217_v46 }
 0x75c   :  { %8882 = vst [vmem:[#allocation6_spill] sm:$0xff] %v8195_v21 }
 0x75f   :  { %3807 = vadd.xlane.f32.xlu1 %v3767_v24  ;;  %v3683_v24 = vpop.f32.mrf.mxu3 }
 0x762   :  { %5745 = vset.pattern.permute.xlu0 %v8818_v35  ;;  %v3806_v49 = vpop.xlane.xlu0 %3805 }
 0x763   :  { %v8203_v42 = vpop.permute.xlu2 %3914  ;;  %v4342_v5 = vmul.f32 %v4310_v26, %v3806_v49 }
 0x76b   :  { %v4137_v45 = vpop.permute.xlu2 %4136 }
 0x76c   :  { %v4245_v47 = vmul.f32 %v4137_v45, %v4085_v57  ;;  %v4087_v45 = vld [vmem:[%s8784_s11 + $0x40] sm:$0xff] }
 0x773   :  { %v4145_v52 = vpop.permute.xlu0 %4144 }
 0x778   :  { %3944 = vperm.xlu1 %5733, %v3734_v60  }
 0x77c   :  { %3809 = vadd.xlane.f32.xlu2 %v3768_v8  ;;  %v3935_v34 = vpop.permute.xlu0 %3934  ;;  %v8253_v8 = vmax.f32 %v3683_v24, 0.0 }
 0x77d   :  { %v8205_v61 = vpop.xlane.xlu1 %3801  ;;  %v4056_v43 = vmul.f32 %v3935_v34, %v3864_v23 }
 0x77e   :  { %v3775_v55 = vmul.f32 %v8111_v54, %v8253_v8 }
 0x784   :  { %3817 = vadd.xlane.f32.xlu0 %v3772_v33  ;;  %v3685_v33 = vpop.f32.mrf.mxu3 }
 0x78c   :  { %v3688_v44 = vpop.f32.mrf.mxu3 }
 0x78d   :  { %v8258_v3 = vmax.f32 %v3688_v44, 0.0 }
 0x794   :  { %3939 = vperm.xlu2 %5737, %v3733_v25  }
 0x795   :  { %v3920_v56 = vpop.permute.xlu1 %3919 }
 0x796   :  { %v4053_v63 = vmul.f32 %v3920_v56, %v3861_v36  ;;  %v4311_v36 = vld [vmem:[%s8786_s12 + $0x40] sm:$0xff] }
 0x798   :  { %v4277_v31 = vadd.f32 %v4245_v47, %v4053_v63  ;;  %3964 = vperm.xlu0 %5745, %v8215_v28   ;;  %v3773_v63 = vmul.f32 %v8111_v54, %v3737_v12 }
 0x79c   :  { %5739 = vset.pattern.permute.xlu2 %v8820_v0 }
 0x79d   :  { %4156 = vperm.xlu2 %5739, %v3734_v60   ;;  %v3771_v60 = vmul.f32 %v8111_v54, %v8173_v14  ;;  %v3863_v14 = vld [vmem:[%s8785_s10 + $0x40] sm:$0xff] }
 0x79e   :  { %v4141_v17 = vpop.permute.xlu1 %4140 }
 0x79f   :  { %v4246_v13 = vmul.f32 %v4141_v17, %v4086_v62  ;;  %v3867_v17 = vld [vmem:[%s8785_s10 + $0x60] sm:$0xff] }
 0x7a0   :  { %5746 = vset.pattern.permute.xlu0 %v8820_v0 }
 0x7a1   :  { %4172 = vperm.xlu0 %5746, %v8215_v28  }
 0x7a2   :  { %3813 = vadd.xlane.f32.xlu1 %v3770_v15 }
 0x7a5   :  { %v3804_v22 = vpop.xlane.xlu2 %3803  ;;  %5742 = vset.pattern.permute.xlu2 %v8818_v35 }
 0x7a6   :  { %v4341_v19 = vmul.f32 %v4309_v27, %v3804_v22 }
 0x7a7   :  { %v3930_v57 = vpop.permute.xlu1 %3929 }
 0x7a8   :  { %v8228_v48 = vadd.f32 %v4341_v19, %v4277_v31  ;;  %v4055_v47 = vmul.f32 %v3930_v57, %v3863_v14  ;;  %v4247_v31 = vmul.f32 %v4145_v52, %v4087_v45 }
 0x7a9   :  { %5749 = vset.pattern.permute.xlu0 %v8818_v35 }
 0x7aa   :  { %v4279_v27 = vadd.f32 %v4247_v31, %v4055_v47 }
 0x7ad   :  { %v3925_v10 = vpop.permute.xlu2 %3924 }
 0x7ae   :  { %v4054_v20 = vmul.f32 %v3925_v10, %v3862_v40  ;;  %v3690_v40 = vpop.f32.mrf.mxu3  ;;  %v8286_v10 = vmax.f32 %v3685_v33, 0.0 }
 0x7af   :  { %v8284_v26 = vmax.f32 %v3690_v40, 0.0 }
 0x7b0   :  { %v4278_v16 = vadd.f32 %v4246_v13, %v4054_v20  ;;  %v3774_v20 = vmul.f32 %v8111_v54, %v8215_v28 }
 0x7b1   :  { %v3778_v52 = vmul.f32 %v8111_v54, %v8284_v26 }
 0x7b2   :  { %v8240_v2 = vadd.f32 %v4342_v5, %v4278_v16 }
 0x7b5   :  { %v4149_v25 = vpop.permute.xlu2 %4148 }
 0x7b6   :  { %v4248_v30 = vmul.f32 %v4149_v25, %v4088_v53  ;;  %v3693_v13 = vpop.f32.mrf.mxu3  ;;  %v3776_v53 = vmul.f32 %v8111_v54, %v8286_v10  ;;  %v8305_v25 = vpop.permute.xlu0 %4152 }
 0x7b7   :  { %v8303_v28 = vmax.f32 %v3693_v13, 0.0  ;;  %v4092_v13 = vld [vmem:[%s8784_s11 + $0x68] sm:$0xff] }
 0x7b8   :  { %v4280_v9 = vadd.f32 %v4248_v30, %v4056_v43 }
 0x7b9   :  { %v3779_v31 = vmul.f32 %v8111_v54, %v8303_v28 }
 0x7bb   :  { %3959 = vperm.xlu1 %5733, %v3737_v12  }
 0x7be   :  { %v3695_v5 = vpop.f32.mrf.mxu3 }
 0x7bf   :  { %v8293_v16 = vmax.f32 %v3695_v5, 0.0  ;;  %v3869_v5 = vld [vmem:[%s8785_s10 + $0x70] sm:$0xff] }
 0x7c3   :  { %5744 = vset.pattern.permute.xlu1 %v8820_v0 }
 0x7c4   :  { %4168 = vperm.xlu1 %5744, %v3737_v12   ;;  %v8314_v12 = vpop.xlane.xlu0 %3811 }
 0x7c6   :  { %3815 = vadd.xlane.f32.xlu2 %v3771_v60  ;;  %v3698_v23 = vpop.f32.mrf.mxu3 }
 0x7c7   :  { %v8296_v34 = vmax.f32 %v3698_v23, 0.0  ;;  %v3868_v23 = vld [vmem:[%s8785_s10 + $0x68] sm:$0xff] }
 0x7c9   :  { %v3781_v30 = vmul.f32 %v8111_v54, %v8296_v34 }
 0x7cb   :  { %3823 = vadd.xlane.f32.xlu0 %v3775_v55 }
 0x7cc   :  { %5748 = vset.pattern.permute.xlu1 %v8818_v35  ;;  %v3950_v55 = vpop.permute.xlu0 %3949 }
 0x7ce   :  { %v8308_v43 = vpop.f32.mrf.mxu3 }
 0x7d2   :  { %v3808_v56 = vpop.xlane.xlu1 %3807 }
 0x7d3   :  { %v4343_v15 = vmul.f32 %v4311_v36, %v3808_v56 }
 0x7d4   :  { %v4161_v45 = vpop.permute.xlu0 %4160 }
 0x7d5   :  { %v8278_v19 = vadd.f32 %v4343_v15, %v4279_v27 }
 0x7d6   :  { %v8316_v24 = vpop.f32.mrf.mxu3 }
 0x7de   :  { %3954 = vperm.xlu2 %5742, %v8193_v58   ;;  %v3705_v44 = vpop.f32.mrf.mxu3 }
 0x7df   :  { %3979 = vperm.xlu0 %5749, %v8258_v3   ;;  %v8318_v14 = vmax.f32 %v3705_v44, 0.0 }
 0x7e6   :  { %5743 = vset.pattern.permute.xlu2 %v8820_v0 }
 0x7e7   :  { %4164 = vperm.xlu2 %5743, %v8193_v58   ;;  %v4312_v58 = vld [vmem:[%s8786_s12 + $0x48] sm:$0xff] }
 0x7ea   :  { %v3945_v33 = vpop.permute.xlu1 %3944 }
 0x7ee   :  { %3819 = vadd.xlane.f32.xlu1 %v3773_v63 }
 0x7ef   :  { %v3810_v49 = vpop.xlane.xlu2 %3809  ;;  %5747 = vset.pattern.permute.xlu2 %v8818_v35 }
 0x7f0   :  { %v4344_v22 = vmul.f32 %v4312_v58, %v3810_v49 }
 0x7f2   :  { %v8280_v62 = vadd.f32 %v4344_v22, %v4280_v9  ;;  %v3777_v9 = vmul.f32 %v8111_v54, %v8258_v3  ;;  %v4094_v22 = vld [vmem:[%s8784_s11 + $0x78] sm:$0xff] }
 0x7f7   :  { %v3940_v60 = vpop.permute.xlu2 %3939  ;;  %v3818_v47 = vpop.xlane.xlu0 %3817 }
 0x7ff   :  { %v4157_v57 = vpop.permute.xlu2 %4156 }
 0x807   :  { %3974 = vperm.xlu1 %5748, %v8286_v10  }
 0x809   :  { %3829 = vadd.xlane.f32.xlu0 %v3778_v52  ;;  %v4093_v52 = vld [vmem:[%s8784_s11 + $0x70] sm:$0xff] }
 0x80a   :  { %v3965_v15 = vpop.permute.xlu0 %3964 }
 0x810   :  { %3821 = vadd.xlane.f32.xlu2 %v3774_v20  ;;  %v3870_v20 = vld [vmem:[%s8785_s10 + $0x78] sm:$0xff] }
 0x811   :  { %v4062_v38 = vmul.f32 %v3965_v15, %v3870_v20 }
 0x813   :  { %v4173_v40 = vpop.permute.xlu0 %4172 }
 0x814   :  { %v4254_v44 = vmul.f32 %v4173_v40, %v4094_v22 }
 0x815   :  { %v3814_v36 = vpop.xlane.xlu1 %3813 }
 0x816   :  { %v4286_v21 = vadd.f32 %v4254_v44, %v4062_v38  ;;  %v4249_v38 = vmul.f32 %v8305_v25, %v4089_v7  ;;  %v3784_v7 = vmul.f32 %v8111_v54, %v8318_v14 }
 0x81d   :  { %3994 = vperm.xlu0 %5749, %v8293_v16  }
 0x825   :  { %5750 = vset.pattern.permute.xlu0 %v8820_v0  ;;  %v3865_v0 = vld [vmem:[%s8785_s10 + $0x50] sm:$0xff] }
 0x826   :  { %4200 = vperm.xlu0 %5750, %v8296_v34   ;;  %v4057_v20 = vmul.f32 %v3940_v60, %v3865_v0  ;;  %v4313_v0 = vld [vmem:[%s8786_s12 + $0x50] sm:$0xff] }
 0x828   :  { %3969 = vperm.xlu2 %5747, %v8253_v8  }
 0x82d   :  { %v3960_v63 = vpop.permute.xlu1 %3959 }
 0x82e   :  { %v4061_v22 = vmul.f32 %v3960_v63, %v3869_v5  ;;  %v4348_v5 = vmul.f32 %v4316_v18, %v3818_v47  ;;  %v4281_v18 = vadd.f32 %v4249_v38, %v4057_v20  ;;  %v8885_v47 = vmov 1  }
 0x831   :  { %3825 = vadd.xlane.f32.xlu1 %v3776_v53  ;;  %v4317_v53 = vld [vmem:[%s8786_s12 + $0x70] sm:$0xff] }
 0x836   :  { %v4169_v49 = vpop.permute.xlu1 %4168 }
 0x839   :  { %v3816_v56 = vpop.xlane.xlu2 %3815 }
 0x841   :  { %v3955_v58 = vpop.permute.xlu2 %3954 }
 0x849   :  { %v4165_v27 = vpop.permute.xlu2 %4164 }
 0x84a   :  { %3989 = vperm.xlu1 %5748, %v8303_v28   ;;  %v4252_v35 = vmul.f32 %v4165_v27, %v4092_v13  ;;  %v4315_v13 = vld [vmem:[%s8786_s12 + $0x60] sm:$0xff] }
 0x850   :  { %3835 = vadd.xlane.f32.xlu0 %v3781_v30 }
 0x851   :  { %3827 = vadd.xlane.f32.xlu2 %v3777_v9  ;;  %v4091_v9 = vld [vmem:[%s8784_s11 + $0x60] sm:$0xff] }
 0x852   :  { %v4251_v40 = vmul.f32 %v4161_v45, %v4091_v9  ;;  %v3866_v45 = vld [vmem:[%s8785_s10 + $0x58] sm:$0xff] }
 0x861   :  { %v3820_v30 = vpop.xlane.xlu1 %3819 }
 0x862   :  { %v4349_v27 = vmul.f32 %v4317_v53, %v3820_v30  ;;  %v4347_v30 = vmul.f32 %v4315_v13, %v3816_v56 }
 0x864   :  { %4212 = vperm.xlu0 %5750, %v8318_v14  }
 0x869   :  { %3984 = vperm.xlu2 %5747, %v8284_v26  }
 0x874   :  { %3831 = vadd.xlane.f32.xlu1 %v3779_v31  ;;  %v4253_v31 = vmul.f32 %v4169_v49, %v4093_v52  ;;  %v4060_v49 = vmul.f32 %v3955_v58, %v3868_v23  ;;  %v4090_v52 = vld [vmem:[%s8784_s11 + $0x58] sm:$0xff]  ;;  %v4059_v58 = vmul.f32 %v3950_v55, %v3867_v17 }
 0x875   :  { %v4314_v23 = vld [vmem:[%s8786_s12 + $0x58] sm:$0xff]  ;;  %v4250_v53 = vmul.f32 %v4157_v57, %v4090_v52  ;;  %v3746_v57 = vmax.f32 %v8308_v43, 0.0  ;;  %v8886_v43 = vpack.c.bf16 %v8280_v62, %v8278_v19  ;;  %v3747_v19 = vmax.f32 %v8316_v24, 0.0  ;;  %v8410_v24 = vpop.xlane.xlu0 %3823 }
 0x876   :  { %v4285_v39 = vadd.f32 %v4253_v31, %v4061_v22  ;;  %v4284_v15 = vadd.f32 %v4252_v35, %v4060_v49  ;;  %v4283_v44 = vadd.f32 %v4251_v40, %v4059_v58  ;;  %v4058_v35 = vmul.f32 %v3945_v33, %v3866_v45 }
 0x877   :  { %v3780_v33 = vmul.f32 %v8111_v54, %v8293_v16  ;;  %v3782_v49 = vmul.f32 %v8111_v54, %v3746_v57  ;;  %v8888_v62 = vmov 0   ;;  %v3783_v13 = vmul.f32 %v8111_v54, %v3747_v19 }
 0x878   :  { %v4381_v9 = vadd.f32 %v4349_v27, %v4285_v39  ;;  %v4282_v60 = vadd.f32 %v4250_v53, %v4058_v35  ;;  %v4379_v55 = vadd.f32 %v4347_v30, %v4283_v44  ;;  %v4345_v39 = vmul.f32 %v4313_v0, %v8314_v12 }
 0x879   :  { %v8887_v12 = vpack.c.bf16 %v8240_v2, %v8228_v48  ;;  %v8423_v45 = vpop.permute.xlu1 %3974 }
 0x87a   :  { %v4377_v25 = vadd.f32 %v4345_v39, %v4281_v18  ;;  %v3878_v39 = vld [vmem:[%s8785_s10 + $0xb8] sm:$0xff] }
 0x883   :  { %v3822_v11 = vpop.xlane.xlu2 %3821 }
 0x884   :  { %v4350_v63 = vmul.f32 %v4318_v51, %v3822_v11  ;;  %v4346_v11 = vmul.f32 %v4314_v23, %v3814_v36  ;;  %v4380_v51 = vadd.f32 %v4348_v5, %v4284_v15  ;;  %v3708_v36 = vpop.f32.mrf.mxu3 }
 0x885   :  { %v3749_v52 = vmax.f32 %v3708_v36, 0.0 }
 0x886   :  { %v4382_v46 = vadd.f32 %v4350_v63, %v4286_v21  ;;  %v4378_v21 = vadd.f32 %v4346_v11, %v4282_v60  ;;  %v4407_v56 = vpack.c.bf16 %v4380_v51, %v4379_v55  ;;  %v3877_v11 = vld [vmem:[%s8785_s10 + $0xb0] sm:$0xff] }
 0x888   :  { %v4408_v17 = vpack.c.bf16 %v4382_v46, %v4381_v9  ;;  %v4406_v46 = vpack.c.bf16 %v4378_v21, %v4377_v25 }
 0x88a   :  { %4427 = vmatpush.bf16.msra.mxu0 %v4408_v17 }
 0x88b   :  { %v8420_v58 = vpop.permute.xlu2 %3969 }
 0x88c   :  { %v3710_v31 = vpop.f32.mrf.mxu3 }
 0x88d   :  { %4004 = vperm.xlu1 %5748, %v3746_v57   ;;  %v8392_v22 = vmax.f32 %v3710_v31, 0.0  ;;  %v4326_v31 = vld [vmem:[%s8786_s12 + $0xb8] sm:$0xff] }
 0x88e   :  { %4428 = vmatpush.bf16.msra.mxu0 %v4407_v56  ;;  %3841 = vadd.xlane.f32.xlu0 %v3784_v7  ;;  %v4102_v56 = vld [vmem:[%s8784_s11 + $0xb8] sm:$0xff] }
 0x892   :  { %4429 = vmatpush.bf16.msra.mxu0 %v4406_v46  ;;  %3833 = vadd.xlane.f32.xlu2 %v3780_v33 }
 0x894   :  { %v3713_v48 = vpop.f32.mrf.mxu3 }
 0x895   :  { %5753 = vset.pattern.permute.xlu1 %v8885_v47  ;;  %v8400_v2 = vmax.f32 %v3713_v48, 0.0 }
 0x896   :  { %4430 = vmatpush.bf16.msra.mxu0 %v8886_v43  ;;  %v3786_v43 = vmul.f32 %v8111_v54, %v8392_v22 }
 0x897   :  { %v3787_v27 = vmul.f32 %v8111_v54, %v8400_v2 }
 0x89a   :  { %4431 = vmatpush.bf16.msra.mxu0 %v8887_v12 }
 0x8a2   :  { %4220 = vperm.xlu0 %5750, %v8392_v22  }
 0x8a4   :  { %v8433_v53 = vpop.xlane.xlu1 %3825 }
 0x8aa   :  { %3999 = vperm.xlu2 %5747, %v8296_v34   ;;  %v3715_v34 = vpop.f32.mrf.mxu3 }
 0x8ab   :  { %v8406_v40 = vmax.f32 %v3715_v34, 0.0 }
 0x8b2   :  { %5751 = vset.pattern.permute.xlu2 %v8885_v47  ;;  %v3718_v15 = vpop.f32.mrf.mxu3 }
 0x8b3   :  { %4204 = vperm.xlu2 %5751, %v3746_v57   ;;  %v8413_v63 = vmax.f32 %v3718_v15, 0.0  ;;  %v4103_v15 = vld [vmem:[%s8784_s11 + $0xc0] sm:$0xff] }
 0x8b7   :  { %3837 = vadd.xlane.f32.xlu1 %v3782_v49 }
 0x8ba   :  { %v3720_v36 = vpop.f32.mrf.mxu3 }
 0x8bb   :  { %5752 = vset.pattern.permute.xlu2 %v8888_v62  ;;  %v8465_v12 = vmax.f32 %v3720_v36, 0.0 }
 0x8bc   :  { %4009 = vperm.xlu2 %5752, %v3747_v19   ;;  %v8438_v9 = vpop.permute.xlu1 %3989 }
 0x8c4   :  { %v8428_v5 = vpop.xlane.xlu2 %3827 }
 0x8cc   :  { %3847 = vadd.xlane.f32.xlu0 %v3787_v27  ;;  %v8435_v30 = vpop.permute.xlu2 %3984 }
 0x8d0   :  { %4208 = vperm.xlu1 %5753, %v3747_v19   ;;  %v3790_v19 = vmul.f32 %v8111_v54, %v8465_v12 }
 0x8d8   :  { %5754 = vset.pattern.permute.xlu1 %v8888_v62 }
 0x8d9   :  { %4014 = vperm.xlu1 %5754, %v8318_v14   ;;  %v8418_v14 = vpop.permute.xlu0 %3979 }
 0x8e0   :  { %4228 = vperm.xlu0 %5750, %v8406_v40  }
 0x8e1   :  { %5755 = vset.pattern.permute.xlu1 %v8885_v47  ;;  %v8426_v20 = vpop.xlane.xlu0 %3829 }
 0x8e2   :  { %4216 = vperm.xlu1 %5755, %v3749_v52  }
 0x8e5   :  { %3839 = vadd.xlane.f32.xlu2 %v3783_v13 }
 0x8e7   :  { %v8446_v35 = vpop.xlane.xlu1 %3831 }
 0x8e8   :  { %5759 = vset.pattern.permute.xlu0 %v8888_v62 }
 0x8e9   :  { %4039 = vperm.xlu0 %5759, %v8413_v63   ;;  %v8431_v23 = vpop.permute.xlu0 %3994 }
 0x8ea   :  { %5756 = vset.pattern.permute.xlu1 %v8888_v62 }
 0x8f1   :  { %5763 = vset.pattern.permute.xlu0 %v8885_v47  ;;  %v4201_v38 = vpop.permute.xlu0 %4200 }
 0x8f2   :  { %4132 = vperm.xlu0 %5763, %v8157_v59   ;;  %v3785_v59 = vmul.f32 %v8111_v54, %v3749_v52  ;;  %v3879_v54 = vld [vmem:[%s8785_s10 + $0xc0] sm:$0xff] }
 0x8f9   :  { %v3836_v51 = vpop.xlane.xlu0 %3835 }
 0x8fa   :  { %4120 = vperm.xlu0 %5763, %v8127_v32   ;;  %v4101_v32 = vld [vmem:[%s8784_s11 + $0xb0] sm:$0xff] }
 0x8fb   :  { %v4261_v0 = vmul.f32 %v4201_v38, %v4101_v32 }
 0x8fd   :  { %4019 = vperm.xlu2 %5752, %v3749_v52  }
 0x8ff   :  { %v4005_v21 = vpop.permute.xlu1 %4004 }
 0x900   :  { %v4070_v25 = vmul.f32 %v4005_v21, %v3878_v39 }
 0x901   :  { %v4213_v34 = vpop.permute.xlu0 %4212 }
 0x902   :  { %4188 = vperm.xlu0 %5763, %v8284_v26   ;;  %v4325_v26 = vld [vmem:[%s8786_s12 + $0xb0] sm:$0xff] }
 0x903   :  { %v4357_v60 = vmul.f32 %v4325_v26, %v3836_v51 }
 0x905   :  { %v8440_v44 = vpop.xlane.xlu2 %3833 }
 0x909   :  { %v3842_v52 = vpop.xlane.xlu0 %3841 }
 0x90c   :  { %3843 = vadd.xlane.f32.xlu1 %v3785_v59 }
 0x90d   :  { %v4000_v17 = vpop.permute.xlu2 %3999 }
 0x90e   :  { %v4069_v18 = vmul.f32 %v4000_v17, %v3877_v11  ;;  %v4328_v17 = vld [vmem:[%s8786_s12 + $0xc8] sm:$0xff] }
 0x910   :  { %v4293_v55 = vadd.f32 %v4261_v0, %v4069_v18 }
 0x912   :  { %v8454_v57 = vadd.f32 %v4357_v60, %v4293_v55  ;;  %v4360_v55 = vmul.f32 %v4328_v17, %v3842_v52 }
 0x914   :  { %v8489_v38 = vpop.permute.xlu0 %4220 }
 0x915   :  { %v4205_v7 = vpop.permute.xlu2 %4204 }
 0x916   :  { %v4262_v46 = vmul.f32 %v4205_v7, %v4102_v56  ;;  %v4327_v7 = vld [vmem:[%s8786_s12 + $0xc0] sm:$0xff] }
 0x918   :  { %v4294_v33 = vadd.f32 %v4262_v46, %v4070_v25 }
 0x91d   :  { %v4010_v13 = vpop.permute.xlu2 %4009 }
 0x91e   :  { %v4071_v32 = vmul.f32 %v4010_v13, %v3879_v54 }
 0x925   :  { %4024 = vperm.xlu1 %5756, %v8392_v22  }
 0x926   :  { %3845 = vadd.xlane.f32.xlu2 %v3786_v43 }
 0x92a   :  { %v3838_v49 = vpop.xlane.xlu1 %3837 }
 0x92b   :  { %v4358_v48 = vmul.f32 %v4326_v31, %v3838_v49  ;;  %v3860_v49 = vld [vmem:[%s8785_s10 + $0x28] sm:$0xff] }
 0x92c   :  { %3853 = vadd.xlane.f32.xlu0 %v3790_v19  ;;  %v4084_v19 = vld [vmem:[%s8784_s11 + $0x28] sm:$0xff]  ;;  %v4052_v52 = vmul.f32 %v8203_v42, %v3860_v49 }
 0x92d   :  { %v8472_v27 = vadd.f32 %v4358_v48, %v4294_v33  ;;  %5757 = vset.pattern.permute.xlu1 %v8885_v47  ;;  %v4308_v48 = vld [vmem:[%s8786_s12 + $0x28] sm:$0xff] }
 0x92e   :  { %4224 = vperm.xlu1 %5757, %v8400_v2   ;;  %v4340_v13 = vmul.f32 %v4308_v48, %v8205_v61 }
 0x92f   :  { %v4412_v22 = vpack.c.bf16 %v8472_v27, %v8454_v57  ;;  %v3856_v57 = vld [vmem:[%s8785_s10 + $0x8] sm:$0xff] }
 0x930   :  { %v4320_v27 = vld [vmem:[%s8786_s12 + $0x88] sm:$0xff] }
 0x936   :  { %5758 = vset.pattern.permute.xlu1 %v8888_v62 }
 0x937   :  { %4034 = vperm.xlu1 %5758, %v8406_v40  }
 0x93e   :  { %4029 = vperm.xlu2 %5752, %v8400_v2   ;;  %v4104_v2 = vld [vmem:[%s8784_s11 + $0xc8] sm:$0xff] }
 0x93f   :  { %5762 = vset.pattern.permute.xlu1 %v8885_v47  ;;  %v8499_v51 = vpop.xlane.xlu0 %3847  ;;  %v4264_v18 = vmul.f32 %v4213_v34, %v4104_v2 }
 0x940   :  { %4176 = vperm.xlu0 %5763, %v8253_v8   ;;  %v3880_v8 = vld [vmem:[%s8785_s10 + $0xc8] sm:$0xff] }
 0x942   :  { %v4209_v59 = vpop.permute.xlu1 %4208 }
 0x943   :  { %v4263_v11 = vmul.f32 %v4209_v59, %v4103_v15  ;;  %v3857_v59 = vld [vmem:[%s8785_s10 + $0x10] sm:$0xff] }
 0x944   :  { %v4049_v42 = vmul.f32 %v8207_v29, %v3857_v59  ;;  %v4322_v29 = vld [vmem:[%s8786_s12 + $0x98] sm:$0xff] }
 0x945   :  { %v4295_v26 = vadd.f32 %v4263_v11, %v4071_v32  ;;  %v4081_v32 = vld [vmem:[%s8784_s11 + $0x10] sm:$0xff]  ;;  %v3886_v59 = vld [vmem:[%s8785_s10 + $0xf8] sm:$0xff] }
 0x946   :  { %5760 = vset.pattern.permute.xlu2 %v8885_v47  ;;  %v4305_v11 = vld [vmem:[%s8786_s12 + $0x10] sm:$0xff] }
 0x947   :  { %4232 = vperm.xlu2 %5760, %v8413_v63  }
 0x94b   :  { %v4015_v0 = vpop.permute.xlu1 %4014 }
 0x94c   :  { %v4072_v60 = vmul.f32 %v4015_v0, %v3880_v8  ;;  %v4337_v8 = vmul.f32 %v4305_v11, %v8191_v41  ;;  %v4333_v11 = vld [vmem:[%s8786_s12 + $0xf0] sm:$0xff] }
 0x94e   :  { %v4296_v39 = vadd.f32 %v4264_v18, %v4072_v60  ;;  %v3874_v18 = vld [vmem:[%s8785_s10 + $0x98] sm:$0xff] }
 0x94f   :  { %5761 = vset.pattern.permute.xlu2 %v8888_v62  ;;  %v5905_v62 = vld [vmem:[%s8783_s9] ss:$0 sm:$0xff]  ;;  %v4098_v60 = vld [vmem:[%s8784_s11 + $0x98] sm:$0xff] }
 0x950   :  { %v8505_v21 = vadd.f32 %v4360_v55, %v4296_v39  ;;  %v3788_v31 = vmul.f32 %v5905_v62, %v8406_v40  ;;  %v3789_v61 = vmul.f32 %v5905_v62, %v8413_v63  ;;  %v4066_v63 = vmul.f32 %v8435_v30, %v3874_v18  ;;  %v4334_v18 = vld [vmem:[%s8786_s12 + $0xf8] sm:$0xff] }
 0x951   :  { %v4354_v39 = vmul.f32 %v4322_v29, %v8426_v20  ;;  %v4332_v29 = vld [vmem:[%s8786_s12 + $0xe8] sm:$0xff] }
 0x952   :  { %v8507_v56 = vpop.permute.xlu0 %4228 }
 0x954   :  { %v8586_v30 = vpop.permute.xlu1 %4216 }
 0x958   :  { %v3840_v25 = vpop.xlane.xlu2 %3839 }
 0x959   :  { %v4359_v46 = vmul.f32 %v4327_v7, %v3840_v25 }
 0x95b   :  { %v8512_v33 = vadd.f32 %v4359_v46, %v4295_v26  ;;  %v8514_v36 = vpop.permute.xlu0 %4039 }
 0x95d   :  { %v4413_v43 = vpack.c.bf16 %v8505_v21, %v8512_v33 }
 0x961   :  { %3849 = vadd.xlane.f32.xlu1 %v3788_v31 }
 0x964   :  { %v4133_v34 = vpop.permute.xlu0 %4132 }
 0x965   :  { %v4244_v54 = vmul.f32 %v4133_v34, %v4084_v19 }
 0x967   :  { %v4276_v40 = vadd.f32 %v4244_v54, %v4052_v52 }
 0x969   :  { %v8533_v15 = vadd.f32 %v4340_v13, %v4276_v40  ;;  %v4107_v13 = vld [vmem:[%s8784_s11 + $0xe0] sm:$0xff] }
 0x96a   :  { %v3883_v40 = vld [vmem:[%s8785_s10 + $0xe0] sm:$0xff] }
 0x96c   :  { %v4121_v26 = vpop.permute.xlu0 %4120 }
 0x96d   :  { %v4241_v2 = vmul.f32 %v4121_v26, %v4081_v32  ;;  %v3884_v32 = vld [vmem:[%s8785_s10 + $0xe8] sm:$0xff]  ;;  %v4110_v26 = vld [vmem:[%s8784_s11 + $0xf8] sm:$0xff] }
 0x96f   :  { %v4273_v17 = vadd.f32 %v4241_v2, %v4049_v42  ;;  %v4108_v42 = vld [vmem:[%s8784_s11 + $0xe8] sm:$0xff]  ;;  %v3882_v2 = vld [vmem:[%s8785_s10 + $0xd8] sm:$0xff] }
 0x970   :  { %3851 = vadd.xlane.f32.xlu2 %v3789_v61 }
 0x971   :  { %v8547_v0 = vadd.f32 %v4337_v8, %v4273_v17 }
 0x974   :  { %v4189_v55 = vpop.permute.xlu0 %4188 }
 0x975   :  { %v4258_v41 = vmul.f32 %v4189_v55, %v4098_v60 }
 0x977   :  { %v4290_v7 = vadd.f32 %v4258_v41, %v4066_v63  ;;  %v4106_v41 = vld [vmem:[%s8784_s11 + $0xd8] sm:$0xff] }
 0x979   :  { %v8560_v25 = vadd.f32 %v4354_v39, %v4290_v7 }
 0x97a   :  { %4236 = vperm.xlu1 %5762, %v8465_v12  }
 0x97f   :  { %v8588_v46 = vpop.xlane.xlu1 %3843 }
 0x982   :  { %4128 = vperm.xlu1 %5762, %v8141_v37   ;;  %v3871_v37 = vld [vmem:[%s8785_s10 + $0x80] sm:$0xff] }
 0x988   :  { %4044 = vperm.xlu2 %5761, %v8465_v12   ;;  %v4020_v12 = vpop.permute.xlu2 %4019 }
 0x98a   :  { %4196 = vperm.xlu1 %5762, %v8293_v16   ;;  %v4095_v16 = vld [vmem:[%s8784_s11 + $0x80] sm:$0xff] }
 0x990   :  { %5764 = vset.pattern.permute.xlu2 %v8885_v47 }
 0x991   :  { %4192 = vperm.xlu2 %5764, %v8303_v28  }
 0x992   :  { %4184 = vperm.xlu1 %5762, %v8258_v3   ;;  %v4319_v3 = vld [vmem:[%s8786_s12 + $0x80] sm:$0xff] }
 0x997   :  { %v4025_v31 = vpop.permute.xlu1 %4024 }
 0x999   :  { %4124 = vperm.xlu2 %5764, %v8132_v4   ;;  %v3846_v62 = vpop.xlane.xlu2 %3845 }
 0x99a   :  { %4116 = vperm.xlu1 %5762, %v8120_v50   ;;  %v4063_v50 = vmul.f32 %v8420_v58, %v3871_v37  ;;  %v4109_v58 = vld [vmem:[%s8784_s11 + $0xf0] sm:$0xff] }
 0x99f   :  { %v3854_v20 = vpop.xlane.xlu0 %3853 }
 0x9a0   :  { %v4225_v19 = vpop.permute.xlu1 %4224 }
 0x9a1   :  { %4112 = vperm.xlu2 %5764, %v8114_v1   ;;  %v4351_v1 = vmul.f32 %v4319_v3, %v8410_v24  ;;  %v4030_v49 = vpop.permute.xlu2 %4029  ;;  %v3885_v24 = vld [vmem:[%s8785_s10 + $0xf0] sm:$0xff]  ;;  %v4267_v60 = vmul.f32 %v4225_v19, %v4107_v13  ;;  %v4074_v3 = vmul.f32 %v4025_v31, %v3882_v2  ;;  %v3875_v31 = vld [vmem:[%s8785_s10 + $0xa0] sm:$0xff] }
 0x9a2   :  { %v4077_v17 = vmul.f32 %v8514_v36, %v3885_v24  ;;  %v4075_v39 = vmul.f32 %v4030_v49, %v3883_v40  ;;  %v4268_v36 = vmul.f32 %v8507_v56, %v4108_v42  ;;  %v4266_v49 = vmul.f32 %v8489_v38, %v4106_v41  ;;  %v3859_v56 = vld [vmem:[%s8785_s10 + $0x20] sm:$0xff]  ;;  %v4329_v40 = vld [vmem:[%s8786_s12 + $0xd0] sm:$0xff] }
 0x9a3   :  { %v4099_v38 = vld [vmem:[%s8784_s11 + $0xa0] sm:$0xff]  ;;  %v8889_v41 = vld [vmem:[#allocation8_spill] sm:$0xff] }
 0x9a9   :  { %4180 = vperm.xlu2 %5764, %v8286_v10   ;;  %v4233_v48 = vpop.permute.xlu2 %4232  ;;  %v4035_v34 = vpop.permute.xlu1 %4034 }
 0x9aa   :  { %v4269_v61 = vmul.f32 %v4233_v48, %v4109_v58  ;;  %v4076_v7 = vmul.f32 %v4035_v34, %v3884_v32  ;;  %v4330_v48 = vld [vmem:[%s8786_s12 + $0xd8] sm:$0xff]  ;;  %v4299_v34 = vadd.f32 %v4267_v60, %v4075_v39  ;;  %v4105_v58 = vld [vmem:[%s8784_s11 + $0xd0] sm:$0xff]  ;;  %v4307_v32 = vld [vmem:[%s8786_s12 + $0x20] sm:$0xff] }
 0x9ab   :  { %v4265_v60 = vmul.f32 %v8586_v30, %v4105_v58  ;;  %v4339_v39 = vmul.f32 %v4307_v32, %v8889_v41  ;;  %v3873_v32 = vld [vmem:[%s8785_s10 + $0x90] sm:$0xff] }
 0x9b2   :  { %v4177_v4 = vpop.permute.xlu0 %4176 }
 0x9b3   :  { %v4255_v28 = vmul.f32 %v4177_v4, %v4095_v16  ;;  %v4331_v4 = vld [vmem:[%s8786_s12 + $0xe0] sm:$0xff] }
 0x9b5   :  { %v4287_v10 = vadd.f32 %v4255_v28, %v4063_v50  ;;  %v3881_v50 = vld [vmem:[%s8785_s10 + $0xd0] sm:$0xff]  ;;  %v4366_v28 = vmul.f32 %v4334_v18, %v3854_v20 }
 0x9b6   :  { %v4073_v13 = vmul.f32 %v4020_v12, %v3881_v50  ;;  %v4100_v50 = vld [vmem:[%s8784_s11 + $0xa8] sm:$0xff] }
 0x9b7   :  { %v8584_v47 = vadd.f32 %v4351_v1, %v4287_v10  ;;  %v4301_v1 = vadd.f32 %v4269_v61, %v4077_v17  ;;  %v4051_v61 = vmul.f32 %v8199_v6, %v3859_v56  ;;  %v4324_v56 = vld [vmem:[%s8786_s12 + $0xa8] sm:$0xff] }
 0x9b8   :  { %v4356_v58 = vmul.f32 %v4324_v56, %v8440_v44  ;;  %v4097_v44 = vld [vmem:[%s8784_s11 + $0x90] sm:$0xff] }
 0x9d4   :  { %v3850_v54 = vpop.xlane.xlu1 %3849 }
 0x9d5   :  { %v4364_v10 = vmul.f32 %v4332_v29, %v3850_v54  ;;  %v4363_v54 = vmul.f32 %v4331_v4, %v8499_v51  ;;  %v4323_v51 = vld [vmem:[%s8786_s12 + $0xa0] sm:$0xff]  ;;  %v4361_v29 = vmul.f32 %v4329_v40, %v8588_v46  ;;  %v4082_v46 = vld [vmem:[%s8784_s11 + $0x18] sm:$0xff] }
 0x9d6   :  { %v3855_v40 = vld [vmem:[%s8785_s10] sm:$0xff] }
 0x9e3   :  { %v3852_v52 = vpop.xlane.xlu2 %3851 }
 0x9e4   :  { %v4365_v37 = vmul.f32 %v4333_v11, %v3852_v52  ;;  %v4300_v52 = vadd.f32 %v4268_v36, %v4076_v7  ;;  %v4298_v11 = vadd.f32 %v4266_v49, %v4074_v3  ;;  %v8890_v49 = vld [vmem:[#allocation5_spill] sm:$0xff] }
 0x9e6   :  { %v4397_v20 = vadd.f32 %v4365_v37, %v4301_v1  ;;  %v4396_v42 = vadd.f32 %v4364_v10, %v4300_v52  ;;  %v4297_v37 = vadd.f32 %v4265_v60, %v4073_v13 }
 0x9e8   :  { %v4393_v30 = vadd.f32 %v4361_v29, %v4297_v37 }
 0x9eb   :  { %v4045_v8 = vpop.permute.xlu2 %4044 }
 0x9ec   :  { %v4078_v55 = vmul.f32 %v4045_v8, %v3886_v59  ;;  %v4237_v63 = vpop.permute.xlu1 %4236  ;;  %v4083_v59 = vld [vmem:[%s8784_s11 + $0x20] sm:$0xff]  ;;  %v4067_v8 = vmul.f32 %v8438_v9, %v3875_v31  ;;  %v3858_v9 = vld [vmem:[%s8785_s10 + $0x18] sm:$0xff] }
 0x9ed   :  { %v4270_v16 = vmul.f32 %v4237_v63, %v4110_v26  ;;  %v4362_v26 = vmul.f32 %v4330_v48, %v3846_v62  ;;  %v4355_v62 = vmul.f32 %v4323_v51, %v8446_v35  ;;  %v3876_v35 = vld [vmem:[%s8785_s10 + $0xa8] sm:$0xff]  ;;  %v4050_v48 = vmul.f32 %v8890_v49, %v3858_v9 }
 0x9ee   :  { %v4068_v52 = vmul.f32 %v8431_v23, %v3876_v35  ;;  %v4079_v23 = vld [vmem:[%s8784_s11] sm:$0xff]  ;;  %v4352_v9 = vmul.f32 %v4320_v27, %v8433_v53  ;;  %v5724_v53 = vld [vmem:[%s8787_s13 + $0x4] sm:$0xf0] }
 0x9ef   :  { %v4302_v19 = vadd.f32 %v4270_v16, %v4078_v55  ;;  %v4395_v55 = vadd.f32 %v4363_v54, %v4299_v34  ;;  %v4394_v16 = vadd.f32 %v4362_v26, %v4298_v11  ;;  %v4303_v11 = vld [vmem:[%s8786_s12] sm:$0xff] }
 0x9f1   :  { %v4398_v24 = vadd.f32 %v4366_v28, %v4302_v19  ;;  %v4415_v6 = vpack.c.bf16 %v4396_v42, %v4395_v55  ;;  %v4306_v28 = vld [vmem:[%s8786_s12 + $0x18] sm:$0xff]  ;;  %v4414_v19 = vpack.c.bf16 %v4394_v16, %v4393_v30  ;;  %v4321_v42 = vld [vmem:[%s8786_s12 + $0x90] sm:$0xff] }
 0x9f2   :  { %v4353_v60 = vmul.f32 %v4321_v42, %v8428_v5  ;;  %v4080_v5 = vld [vmem:[%s8784_s11 + $0x8] sm:$0xff] }
 0x9f3   :  { %v4416_v12 = vpack.c.bf16 %v4398_v24, %v4397_v20  ;;  %v4193_v2 = vpop.permute.xlu2 %4192  ;;  %v8891_v24 = vld [vmem:[#allocation6_spill] sm:$0xff] }
 0x9f4   :  { %v4259_v17 = vmul.f32 %v4193_v2, %v4099_v38  ;;  %v4129_v18 = vpop.permute.xlu1 %4128  ;;  %v4338_v38 = vmul.f32 %v4306_v28, %v8891_v24 }
 0x9f5   :  { %v4243_v63 = vmul.f32 %v4129_v18, %v4083_v59  ;;  %4441 = vmatpush.bf16.msra.mxu1 %v4416_v12 }
 0x9f6   :  { %v4291_v7 = vadd.f32 %v4259_v17, %v4067_v8 }
 0x9f7   :  { %v4275_v36 = vadd.f32 %v4243_v63, %v4051_v61  ;;  %v4065_v61 = vmul.f32 %v8418_v14, %v3873_v32  ;;  %v3872_v63 = vld [vmem:[%s8785_s10 + $0x88] sm:$0xff] }
 0x9f8   :  { %v4387_v3 = vadd.f32 %v4355_v62, %v4291_v7  ;;  %v4096_v14 = vld [vmem:[%s8784_s11 + $0x88] sm:$0xff]  ;;  %v4064_v7 = vmul.f32 %v8423_v45, %v3872_v63 }
 0x9f9   :  { %v4371_v4 = vadd.f32 %v4339_v39, %v4275_v36  ;;  %4442 = vmatpush.bf16.msra.mxu1 %v4415_v6  ;;  %v4304_v62 = vld [vmem:[%s8786_s12 + $0x8] sm:$0xff] }
 0x9fa   :  { %v8894_v36 = vld [vmem:[#allocation3_spill] sm:$0xff] }
 0x9fb   :  { %v4125_v1 = vpop.permute.xlu2 %4124  ;;  %v4403_v10 = vpack.c.bf16 %v8533_v15, %v4371_v4  ;;  %v4048_v6 = vmul.f32 %v8894_v36, %v3856_v57  ;;  %v8895_v4 = vld [vmem:[#allocation7_spill] sm:$0xff] }
 0x9fc   :  { %v4242_v31 = vmul.f32 %v4125_v1, %v4082_v46  ;;  %v4197_v34 = vpop.permute.xlu1 %4196  ;;  %v4336_v46 = vmul.f32 %v4304_v62, %v8895_v4  ;;  %v5477_v45 = vld [vmem:[%s8787_s13 + $0x8] sm:$0xf0]  ;;  %v5475_v1 = vld [vmem:[%s8787_s13] sm:$0xf] }
 0x9fd   :  { %v4260_v20 = vmul.f32 %v4197_v34, %v4100_v50  ;;  %4432 = vmatpush.bf16.msra.mxu0 %v4403_v10  ;;  %4443 = vmatpush.bf16.msra.mxu1 %v4414_v19 }
 0x9fe   :  { %v4274_v54 = vadd.f32 %v4242_v31, %v4050_v48  ;;  %v5476_v48 = vor.u32 %v5724_v53, %v5475_v1 }
 0x9ff   :  { %v4292_v15 = vadd.f32 %v4260_v20, %v4068_v52 }
 0xa00   :  { %v4370_v13 = vadd.f32 %v4338_v38, %v4274_v54 }
 0xa01   :  { %v4388_v59 = vadd.f32 %v4356_v58, %v4292_v15  ;;  %4444 = vmatpush.bf16.msra.mxu1 %v4413_v43  ;;  %v8892_v43 = vld [vmem:[#allocation4_spill] sm:$0xff] }
 0xa02   :  { %v4402_v51 = vpack.c.bf16 %v4370_v13, %v8547_v0  ;;  %v4047_v26 = vmul.f32 %v8892_v43, %v3855_v40  ;;  %v8893_v0 = vld [vmem:[#allocation2_spill] sm:$0xff]  ;;  %v4455_v40 = vlaneseq }
 0xa03   :  { %v4113_v21 = vpop.permute.xlu2 %4112  ;;  %v4411_v33 = vpack.c.bf16 %v4388_v59, %v4387_v3  ;;  %v4335_v17 = vmul.f32 %v4303_v11, %v8893_v0 }
 0xa04   :  { %v4239_v12 = vmul.f32 %v4113_v21, %v4079_v23  ;;  %v4185_v2 = vpop.permute.xlu1 %4184  ;;  %4433 = vmatpush.bf16.msra.mxu0 %v4402_v51 }
 0xa05   :  { %v4257_v8 = vmul.f32 %v4185_v2, %v4097_v44  ;;  %4445 = vmatpush.bf16.msra.mxu1 %v4412_v22  ;;  %v4456_v44 = vand.u32 127, %v4455_v40 }
 0xa06   :  { %v4271_v18 = vadd.f32 %v4239_v12, %v4047_v26 }
 0xa07   :  { %v4289_v29 = vadd.f32 %v4257_v8, %v4065_v61  ;;  %vm4464_vm3 = vcmp.lt.s32.totalorder %v4456_v44, 18  ;;  %vm4457_vm5 = vcmp.lt.s32.totalorder %v4456_v44, 2 }
 0xa08   :  { %v4367_v55 = vadd.f32 %v4335_v17, %v4271_v18 }
 0xa09   :  { %v4385_v41 = vadd.f32 %v4353_v60, %v4289_v29  ;;  %4446 = vmatpush.bf16.msra.mxu1 %v4411_v33  ;;  %v5768_v33 = vld [vmem:[%s8788_s15] ss:$0 sm:$0xff] }
 0xa0b   :  { %v4181_v22 = vpop.permute.xlu2 %4180  ;;  %v4410_v39 = vpack.c.bf16 %v8560_v25, %v4385_v41  ;;  %v5723_v25 = vld [vmem:[%s8787_s13 + $0x4] sm:$0xf] }
 0xa0c   :  { %v4256_v37 = vmul.f32 %v4181_v22, %v4096_v14  ;;  %v4117_v16 = vpop.permute.xlu1 %4116  ;;  %v5480_v49 = vor.u32 %v5723_v25, %v5477_v45 }
 0xa0d   :  { %v4240_v3 = vmul.f32 %v4117_v16, %v4080_v5  ;;  %4447 = vmatpush.bf16.msra.mxu1 %v4410_v39 }
 0xa0e   :  { %v4288_v30 = vadd.f32 %v4256_v37, %v4064_v7 }
 0xa0f   :  { %v4272_v35 = vadd.f32 %v4240_v3, %v4048_v6 }
 0xa10   :  { %v4384_v50 = vadd.f32 %v4352_v9, %v4288_v30 }
 0xa11   :  { %v4368_v28 = vadd.f32 %v4336_v46, %v4272_v35 }
 0xa12   :  { %v4409_v10 = vpack.c.bf16 %v4384_v50, %v8584_v47 }
 0xa13   :  { %v4401_v19 = vpack.c.bf16 %v4368_v28, %v4367_v55 }
 0xa14   :  { %4448 = vmatpush.bf16.msra.mxu1 %v4409_v10 }
 0xa15   :  { %4434 = vmatpush.bf16.msra.mxu0 %v4401_v19 }
 0xa17   :  { %4449 = vmatmul.bf16.vlgmr.msra.gmra.mxu1 %v5480_v49 }
 0xa18   :  { %4435 = vmatmul.bf16.vlgmr.msra.gmra.mxu0 %v5476_v48 }
 0xa94   :  { %v4450_v56 = vpop.f32.mrf.mxu1 }
 0xa95   :  { %v4436_v31 = vpop.f32.mrf.mxu0 }
 0xa96   :  { %v4451_v34 = vadd.f32 %v4450_v56, %v4436_v31 }
 0xa98   :  { %v5481_v52 = vmul.f32 -1.442695, %v4451_v34  ;;  %v4462_v61 = vadd.f32 %v5768_v33, %v4451_v34 }
 0xa9a   :  { %5897 = vpow2.f32 %v5481_v52 }
 0xa9c   :  { %v4452_v20 = vpop.f32.mrf.mxu1 }
 0xa9d   :  { %v4438_v24 = vpop.f32.mrf.mxu0 }
 0xa9e   :  { %v4453_v38 = vadd.f32 %v4452_v20, %v4438_v24 }
 0xaa0   :  { %v5898_v54 = vpop.eup %5897  ;;  %v5482_v58 = vmul.f32 -1.442695, %v4453_v38  ;;  %v4463_v57 = vadd.f32 %v5768_v33, %v4453_v38 }
 0xaa1   :  { %v4471_v15 = vadd.f32 1.0, %v5898_v54 }
 0xaa2   :  { %5899 = vpow2.f32 %v5482_v58 }
 0xaa3   :  { %5901 = vrcp.f32 %v4471_v15  ;;  %v4484_v51 = vand.u32 2147483648, %v4471_v15  ;;  %v4482_v21 = vand.u32 2147483647, %v4471_v15  ;;  %vm4478_vm2 = vweird.f32 %v4471_v15 }
 0xaa5   :  { %v4485_v42 = vor.u32 1.1754944e-38, %v4484_v51  ;;  %vm4483_vm6 = vcmp.eq.f32.partialorder %v4482_v21, 8.507059e+37 }
 0xaa8   :  { %v5900_v47 = vpop.eup %5899 }
 0xaa9   :  { %v5902_v13 = vpop.eup %5901  ;;  %v4472_v59 = vadd.f32 1.0, %v5900_v47 }
 0xaaa   :  { %v4474_v23 = vmul.f32 %v5902_v13, %v4471_v15  ;;  %vm4479_vm1 = vweird.f32 %v5902_v13 }
 0xaab   :  { %5903 = vrcp.f32 %v4472_v59  ;;  %vm4480_vm4 = vmor %vm4478_vm2, %vm4479_vm1  ;;  %v4499_v60 = vand.u32 2147483648, %v4472_v59  ;;  %v4497_v55 = vand.u32 2147483647, %v4472_v59  ;;  %vm4493_vm8 = vweird.f32 %v4472_v59 }
 0xaac   :  { %v4475_v32 = vsub.f32 1.0, %v4474_v23 }
 0xaad   :  { %v4500_v41 = vor.u32 1.1754944e-38, %v4499_v60  ;;  %vm4498_vm10 = vcmp.eq.f32.partialorder %v4497_v55, 8.507059e+37 }
 0xaae   :  { %v4476_v11 = vmul.f32 %v5902_v13, %v4475_v32 }
 0xab0   :  { %v4477_v43 = vadd.f32 %v5902_v13, %v4476_v11 }
 0xab1   :  { %v5904_v26 = vpop.eup %5903 }
 0xab2   :  { %v4481_v12 = vsel %vm4480_vm4, %v5902_v13, %v4477_v43  ;;  %v4489_v2 = vmul.f32 %v5904_v26, %v4472_v59  ;;  %vm4494_vm7 = vweird.f32 %v5904_v26 }
 0xab3   :  { %v4486_v8 = vsel %vm4483_vm6, %v4485_v42, %v4481_v12  ;;  %vm4495_vm9 = vmor %vm4493_vm8, %vm4494_vm7 }
 0xab4   :  { %v4503_v0 = vsel %vm4464_vm3, %v4486_v8, 0.0  ;;  %v4490_v17 = vsub.f32 1.0, %v4489_v2 }
 0xab5   :  { %v4505_v18 = vsel %vm4457_vm5, %v4462_v61, %v4503_v0 }
 0xab6   :  { %4507 = vst [vmem:[%s8789_s16] sm:$0xff] %v4505_v18  ;;  %v4491_v29 = vmul.f32 %v5904_v26, %v4490_v17 }
 0xab8   :  { %v4492_v63 = vadd.f32 %v5904_v26, %v4491_v29 }
 0xaba   :  { %v4496_v14 = vsel %vm4495_vm9, %v5904_v26, %v4492_v63 }
 0xabb   :  { %v4501_v5 = vsel %vm4498_vm10, %v4500_v41, %v4496_v14 }
 0xabc   :  { %v4504_v27 = vsel %vm4464_vm3, %v4501_v5, 0.0 }
 0xabd   :  { %v4506_v22 = vsel %vm4457_vm5, %v4463_v57, %v4504_v27 }
 0xabe   :  { %4508 = vst [vmem:[%s8789_s16 + $0x8] sm:$0xff] %v4506_v22 }

</bundles_post_ra>
